<compile_context>
chip_gen: v6e
topology: v6e:2x2x1
jax: 0.10.0
libtpu: 0.0.40
codegen_flags: <defaults>
</compile_context>

<pallas_src>
import functools

import jax
import jax.numpy as jnp
from jax.experimental import pallas as pl
from jax.experimental.pallas import tpu as pltpu

HIDDEN = 64
MB = 1024 * 1024

# rows inside the packed bf16 weight buffer [2*HIDDEN, HIDDEN]
RW_W2, RW_W3 = 0, HIDDEN
# rows inside the packed f32 bias/head buffer [5, HIDDEN]
RB_B1, RB_B2, RB_B3, RB_WL, RB_BL = 0, 1, 2, 3, 4
B_ROWS = 5


def _round_up(x, m):
    return ((x + m - 1) // m) * m


@functools.lru_cache(maxsize=1)
def _vmem_capacity_bytes():
    """Per-core VMEM capacity; conservative (v7x) fallback if the query fails."""
    try:
        return int(pltpu.get_tpu_info().vmem_capacity_bytes)
    except Exception:
        return 64 * MB


# ------------------------------------------------------------------ kernels

def gnn_fused_kernel(a_ref, xw_ref, w_ref, b_ref, p_ref, out_ref):
    """All 3 GCN layers + mean pool + Linear(64,1) with A resident in VMEM.

    A (bf16) is read once; each layer = one A-sized MXU matmul (A @ HW) plus a
    tiny [N,64]@[64,64] feature transform.  Accumulation stays f32."""
    # layer 1: relu(A @ (x*w1) + b1)   -- xw precomputed in the wrapper (bf16)
    h = jnp.dot(a_ref[...], xw_ref[...], preferred_element_type=jnp.float32)
    h = jnp.maximum(h + b_ref[RB_B1:RB_B1 + 1, :], 0.0)

    # layer 2: relu(A @ (h @ w2) + b2)
    hw = jnp.dot(h.astype(jnp.bfloat16), w_ref[RW_W2:RW_W2 + HIDDEN, :],
                 preferred_element_type=jnp.float32).astype(jnp.bfloat16)
    h = jnp.dot(a_ref[...], hw, preferred_element_type=jnp.float32)
    h = jnp.maximum(h + b_ref[RB_B2:RB_B2 + 1, :], 0.0)

    # layer 3 (no relu): A @ (h @ w3) + b3
    hw = jnp.dot(h.astype(jnp.bfloat16), w_ref[RW_W3:RW_W3 + HIDDEN, :],
                 preferred_element_type=jnp.float32).astype(jnp.bfloat16)
    h = jnp.dot(a_ref[...], hw, preferred_element_type=jnp.float32)
    h = h + b_ref[RB_B3:RB_B3 + 1, :]

    # global_mean_pool + Linear(64 -> 1) head (kept f32 for accuracy)
    pooled = jnp.dot(p_ref[...], h, preferred_element_type=jnp.float32)   # [G, H]
    out_ref[...] = (pooled * b_ref[RB_WL:RB_WL + 1, :]).sum(-1, keepdims=True) \
        + b_ref[RB_BL:RB_BL + 1, 0:1]


def gcn1_stream_kernel(a_ref, xw_ref, w_ref, b_ref, o_ref):
    """Layer 1 for one A row tile; epilogue folds layer-2's feature transform
    so the next kernel is a single A_tile @ HW matmul.  Output is bf16."""
    h = jnp.dot(a_ref[...], xw_ref[...], preferred_element_type=jnp.float32)
    h = jnp.maximum(h + b_ref[RB_B1:RB_B1 + 1, :], 0.0)
    o_ref[...] = jnp.dot(h.astype(jnp.bfloat16), w_ref[RW_W2:RW_W2 + HIDDEN, :],
                         preferred_element_type=jnp.float32).astype(jnp.bfloat16)


def gcn2_stream_kernel(a_ref, hw_ref, w_ref, b_ref, o_ref):
    """Layer 2 for one A row tile; epilogue folds layer-3's feature transform."""
    h = jnp.dot(a_ref[...], hw_ref[...], preferred_element_type=jnp.float32)
    h = jnp.maximum(h + b_ref[RB_B2:RB_B2 + 1, :], 0.0)
    o_ref[...] = jnp.dot(h.astype(jnp.bfloat16), w_ref[RW_W3:RW_W3 + HIDDEN, :],
                         preferred_element_type=jnp.float32).astype(jnp.bfloat16)


def gcn3_pool_stream_kernel(a_ref, hw_ref, b_ref, p_ref, o_ref):
    """Layer 3 (no relu) fused with mean pool; each tile writes an independent
    partial [G, H] so the grid axis stays 'parallel' (megacore friendly)."""
    z = jnp.dot(a_ref[...], hw_ref[...], preferred_element_type=jnp.float32)
    z = z + b_ref[RB_B3:RB_B3 + 1, :]
    o_ref[...] = jnp.dot(p_ref[...], z, preferred_element_type=jnp.float32)[None, :, :]


# ------------------------------------------------------------------ wrapper

def _pack_params(params):
    (w1, b1, w2, b2, w3, b3, wl, bl) = params
    weights = jnp.concatenate([w2, w3], axis=0).astype(jnp.bfloat16)   # [2H, H] bf16
    bl_row = jnp.zeros((1, HIDDEN), jnp.float32).at[0, 0].set(bl[0, 0])
    biases = jnp.concatenate(
        [b1, b2, b3, wl.reshape(1, HIDDEN), bl_row], axis=0)           # [5, H] f32
    return weights, biases


def gnn_forward(a_norm, x, params, pool, *, force_streamed=False):
    """Full GNN forward.  a_norm: [N,N] f32, x: [N,1] f32, pool: [G,N] f32.
    Returns [G, 1]."""
    (w1, b1, w2, b2, w3, b3, wl, bl) = params
    n = a_norm.shape[0]
    g = pool.shape[0]

    vmem_cap = _vmem_capacity_bytes()
    # generation-aware scoped-VMEM limit: ~48 MiB on v7x (64 MiB physical),
    # ~100 MiB on v5e / v6e (128 MiB physical).
    vmem_limit = max(min(vmem_cap - 16 * MB, 100 * MB), 32 * MB)

    weights, biases = _pack_params(params)
    w_shape, b_shape = (2 * HIDDEN, HIDDEN), (B_ROWS, HIDDEN)

    # ---------- decide fused (A resident) vs streamed path ----------
    np_f = max(_round_up(n, 128), 128)
    fused_bytes = (2 * np_f * np_f                  # A bf16
                   + 2 * np_f * HIDDEN              # xw bf16
                   + 3 * 4 * np_f * HIDDEN          # f32 H temporaries
                   + 4 * g * np_f                   # pool matrix
                   + 4 * B_ROWS * HIDDEN + 2 * w_shape[0] * HIDDEN + 1 * MB)
    use_fused = ((not force_streamed)
                 and np_f <= 4096                   # bound in-kernel code size
                 and fused_bytes <= int(0.85 * vmem_limit))

    if use_fused:
        pad = np_f - n
        a_p = jnp.pad(a_norm, ((0, pad), (0, pad))).astype(jnp.bfloat16)
        xw = (jnp.pad(x, ((0, pad), (0, 0))) * w1).astype(jnp.bfloat16)   # [Np, H]
        pool_p = jnp.pad(pool, ((0, 0), (0, pad)))

        return pl.pallas_call(
            gnn_fused_kernel,
            out_shape=jax.ShapeDtypeStruct((g, 1), jnp.float32),
            grid=(1,),
            in_specs=[
                pl.BlockSpec((np_f, np_f), lambda i: (0, 0)),
                pl.BlockSpec((np_f, HIDDEN), lambda i: (0, 0)),
                pl.BlockSpec(w_shape, lambda i: (0, 0)),
                pl.BlockSpec(b_shape, lambda i: (0, 0)),
                pl.BlockSpec((g, np_f), lambda i: (0, 0)),
            ],
            out_specs=pl.BlockSpec((g, 1), lambda i: (0, 0)),
            compiler_params=pltpu.CompilerParams(
                dimension_semantics=("arbitrary",),
                vmem_limit_bytes=vmem_limit),
            cost_estimate=pl.CostEstimate(
                flops=3 * 2 * np_f * np_f * HIDDEN + 2 * 2 * np_f * HIDDEN * HIDDEN,
                transcendentals=0,
                bytes_accessed=2 * np_f * np_f + 2 * np_f * HIDDEN + 4 * g * np_f),
        )(a_p, xw, weights, biases, pool_p)

    # ---------- streamed fallback: A row tiles, one big matmul per tile ----------
    tm = 256
    if 3 * tm * max(_round_up(n, tm), tm) * 2 > vmem_limit // 2:
        tm = 128      # halves per-step VMEM; no MXU cost (mem-bound, and v5e MXU is 128-wide)
    np_s = max(_round_up(n, tm), tm)
    pad = np_s - n
    num_tiles = np_s // tm

    a_p = jnp.pad(a_norm, ((0, pad), (0, pad))).astype(jnp.bfloat16)
    xw = (jnp.pad(x, ((0, pad), (0, 0))) * w1).astype(jnp.bfloat16)       # hoisted layer-1 transform
    pool_p = jnp.pad(pool, ((0, 0), (0, pad)))

    # deeper pipelining on the dominant (DMA-bound) A stream, if supported
    try:
        a_spec = pl.BlockSpec((tm, np_s), lambda i: (i, 0),
                              pipeline_mode=pl.Buffered(3))
    except Exception:
        a_spec = pl.BlockSpec((tm, np_s), lambda i: (i, 0))

    res_spec = pl.BlockSpec((np_s, HIDDEN), lambda i: (0, 0))   # resident bf16 HW
    w_spec = pl.BlockSpec(w_shape, lambda i: (0, 0))
    b_spec = pl.BlockSpec(b_shape, lambda i: (0, 0))
    row_out = pl.BlockSpec((tm, HIDDEN), lambda i: (i, 0))

    parallel = pltpu.CompilerParams(
        dimension_semantics=("parallel",), vmem_limit_bytes=vmem_limit)

    mm_flops = 2 * np_s * np_s * HIDDEN
    ft_flops = 2 * np_s * HIDDEN * HIDDEN
    a_bytes = 2 * np_s * np_s
    h_bytes = 2 * np_s * HIDDEN

    hw1 = pl.pallas_call(
        gcn1_stream_kernel,
        out_shape=jax.ShapeDtypeStruct((np_s, HIDDEN), jnp.bfloat16),
        grid=(num_tiles,),
        in_specs=[a_spec, res_spec, w_spec, b_spec],
        out_specs=row_out,
        compiler_params=parallel,
        cost_estimate=pl.CostEstimate(flops=mm_flops + ft_flops, transcendentals=0,
                                      bytes_accessed=a_bytes + 2 * h_bytes),
    )(a_p, xw, weights, biases)

    hw2 = pl.pallas_call(
        gcn2_stream_kernel,
        out_shape=jax.ShapeDtypeStruct((np_s, HIDDEN), jnp.bfloat16),
        grid=(num_tiles,),
        in_specs=[a_spec, res_spec, w_spec, b_spec],
        out_specs=row_out,
        compiler_params=parallel,
        cost_estimate=pl.CostEstimate(flops=mm_flops + ft_flops, transcendentals=0,
                                      bytes_accessed=a_bytes + 2 * h_bytes),
    )(a_p, hw1, weights, biases)

    partials = pl.pallas_call(
        gcn3_pool_stream_kernel,
        out_shape=jax.ShapeDtypeStruct((num_tiles, g, HIDDEN), jnp.float32),
        grid=(num_tiles,),
        in_specs=[a_spec, res_spec, b_spec,
                  pl.BlockSpec((g, tm), lambda i: (0, i))],
        out_specs=pl.BlockSpec((1, g, HIDDEN), lambda i: (i, 0, 0)),
        compiler_params=parallel,
        cost_estimate=pl.CostEstimate(
            flops=mm_flops + 2 * g * np_s * HIDDEN, transcendentals=0,
            bytes_accessed=a_bytes + h_bytes + 4 * g * np_s + 4 * num_tiles * g * HIDDEN),
    )(a_p, hw2, biases, pool_p)

    pooled = partials.sum(axis=0)                      # tiny [num_tiles, G, H] reduce
    return pooled @ wl + bl                            # 64->1 head (negligible XLA op)


# ----------------- plain-JAX glue: graph preprocessing -----------------

def build_norm_adjacency(edge_index, num_nodes):
    """Dense GCN-normalized adjacency with self-loops (GCNConv default)."""
    row, col = edge_index[0], edge_index[1]            # messages flow row -> col
    a = jnp.zeros((num_nodes, num_nodes), jnp.float32)
    a = a.at[col, row].add(1.0)                        # A[dst, src]
    a = a + jnp.eye(num_nodes, dtype=jnp.float32)      # add self-loops
    deg = a.sum(axis=1)
    dinv = jax.lax.rsqrt(deg)
    return dinv[:, None] * a * dinv[None, :]


def build_mean_pool(batch, num_graphs):
    """P[g, i] = 1/|graph g| if node i belongs to graph g else 0."""
    onehot = (batch[None, :] == jnp.arange(num_graphs)[:, None]).astype(jnp.float32)
    counts = onehot.sum(axis=1, keepdims=True)
    return onehot / jnp.maximum(counts, 1.0)


def init_params(key):
    ks = jax.random.split(key, 8)
    def w(k, shape):
        return (0.1 * jax.random.normal(k, shape)).astype(jnp.float32)
    w1 = w(ks[0], (1, HIDDEN));      b1 = w(ks[1], (1, HIDDEN))
    w2 = w(ks[2], (HIDDEN, HIDDEN)); b2 = w(ks[3], (1, HIDDEN))
    w3 = w(ks[4], (HIDDEN, HIDDEN)); b3 = w(ks[5], (1, HIDDEN))
    wl = w(ks[6], (HIDDEN, 1));      bl = w(ks[7], (1, 1))
    return (w1, b1, w2, b2, w3, b3, wl, bl)


def gnn_reference(a_norm, x, params, pool):
    """Pure-JAX f32 reference with the exact PyTorch GCNConv semantics."""
    (w1, b1, w2, b2, w3, b3, wl, bl) = params
    h = jnp.maximum(a_norm @ (x @ w1) + b1, 0.0)
    h = jnp.maximum(a_norm @ (h @ w2) + b2, 0.0)
    h = a_norm @ (h @ w3) + b3
    return (pool @ h) @ wl + bl


if __name__ == "__main__":
    key = jax.random.PRNGKey(0)
    kparam, kx = jax.random.split(key)

    # Two ring graphs of 160 nodes each -> N=320 (fused path; streamed path also tested).
    nodes_per_graph, num_graphs = 160, 2
    num_nodes = nodes_per_graph * num_graphs

    edges = []
    for gidx in range(num_graphs):
        off = gidx * nodes_per_graph
        for i in range(nodes_per_graph):
            j = (i + 1) % nodes_per_graph
            edges.append((off + i, off + j))
            edges.append((off + j, off + i))   # undirected: both directions
    edge_index = jnp.array(edges, dtype=jnp.int32).T          # [2, E]
    batch = jnp.repeat(jnp.arange(num_graphs, dtype=jnp.int32), nodes_per_graph)

    x = jax.random.normal(kx, (num_nodes, 1), dtype=jnp.float32)   # data.x: [N, 1]

    a_norm = build_norm_adjacency(edge_index, num_nodes)
    pool = build_mean_pool(batch, num_graphs)
    params = init_params(kparam)

    ref = gnn_reference(a_norm, x, params, pool)
    fwd = jax.jit(gnn_forward, static_argnames=("force_streamed",))

    # fused (A-resident, single pallas_call) path
    out_fused = fwd(a_norm, x, params, pool, force_streamed=False)
    jax.block_until_ready(out_fused)
    assert out_fused.shape == (num_graphs, 1)
    assert jnp.allclose(out_fused, ref, rtol=5e-2, atol=2e-2), (out_fused, ref)

    # streamed (row-tiled) fallback path
    out_stream = fwd(a_norm, x, params, pool, force_streamed=True)
    jax.block_until_ready(out_stream)
    assert jnp.allclose(out_stream, ref, rtol=5e-2, atol=2e-2), (out_stream, ref)

    print("KERNEL_OK")
</pallas_src>

<mosaic_0001>
module attributes {stable_mosaic.version = 11 : i64} {
  func.func @gnn_fused_kernel(%arg0: i32, %arg1: memref<384x384xbf16, #tpu.memory_space<vmem>>, %arg2: memref<384x64xbf16, #tpu.memory_space<vmem>>, %arg3: memref<128x64xbf16, #tpu.memory_space<vmem>>, %arg4: memref<5x64xf32, #tpu.memory_space<vmem>>, %arg5: memref<2x384xf32, #tpu.memory_space<vmem>>, %arg6: memref<2x1xf32, #tpu.memory_space<vmem>>) attributes {dimension_semantics = [#tpu.dimension_semantics<arbitrary>], iteration_bounds = array<i64: 1>, scalar_prefetch = 0 : i64, scratch_operands = 0 : i64, tpu.core_type = #tpu.core_type<tc>, window_params = [{pipeline_mode = #tpu.pipeline_mode<synchronous>, transform_indices = @transform_0, window_bounds = array<i64: 384, 384>}, {pipeline_mode = #tpu.pipeline_mode<synchronous>, transform_indices = @transform_1, window_bounds = array<i64: 384, 64>}, {pipeline_mode = #tpu.pipeline_mode<synchronous>, transform_indices = @transform_2, window_bounds = array<i64: 128, 64>}, {pipeline_mode = #tpu.pipeline_mode<synchronous>, transform_indices = @transform_3, window_bounds = array<i64: 5, 64>}, {pipeline_mode = #tpu.pipeline_mode<synchronous>, transform_indices = @transform_4, window_bounds = array<i64: 2, 384>}, {pipeline_mode = #tpu.pipeline_mode<synchronous>, transform_indices = @transform_5, window_bounds = array<i64: 2, 1>}]} {
    %c0 = arith.constant 0 : index
    %c0_0 = arith.constant 0 : index
    %0 = vector.load %arg1[%c0, %c0_0] : memref<384x384xbf16, #tpu.memory_space<vmem>>, vector<384x384xbf16>
    %c0_1 = arith.constant 0 : index
    %c0_2 = arith.constant 0 : index
    %1 = vector.load %arg2[%c0_1, %c0_2] : memref<384x64xbf16, #tpu.memory_space<vmem>>, vector<384x64xbf16>
    %cst = arith.constant dense<0.000000e+00> : vector<384x64xf32>
    %2 = tpu.matmul %0, %1, %cst {dimension_numbers = #tpu.dot_dimension_numbers<[1], [0], [0], [1], [0, 0, 1, 1], [], []>} : vector<384x384xbf16>, vector<384x64xbf16>, vector<384x64xf32> -> vector<384x64xf32>
    %c0_3 = arith.constant 0 : index
    %c0_4 = arith.constant 0 : index
    %3 = vector.load %arg4[%c0_3, %c0_4] : memref<5x64xf32, #tpu.memory_space<vmem>>, vector<1x64xf32>
    %4 = vector.broadcast %3 : vector<1x64xf32> to vector<384x64xf32>
    %5 = arith.addf %2, %4 : vector<384x64xf32>
    %cst_5 = arith.constant 0.000000e+00 : f32
    %6 = vector.broadcast %cst_5 : f32 to vector<384x64xf32>
    %7 = arith.maximumf %5, %6 : vector<384x64xf32>
    %8 = arith.truncf %7 : vector<384x64xf32> to vector<384x64xbf16>
    %c0_6 = arith.constant 0 : index
    %c0_7 = arith.constant 0 : index
    %9 = vector.load %arg3[%c0_6, %c0_7] : memref<128x64xbf16, #tpu.memory_space<vmem>>, vector<64x64xbf16>
    %cst_8 = arith.constant dense<0.000000e+00> : vector<384x64xf32>
    %10 = tpu.matmul %8, %9, %cst_8 {dimension_numbers = #tpu.dot_dimension_numbers<[1], [0], [0], [1], [0, 0, 1, 1], [], []>} : vector<384x64xbf16>, vector<64x64xbf16>, vector<384x64xf32> -> vector<384x64xf32>
    %11 = arith.truncf %10 : vector<384x64xf32> to vector<384x64xbf16>
    %c0_9 = arith.constant 0 : index
    %c0_10 = arith.constant 0 : index
    %12 = vector.load %arg1[%c0_9, %c0_10] : memref<384x384xbf16, #tpu.memory_space<vmem>>, vector<384x384xbf16>
    %cst_11 = arith.constant dense<0.000000e+00> : vector<384x64xf32>
    %13 = tpu.matmul %12, %11, %cst_11 {dimension_numbers = #tpu.dot_dimension_numbers<[1], [0], [0], [1], [0, 0, 1, 1], [], []>} : vector<384x384xbf16>, vector<384x64xbf16>, vector<384x64xf32> -> vector<384x64xf32>
    %c1 = arith.constant 1 : index
    %c0_12 = arith.constant 0 : index
    %14 = vector.load %arg4[%c1, %c0_12] : memref<5x64xf32, #tpu.memory_space<vmem>>, vector<1x64xf32>
    %15 = vector.broadcast %14 : vector<1x64xf32> to vector<384x64xf32>
    %16 = arith.addf %13, %15 : vector<384x64xf32>
    %cst_13 = arith.constant 0.000000e+00 : f32
    %17 = vector.broadcast %cst_13 : f32 to vector<384x64xf32>
    %18 = arith.maximumf %16, %17 : vector<384x64xf32>
    %19 = arith.truncf %18 : vector<384x64xf32> to vector<384x64xbf16>
    %c64 = arith.constant 64 : index
    %c0_14 = arith.constant 0 : index
    %20 = vector.load %arg3[%c64, %c0_14] : memref<128x64xbf16, #tpu.memory_space<vmem>>, vector<64x64xbf16>
    %cst_15 = arith.constant dense<0.000000e+00> : vector<384x64xf32>
    %21 = tpu.matmul %19, %20, %cst_15 {dimension_numbers = #tpu.dot_dimension_numbers<[1], [0], [0], [1], [0, 0, 1, 1], [], []>} : vector<384x64xbf16>, vector<64x64xbf16>, vector<384x64xf32> -> vector<384x64xf32>
    %22 = arith.truncf %21 : vector<384x64xf32> to vector<384x64xbf16>
    %c0_16 = arith.constant 0 : index
    %c0_17 = arith.constant 0 : index
    %23 = vector.load %arg1[%c0_16, %c0_17] : memref<384x384xbf16, #tpu.memory_space<vmem>>, vector<384x384xbf16>
    %cst_18 = arith.constant dense<0.000000e+00> : vector<384x64xf32>
    %24 = tpu.matmul %23, %22, %cst_18 {dimension_numbers = #tpu.dot_dimension_numbers<[1], [0], [0], [1], [0, 0, 1, 1], [], []>} : vector<384x384xbf16>, vector<384x64xbf16>, vector<384x64xf32> -> vector<384x64xf32>
    %c2 = arith.constant 2 : index
    %c0_19 = arith.constant 0 : index
    %25 = vector.load %arg4[%c2, %c0_19] : memref<5x64xf32, #tpu.memory_space<vmem>>, vector<1x64xf32>
    %26 = vector.broadcast %25 : vector<1x64xf32> to vector<384x64xf32>
    %27 = arith.addf %24, %26 : vector<384x64xf32>
    %c0_20 = arith.constant 0 : index
    %c0_21 = arith.constant 0 : index
    %28 = vector.load %arg5[%c0_20, %c0_21] : memref<2x384xf32, #tpu.memory_space<vmem>>, vector<2x384xf32>
    %cst_22 = arith.constant dense<0.000000e+00> : vector<2x64xf32>
    %29 = tpu.matmul %28, %27, %cst_22 {dimension_numbers = #tpu.dot_dimension_numbers<[1], [0], [0], [1], [0, 0, 1, 1], [], []>} : vector<2x384xf32>, vector<384x64xf32>, vector<2x64xf32> -> vector<2x64xf32>
    %c3 = arith.constant 3 : index
    %c0_23 = arith.constant 0 : index
    %30 = vector.load %arg4[%c3, %c0_23] : memref<5x64xf32, #tpu.memory_space<vmem>>, vector<1x64xf32>
    %31 = vector.broadcast %30 : vector<1x64xf32> to vector<2x64xf32>
    %32 = arith.mulf %29, %31 : vector<2x64xf32>
    %cst_24 = arith.constant dense<0.000000e+00> : vector<2xf32>
    %33 = vector.multi_reduction <add>, %32, %cst_24 [1] : vector<2x64xf32> to vector<2xf32>
    %34 = vector.shape_cast %33 : vector<2xf32> to vector<2x1xf32>
    %c4 = arith.constant 4 : index
    %c0_25 = arith.constant 0 : index
    %35 = vector.load %arg4[%c4, %c0_25] : memref<5x64xf32, #tpu.memory_space<vmem>>, vector<1x1xf32>
    %36 = vector.broadcast %35 : vector<1x1xf32> to vector<2x1xf32>
    %37 = arith.addf %34, %36 : vector<2x1xf32>
    %c0_26 = arith.constant 0 : index
    %c0_27 = arith.constant 0 : index
    %38 = vector.load %arg6[%c0_26, %c0_27] : memref<2x1xf32, #tpu.memory_space<vmem>>, vector<2x1xf32>
    tpu.vector_store %arg6[%c0_26, %c0_27], %37 {strides = array<i32>} : memref<2x1xf32, #tpu.memory_space<vmem>>, vector<2x1xf32>,
    return
  }
  func.func @transform_0(%arg0: i32) -> (i32, i32) {
    %c0_i32 = arith.constant 0 : i32
    %c0_i32_0 = arith.constant 0 : i32
    %c0_i32_1 = arith.constant 0 : i32
    return %c0_i32, %c0_i32_0 : i32, i32
  }
  func.func @transform_1(%arg0: i32) -> (i32, i32) {
    %c0_i32 = arith.constant 0 : i32
    %c0_i32_0 = arith.constant 0 : i32
    %c0_i32_1 = arith.constant 0 : i32
    return %c0_i32, %c0_i32_0 : i32, i32
  }
  func.func @transform_2(%arg0: i32) -> (i32, i32) {
    %c0_i32 = arith.constant 0 : i32
    %c0_i32_0 = arith.constant 0 : i32
    %c0_i32_1 = arith.constant 0 : i32
    return %c0_i32, %c0_i32_0 : i32, i32
  }
  func.func @transform_3(%arg0: i32) -> (i32, i32) {
    %c0_i32 = arith.constant 0 : i32
    %c0_i32_0 = arith.constant 0 : i32
    %c0_i32_1 = arith.constant 0 : i32
    return %c0_i32, %c0_i32_0 : i32, i32
  }
  func.func @transform_4(%arg0: i32) -> (i32, i32) {
    %c0_i32 = arith.constant 0 : i32
    %c0_i32_0 = arith.constant 0 : i32
    %c0_i32_1 = arith.constant 0 : i32
    return %c0_i32, %c0_i32_0 : i32, i32
  }
  func.func @transform_5(%arg0: i32) -> (i32, i32) {
    %c0_i32 = arith.constant 0 : i32
    %c0_i32_0 = arith.constant 0 : i32
    %c0_i32_1 = arith.constant 0 : i32
    return %c0_i32, %c0_i32_0 : i32, i32
  }
}

</mosaic_0001>

<bundles_post_ra>
// kernel: gnn_forward.1
= control target key start
LH: loop header
LB: loop body
LE: loop exit
PB: predicated region body
PF: predicated region fallthrough
CT: control target
= control target key end

     0   :  { %v4067_v0 = vmov 0   ;;  %vm1252_vm0 = vcmask 523264   ;;  %vm4070_vm1 = vmmov 0   ;;  %vm3076_vm2 = vcmask 517120   ;;  %s5370_s1 = inlined_call_operand.vmem [shape: bf16[384,64], index: 1, kind: input, shape index: {}]   ;;  %s5371_s0 = inlined_call_operand.vmem [shape: bf16[384,384], index: 0, kind: input, shape index: {}]   ;;  %s5372_s2 = inlined_call_operand.vmem [shape: bf16[128,64], index: 2, kind: input, shape index: {}]   ;;  %s5373_s3 = inlined_call_operand.vmem [shape: f32[5,64], index: 3, kind: input, shape index: {}]   ;;  %s5374_s4 = inlined_call_operand.vmem [shape: f32[2,384], index: 4, kind: input, shape index: {}]   ;;  %s5375_s5 = inlined_call_operand.vmem [shape: f32[2,1], index: 5, kind: output, shape index: {}]  }
   0x1   :  { %698 = vmatprep.subr.bf16.mxu0 %v4067_v0  ;;  %v3796_v1 = vld [vmem:[%s5370_s1 + $0x38] sm:$0xff]   ;;  %v3797_v2 = vld [vmem:[%s5370_s1 + $0x30] sm:$0xff]   ;;  %v3798_v3 = vld [vmem:[%s5370_s1 + $0x28] sm:$0xff]   ;;  %vm3086_vm3 = vcmask 1024  }
   0x2   :  { %699 = vmatpush1.bf16.msra.mxu0 %v3796_v1  ;;  %v3804_v4 = vld [vmem:[%s5370_s1 + $0xb8] sm:$0xff]   ;;  %v3799_v5 = vld [vmem:[%s5370_s1 + $0x20] sm:$0xff]   ;;  %v3806_v6 = vld [vmem:[%s5370_s1 + $0xb0] sm:$0xff]  }
   0x3   :  { %700 = vmatprep.subr.bf16.mxu0 %v4067_v0  ;;  %3453 = vmatprep.subr.bf16.mxu1 %v3804_v4  ;;  %v3808_v7 = vld [vmem:[%s5370_s1 + $0xa8] sm:$0xff]   ;;  %v3800_v8 = vld [vmem:[%s5370_s1 + $0x18] sm:$0xff]   ;;  %v3810_v9 = vld [vmem:[%s5370_s1 + $0xa0] sm:$0xff]  }
   0x4   :  { %3454 = vmatpush3.bf16.msra.mxu1 %v3804_v4  ;;  %v3801_v10 = vld [vmem:[%s5370_s1 + $0x10] sm:$0xff]   ;;  %v3812_v11 = vld [vmem:[%s5370_s1 + $0x98] sm:$0xff]   ;;  %v3802_v12 = vld [vmem:[%s5370_s1 + $0x8] sm:$0xff]  }
   0x5   :  { %3455 = vmatprep.subr.bf16.mxu1 %v3806_v6  ;;  %v3814_v13 = vld [vmem:[%s5370_s1 + $0x90] sm:$0xff]   ;;  %v3803_v16 = vld [vmem:[%s5370_s1] sm:$0xff]   ;;  %v3816_v17 = vld [vmem:[%s5370_s1 + $0x88] sm:$0xff]  }
   0x6   :  { %701 = vmatpush1.bf16.msra.mxu0 %v3797_v2  ;;  %v3820_v14 = vld [vmem:[%s5371_s0 + $0x4] ss:$12 sps:$4 sm:$0xff]   ;;  %v4153_v15 = vld [vmem:[%s5371_s0 + $0x8] ss:$12 sps:$4 sm:$0xff]   ;;  %v3805_v18 = vld [vmem:[%s5370_s1 + $0x78] sm:$0xff]  }
   0x7   :  { %702 = vmatprep.subr.bf16.mxu0 %v4067_v0  ;;  %730 = vmatprep.mubr.bf16.mxu0 %v3820_v14  ;;  %v3818_v19 = vld [vmem:[%s5370_s1 + $0x80] sm:$0xff]   ;;  %v3807_v20 = vld [vmem:[%s5370_s1 + $0x70] sm:$0xff]   ;;  %v3809_v21 = vld [vmem:[%s5370_s1 + $0x68] sm:$0xff]  }
   0x8   :  { %3456 = vmatpush3.bf16.msra.mxu1 %v3806_v6  ;;  %3469 = vmatprep.mubr.bf16.mxu1 %v4153_v15  ;;  %v3824_v22 = vld [vmem:[%s5371_s0 + $0x20] ss:$12 sps:$4 sm:$0xff]   ;;  %v3830_v23 = vld [vmem:[%s5371_s0 + $0x38] ss:$12 sps:$4 sm:$0xff]   ;;  %v3832_v26 = vld [vmem:[%s5371_s0 + $0x50] ss:$12 sps:$4 sm:$0xff]  }
   0x9   :  { %3457 = vmatprep.subr.bf16.mxu1 %v3808_v7  ;;  %v3811_v24 = vld [vmem:[%s5370_s1 + $0x60] sm:$0xff]   ;;  %v3813_v25 = vld [vmem:[%s5370_s1 + $0x58] sm:$0xff]   ;;  %v3838_v27 = vld [vmem:[%s5371_s0 + $0x68] ss:$12 sps:$4 sm:$0xff]  }
   0xa   :  { %703 = vmatpush1.bf16.msra.mxu0 %v3798_v3  ;;  %v3815_v28 = vld [vmem:[%s5370_s1 + $0x50] sm:$0xff]   ;;  %v3817_v29 = vld [vmem:[%s5370_s1 + $0x48] sm:$0xff]   ;;  %v3846_v31 = vld [vmem:[%s5371_s0 + $0x98] ss:$12 sps:$4 sm:$0xff]  }
   0xb   :  { %704 = vmatprep.subr.bf16.mxu0 %v4067_v0  ;;  %v3840_v30 = vld [vmem:[%s5371_s0 + $0x80] ss:$12 sps:$4 sm:$0xff]   ;;  %v3825_v34 = vld [vmem:[%s5371_s0 + $0x1c] ss:$12 sps:$4 sm:$0xff]   ;;  %v3827_v37 = vld [vmem:[%s5371_s0 + $0x18] ss:$12 sps:$4 sm:$0xff]  }
   0xc   :  { %3458 = vmatpush3.bf16.msra.mxu1 %v3808_v7  ;;  %v3819_v32 = vld [vmem:[%s5370_s1 + $0x40] sm:$0xff]   ;;  %v3848_v35 = vld [vmem:[%s5371_s0 + $0xb0] ss:$12 sps:$4 sm:$0xff]   ;;  %v3854_v36 = vld [vmem:[%s5371_s0 + $0xc8] ss:$12 sps:$4 sm:$0xff]  }
   0xd   :  { %3459 = vmatprep.subr.bf16.mxu1 %v3810_v9  ;;  %v3823_v33 = vld [vmem:[%s5371_s0] ss:$12 sps:$4 sm:$0xff]   ;;  %v3862_v40 = vld [vmem:[%s5371_s0 + $0xf8] ss:$12 sps:$4 sm:$0xff]   ;;  %v3831_v41 = vld [vmem:[%s5371_s0 + $0x30] ss:$12 sps:$4 sm:$0xff]  }
   0xe   :  { %705 = vmatpush1.bf16.msra.mxu0 %v3799_v5  ;;  %v3828_v38 = vld [vmem:[%s5371_s0 + $0x34] ss:$12 sps:$4 sm:$0xff]   ;;  %v3833_v42 = vld [vmem:[%s5371_s0 + $0x4c] ss:$12 sps:$4 sm:$0xff]   ;;  %v3864_v43 = vld [vmem:[%s5371_s0 + $0x110] ss:$12 sps:$4 sm:$0xff]  }
   0xf   :  { %706 = vmatprep.subr.bf16.mxu0 %v4067_v0  ;;  %v3856_v39 = vld [vmem:[%s5371_s0 + $0xe0] ss:$12 sps:$4 sm:$0xff]   ;;  %v3870_v44 = vld [vmem:[%s5371_s0 + $0x128] ss:$12 sps:$4 sm:$0xff]   ;;  %v3836_v46 = vld [vmem:[%s5371_s0 + $0x64] ss:$12 sps:$4 sm:$0xff]  }
  0x10   :  { %3460 = vmatpush3.bf16.msra.mxu1 %v3810_v9  ;;  %v3835_v45 = vld [vmem:[%s5371_s0 + $0x48] ss:$12 sps:$4 sm:$0xff]   ;;  %v3872_v47 = vld [vmem:[%s5371_s0 + $0x140] ss:$12 sps:$4 sm:$0xff]   ;;  %v3878_v48 = vld [vmem:[%s5371_s0 + $0x158] ss:$12 sps:$4 sm:$0xff]  }
  0x11   :  { %3461 = vmatprep.subr.bf16.mxu1 %v3812_v11  ;;  %v3839_v49 = vld [vmem:[%s5371_s0 + $0x60] ss:$12 sps:$4 sm:$0xff]   ;;  %v3841_v50 = vld [vmem:[%s5371_s0 + $0x7c] ss:$12 sps:$4 sm:$0xff]   ;;  %v3843_v53 = vld [vmem:[%s5371_s0 + $0x78] ss:$12 sps:$4 sm:$0xff]  }
  0x12   :  { %707 = vmatpush1.bf16.msra.mxu0 %v3800_v8  ;;  %v3880_v51 = vld [vmem:[%s5371_s0 + $0x170] ss:$12 sps:$4 sm:$0xff]   ;;  %v3886_v52 = vld [vmem:[%s5371_s0 + $0x188] ss:$12 sps:$4 sm:$0xff]   ;;  %v3888_v55 = vld [vmem:[%s5371_s0 + $0x1a0] ss:$12 sps:$4 sm:$0xff]  }
  0x13   :  { %708 = vmatprep.subr.bf16.mxu0 %v4067_v0  ;;  %v3844_v54 = vld [vmem:[%s5371_s0 + $0x94] ss:$12 sps:$4 sm:$0xff]   ;;  %v3894_v56 = vld [vmem:[%s5371_s0 + $0x1b8] ss:$12 sps:$4 sm:$0xff]   ;;  %v3847_v57 = vld [vmem:[%s5371_s0 + $0x90] ss:$12 sps:$4 sm:$0xff]  }
  0x14   :  { %3462 = vmatpush3.bf16.msra.mxu1 %v3812_v11  ;;  %v3849_v58 = vld [vmem:[%s5371_s0 + $0xac] ss:$12 sps:$4 sm:$0xff]   ;;  %v3896_v59 = vld [vmem:[%s5371_s0 + $0x1d0] ss:$12 sps:$4 sm:$0xff]   ;;  %v3902_v60 = vld [vmem:[%s5371_s0 + $0x1e8] ss:$12 sps:$4 sm:$0xff]  }
  0x15   :  { %3463 = vmatprep.subr.bf16.mxu1 %v3814_v13  ;;  %v3851_v61 = vld [vmem:[%s5371_s0 + $0xa8] ss:$12 sps:$4 sm:$0xff]   ;;  %v3852_v62 = vld [vmem:[%s5371_s0 + $0xc4] ss:$12 sps:$4 sm:$0xff]   ;;  %v3904_v63 = vld [vmem:[%s5371_s0 + $0x200] ss:$12 sps:$4 sm:$0xff]  }
  0x16   :  { %709 = vmatpush1.bf16.msra.mxu0 %v3801_v10  ;;  %v3910_v1 = vld [vmem:[%s5371_s0 + $0x218] ss:$12 sps:$4 sm:$0xff]   ;;  %v3855_v2 = vld [vmem:[%s5371_s0 + $0xc0] ss:$12 sps:$4 sm:$0xff]   ;;  %v3857_v3 = vld [vmem:[%s5371_s0 + $0xdc] ss:$12 sps:$4 sm:$0xff]  }
  0x17   :  { %710 = vmatprep.subr.bf16.mxu0 %v4067_v0  ;;  %v3912_v4 = vld [vmem:[%s5371_s0 + $0x230] ss:$12 sps:$4 sm:$0xff]   ;;  %v3859_v5 = vld [vmem:[%s5371_s0 + $0xd8] ss:$12 sps:$4 sm:$0xff]   ;;  %v3860_v6 = vld [vmem:[%s5371_s0 + $0xf4] ss:$12 sps:$4 sm:$0xff]  }
  0x18   :  { %3464 = vmatpush3.bf16.msra.mxu1 %v3814_v13  ;;  %v3916_v7 = vld [vmem:[%s5372_s2 + $0x18] sm:$0xff]   ;;  %v3917_v8 = vld [vmem:[%s5372_s2 + $0x10] sm:$0xff]   ;;  %v3918_v9 = vld [vmem:[%s5372_s2 + $0x8] sm:$0xff]  }
  0x19   :  { %3465 = vmatprep.subr.bf16.mxu1 %v3816_v17  ;;  %v3863_v10 = vld [vmem:[%s5371_s0 + $0xf0] ss:$12 sps:$4 sm:$0xff]   ;;  %v3865_v11 = vld [vmem:[%s5371_s0 + $0x10c] ss:$12 sps:$4 sm:$0xff]   ;;  %v3867_v13 = vld [vmem:[%s5371_s0 + $0x108] ss:$12 sps:$4 sm:$0xff]  }
  0x1a   :  { %711 = vmatpush1.bf16.msra.mxu0 %v3802_v12  ;;  %v3919_v12 = vld [vmem:[%s5372_s2] sm:$0xff]  }
  0x1b   :  { %712 = vmatprep.subr.bf16.mxu0 %v4067_v0  ;;  %v3868_v14 = vld [vmem:[%s5371_s0 + $0x124] ss:$12 sps:$4 sm:$0xff]  }
  0x1c   :  { %3466 = vmatpush3.bf16.msra.mxu1 %v3816_v17  ;;  %v3873_v17 = vld [vmem:[%s5371_s0 + $0x13c] ss:$12 sps:$4 sm:$0xff]  }
  0x1d   :  { %3467 = vmatprep.subr.bf16.mxu1 %v3818_v19 }
  0x1e   :  { %713 = vmatpush1.bf16.msra.mxu0 %v3803_v16  ;;  %v3871_v16 = vld [vmem:[%s5371_s0 + $0x120] ss:$12 sps:$4 sm:$0xff]  }
  0x1f   :  { %714 = vmatprep.subr.bf16.mxu0 %v4067_v0 }
  0x20   :  { %3468 = vmatpush3.bf16.msra.mxu1 %v3818_v19  ;;  %v3876_v19 = vld [vmem:[%s5371_s0 + $0x154] ss:$12 sps:$4 sm:$0xff]  }
  0x21   :  { %3517 = vmatprep.subr.bf16.mxu1 %v3916_v7 }
  0x22   :  { %715 = vmatpush2.bf16.msra.mxu0 %v3805_v18  ;;  %v3875_v18 = vld [vmem:[%s5371_s0 + $0x138] ss:$12 sps:$4 sm:$0xff]  }
  0x23   :  { %716 = vmatprep.subr.bf16.mxu0 %v4067_v0  ;;  %3470 = vmatmul.mubr.bf16.vlgmr.msra.gmra.mxu1 %v3824_v22  ;;  %v3883_v22 = vld [vmem:[%s5371_s0 + $0x168] ss:$12 sps:$4 sm:$0xff]  }
  0x24   :  { %3473 = vmatprep.mubr.bf16.mxu1 %v3830_v23  ;;  %3518 = vmatpush3.bf16.msra.mxu1 %v3916_v7  ;;  %v3884_v23 = vld [vmem:[%s5371_s0 + $0x184] ss:$12 sps:$4 sm:$0xff]  }
  0x25   :  { %3519 = vmatprep.subr.bf16.mxu1 %v3917_v8 }
  0x26   :  { %717 = vmatpush2.bf16.msra.mxu0 %v3807_v20  ;;  %v3879_v20 = vld [vmem:[%s5371_s0 + $0x150] ss:$12 sps:$4 sm:$0xff]  }
  0x27   :  { %718 = vmatprep.subr.bf16.mxu0 %v4067_v0 }
  0x28   :  { %3520 = vmatpush3.bf16.msra.mxu1 %v3917_v8 }
  0x29   :  { %3521 = vmatprep.subr.bf16.mxu1 %v3918_v9 }
  0x2a   :  { %719 = vmatpush2.bf16.msra.mxu0 %v3809_v21  ;;  %v3881_v21 = vld [vmem:[%s5371_s0 + $0x16c] ss:$12 sps:$4 sm:$0xff]  }
  0x2b   :  { %720 = vmatprep.subr.bf16.mxu0 %v4067_v0  ;;  %3474 = vmatmul.mubr.bf16.gmra.mxu1 %v3832_v26  ;;  %v3891_v26 = vld [vmem:[%s5371_s0 + $0x198] ss:$12 sps:$4 sm:$0xff]  }
  0x2c   :  { %3477 = vmatprep.mubr.bf16.mxu1 %v3838_v27  ;;  %3522 = vmatpush3.bf16.msra.mxu1 %v3918_v9  ;;  %v3892_v27 = vld [vmem:[%s5371_s0 + $0x1b4] ss:$12 sps:$4 sm:$0xff]  }
  0x2d   :  { %3523 = vmatprep.subr.bf16.mxu1 %v3919_v12 }
  0x2e   :  { %721 = vmatpush2.bf16.msra.mxu0 %v3811_v24  ;;  %v3887_v24 = vld [vmem:[%s5371_s0 + $0x180] ss:$12 sps:$4 sm:$0xff]  }
  0x2f   :  { %722 = vmatprep.subr.bf16.mxu0 %v4067_v0 }
  0x30   :  { %3524 = vmatpush3.bf16.msra.mxu1 %v3919_v12 }
  0x31   :  { %1579 = vmatprep.subr.bf16.mxu1 %v4067_v0 }
  0x32   :  { %723 = vmatpush2.bf16.msra.mxu0 %v3813_v25  ;;  %v3889_v25 = vld [vmem:[%s5371_s0 + $0x19c] ss:$12 sps:$4 sm:$0xff]  }
  0x33   :  { %724 = vmatprep.subr.bf16.mxu0 %v4067_v0  ;;  %3478 = vmatmul.mubr.bf16.gmra.mxu1 %v3840_v30  ;;  %v3899_v30 = vld [vmem:[%s5371_s0 + $0x1c8] ss:$12 sps:$4 sm:$0xff]  }
  0x34   :  { %3481 = vmatprep.mubr.bf16.mxu1 %v3846_v31  ;;  %v3900_v31 = vld [vmem:[%s5371_s0 + $0x1e4] ss:$12 sps:$4 sm:$0xff]  }
  0x36   :  { %725 = vmatpush2.bf16.msra.mxu0 %v3815_v28  ;;  %v3895_v28 = vld [vmem:[%s5371_s0 + $0x1b0] ss:$12 sps:$4 sm:$0xff]  }
  0x37   :  { %726 = vmatprep.subr.bf16.mxu0 %v4067_v0 }
  0x3a   :  { %727 = vmatpush2.bf16.msra.mxu0 %v3817_v29  ;;  %v3897_v29 = vld [vmem:[%s5371_s0 + $0x1cc] ss:$12 sps:$4 sm:$0xff]  }
  0x3b   :  { %728 = vmatprep.subr.bf16.mxu0 %v4067_v0  ;;  %3482 = vmatmul.mubr.bf16.gmra.mxu1 %v3848_v35  ;;  %v3908_v35 = vld [vmem:[%s5371_s0 + $0x214] ss:$12 sps:$4 sm:$0xff]  }
  0x3c   :  { %3485 = vmatprep.mubr.bf16.mxu1 %v3854_v36  ;;  %v3911_v36 = vld [vmem:[%s5371_s0 + $0x210] ss:$12 sps:$4 sm:$0xff]  }
  0x3e   :  { %729 = vmatpush2.bf16.msra.mxu0 %v3819_v32  ;;  %v3903_v32 = vld [vmem:[%s5371_s0 + $0x1e0] ss:$12 sps:$4 sm:$0xff]  }
  0x41   :  { %731 = vmatmul.mubr.bf16.vlgmr.msra.gmra.mxu0 %v3823_v33  ;;  %v3905_v33 = vld [vmem:[%s5371_s0 + $0x1fc] ss:$12 sps:$4 sm:$0xff]  }
  0x42   :  { %738 = vmatprep.mubr.bf16.mxu0 %v3825_v34  ;;  %v3907_v34 = vld [vmem:[%s5371_s0 + $0x1f8] ss:$12 sps:$4 sm:$0xff]  }
  0x43   :  { %3486 = vmatmul.mubr.bf16.gmra.mxu1 %v3856_v39 }
  0x44   :  { %3489 = vmatprep.mubr.bf16.mxu1 %v3862_v40 }
  0x49   :  { %739 = vmatmul.mubr.bf16.gmra.mxu0 %v3827_v37  ;;  %v3913_v37 = vld [vmem:[%s5371_s0 + $0x22c] ss:$12 sps:$4 sm:$0xff]  }
  0x4a   :  { %746 = vmatprep.mubr.bf16.mxu0 %v3828_v38  ;;  %v3915_v38 = vld [vmem:[%s5371_s0 + $0x228] ss:$12 sps:$4 sm:$0xff]  }
  0x4b   :  { %3490 = vmatmul.mubr.bf16.gmra.mxu1 %v3864_v43 }
  0x4c   :  { %3493 = vmatprep.mubr.bf16.mxu1 %v3870_v44 }
  0x51   :  { %747 = vmatmul.mubr.bf16.gmra.mxu0 %v3831_v41  ;;  %v4425_v41 = vld [vmem:[%s5373_s3] ss:$0 sm:$0xff] }
  0x52   :  { %754 = vmatprep.mubr.bf16.mxu0 %v3833_v42 }
  0x53   :  { %3494 = vmatmul.mubr.bf16.gmra.mxu1 %v3872_v47 }
  0x54   :  { %3497 = vmatprep.mubr.bf16.mxu1 %v3878_v48 }
  0x59   :  { %755 = vmatmul.mubr.bf16.gmra.mxu0 %v3835_v45 }
  0x5a   :  { %762 = vmatprep.mubr.bf16.mxu0 %v3836_v46 }
  0x5b   :  { %3498 = vmatmul.mubr.bf16.gmra.mxu1 %v3880_v51 }
  0x5c   :  { %3501 = vmatprep.mubr.bf16.mxu1 %v3886_v52 }
  0x61   :  { %763 = vmatmul.mubr.bf16.gmra.mxu0 %v3839_v49 }
  0x62   :  { %770 = vmatprep.mubr.bf16.mxu0 %v3841_v50 }
  0x63   :  { %3502 = vmatmul.mubr.bf16.gmra.mxu1 %v3888_v55 }
  0x64   :  { %3505 = vmatprep.mubr.bf16.mxu1 %v3894_v56 }
  0x69   :  { %771 = vmatmul.mubr.bf16.gmra.mxu0 %v3843_v53 }
  0x6a   :  { %778 = vmatprep.mubr.bf16.mxu0 %v3844_v54 }
  0x6b   :  { %3506 = vmatmul.mubr.bf16.gmra.mxu1 %v3896_v59 }
  0x6c   :  { %3509 = vmatprep.mubr.bf16.mxu1 %v3902_v60 }
  0x71   :  { %779 = vmatmul.mubr.bf16.gmra.mxu0 %v3847_v57 }
  0x72   :  { %786 = vmatprep.mubr.bf16.mxu0 %v3849_v58 }
  0x73   :  { %3510 = vmatmul.mubr.bf16.gmra.mxu1 %v3904_v63 }
  0x74   :  { %3513 = vmatprep.mubr.bf16.mxu1 %v3910_v1 }
  0x79   :  { %787 = vmatmul.mubr.bf16.gmra.mxu0 %v3851_v61 }
  0x7a   :  { %794 = vmatprep.mubr.bf16.mxu0 %v3852_v62 }
  0x7b   :  { %3514 = vmatmul.mubr.bf16.gmra.mxu1 %v3912_v4 }
  0x81   :  { %795 = vmatmul.mubr.bf16.gmra.mxu0 %v3855_v2 }
  0x82   :  { %802 = vmatprep.mubr.bf16.mxu0 %v3857_v3 }
  0x89   :  { %803 = vmatmul.mubr.bf16.gmra.mxu0 %v3859_v5 }
  0x8a   :  { %810 = vmatprep.mubr.bf16.mxu0 %v3860_v6 }
  0x91   :  { %811 = vmatmul.mubr.bf16.gmra.mxu0 %v3863_v10 }
  0x92   :  { %818 = vmatprep.mubr.bf16.mxu0 %v3865_v11 }
  0x99   :  { %819 = vmatmul.mubr.bf16.gmra.mxu0 %v3867_v13 }
  0x9a   :  { %826 = vmatprep.mubr.bf16.mxu0 %v3868_v14 }
  0xa1   :  { %827 = vmatmul.mubr.bf16.gmra.mxu0 %v3871_v16 }
  0xa2   :  { %834 = vmatprep.mubr.bf16.mxu0 %v3873_v17 }
  0xa9   :  { %835 = vmatmul.mubr.bf16.gmra.mxu0 %v3875_v18 }
  0xaa   :  { %842 = vmatprep.mubr.bf16.mxu0 %v3876_v19 }
  0xb1   :  { %843 = vmatmul.mubr.bf16.gmra.mxu0 %v3879_v20 }
  0xb2   :  { %850 = vmatprep.mubr.bf16.mxu0 %v3881_v21 }
  0xb9   :  { %851 = vmatmul.mubr.bf16.gmra.mxu0 %v3883_v22 }
  0xba   :  { %858 = vmatprep.mubr.bf16.mxu0 %v3884_v23 }
  0xc1   :  { %859 = vmatmul.mubr.bf16.gmra.mxu0 %v3887_v24 }
  0xc2   :  { %866 = vmatprep.mubr.bf16.mxu0 %v3889_v25 }
  0xc9   :  { %867 = vmatmul.mubr.bf16.gmra.mxu0 %v3891_v26 }
  0xca   :  { %874 = vmatprep.mubr.bf16.mxu0 %v3892_v27 }
  0xd1   :  { %875 = vmatmul.mubr.bf16.gmra.mxu0 %v3895_v28 }
  0xd2   :  { %882 = vmatprep.mubr.bf16.mxu0 %v3897_v29 }
  0xd9   :  { %883 = vmatmul.mubr.bf16.gmra.mxu0 %v3899_v30 }
  0xda   :  { %890 = vmatprep.mubr.bf16.mxu0 %v3900_v31 }
  0xe1   :  { %891 = vmatmul.mubr.bf16.gmra.mxu0 %v3903_v32 }
  0xe2   :  { %898 = vmatprep.mubr.bf16.mxu0 %v3905_v33 }
  0xe3   :  { %v3471_v39 = vpop.f32.mrf.mxu1 }
  0xe5   :  { %v957_v40 = vpop.f32.mrf.mxu1 }
  0xe7   :  { %v3472_v43 = vpop.f32.mrf.mxu1 }
  0xe9   :  { %899 = vmatmul.mubr.bf16.gmra.mxu0 %v3907_v34  ;;  %v960_v47 = vpop.f32.mrf.mxu1 }
  0xea   :  { %906 = vmatprep.mubr.bf16.mxu0 %v3908_v35 }
  0xf1   :  { %907 = vmatmul.mubr.bf16.gmra.mxu0 %v3911_v36 }
  0xf2   :  { %914 = vmatprep.mubr.bf16.mxu0 %v3913_v37 }
  0xf9   :  { %915 = vmatmul.mubr.bf16.gmra.mxu0 %v3915_v38 }
  0xfa   :  { %3589 = vmatprep.mubr.bf16.mxu0 %v4153_v15  ;;  %v3475_v15 = vpop.f32.mrf.mxu1 }
  0xfc   :  { %v973_v59 = vpop.f32.mrf.mxu1 }
  0xfe   :  { %v3476_v2 = vpop.f32.mrf.mxu1 }
 0x100   :  { %v976_v9 = vpop.f32.mrf.mxu1 }
 0x101   :  { %v732_v42 = vpop.f32.mrf.mxu0 }
 0x102   :  { %v733_v44 = vadd.f32 %v4425_v41, %v732_v42  ;;  %v3479_v16 = vpop.f32.mrf.mxu1 }
 0x103   :  { %v734_v45 = vpop.f32.mrf.mxu0 }
 0x104   :  { %v958_v48 = vadd.f32 %v957_v40, %v733_v44  ;;  %v989_v23 = vpop.f32.mrf.mxu1 }
 0x105   :  { %v735_v46 = vpop.f32.mrf.mxu0 }
 0x106   :  { %v736_v49 = vadd.f32 %v4425_v41, %v735_v46  ;;  %v1148_v53 = vmax.f32 %v958_v48, 0.0  ;;  %v3480_v29 = vpop.f32.mrf.mxu1 }
 0x107   :  { %v737_v50 = vpop.f32.mrf.mxu0 }
 0x108   :  { %v961_v51 = vadd.f32 %v960_v47, %v736_v49  ;;  %v992_v36 = vpop.f32.mrf.mxu1 }
 0x109   :  { %v740_v52 = vpop.f32.mrf.mxu0 }
 0x10a   :  { %v1149_v54 = vmax.f32 %v961_v51, 0.0  ;;  %v741_v55 = vadd.f32 %v4425_v41, %v740_v52 }
 0x10b   :  { %v742_v56 = vpop.f32.mrf.mxu0 }
 0x10c   :  { %v1196_v57 = vpack.c.bf16 %v1149_v54, %v1148_v53  ;;  %v966_v60 = vadd.f32 %v3471_v39, %v741_v55 }
 0x10d   :  { %v743_v58 = vpop.f32.mrf.mxu0 }
 0x10e   :  { %v744_v61 = vadd.f32 %v4425_v41, %v743_v58  ;;  %3525 = vmatprep.mubr.msk.bf16.mxu1 %vm1252_vm0, %v1196_v57  ;;  %v1150_v3 = vmax.f32 %v966_v60, 0.0 }
 0x10f   :  { %v745_v62 = vpop.f32.mrf.mxu0 }
 0x110   :  { %v969_v63 = vadd.f32 %v3472_v43, %v744_v61  ;;  %v3483_v43 = vpop.f32.mrf.mxu1 }
 0x111   :  { %v748_v1 = vpop.f32.mrf.mxu0 }
 0x112   :  { %v1151_v4 = vmax.f32 %v969_v63, 0.0  ;;  %v749_v5 = vadd.f32 %v4425_v41, %v748_v1  ;;  %v1005_v50 = vpop.f32.mrf.mxu1 }
 0x113   :  { %v750_v6 = vpop.f32.mrf.mxu0 }
 0x114   :  { %v1197_v7 = vpack.c.bf16 %v1151_v4, %v1150_v3  ;;  %v974_v10 = vadd.f32 %v973_v59, %v749_v5  ;;  %v3484_v55 = vpop.f32.mrf.mxu1 }
 0x115   :  { %v751_v8 = vpop.f32.mrf.mxu0 }
 0x116   :  { %v752_v11 = vadd.f32 %v4425_v41, %v751_v8  ;;  %3526 = vmatmul.mubr.msk.bf16.vlgmr.msra.gmra.mxu1 %vm1252_vm0, %v1197_v7  ;;  %v1152_v17 = vmax.f32 %v974_v10, 0.0  ;;  %v1008_v62 = vpop.f32.mrf.mxu1 }
 0x117   :  { %v753_v12 = vpop.f32.mrf.mxu0 }
 0x118   :  { %v977_v13 = vadd.f32 %v976_v9, %v752_v11  ;;  %v3487_v5 = vpop.f32.mrf.mxu1 }
 0x119   :  { %v756_v14 = vpop.f32.mrf.mxu0 }
 0x11a   :  { %v1153_v18 = vmax.f32 %v977_v13, 0.0  ;;  %v757_v19 = vadd.f32 %v4425_v41, %v756_v14  ;;  %v1021_v12 = vpop.f32.mrf.mxu1 }
 0x11b   :  { %v758_v20 = vpop.f32.mrf.mxu0 }
 0x11c   :  { %v1198_v21 = vpack.c.bf16 %v1153_v18, %v1152_v17  ;;  %v982_v24 = vadd.f32 %v3475_v15, %v757_v19  ;;  %v3488_v19 = vpop.f32.mrf.mxu1 }
 0x11d   :  { %v759_v22 = vpop.f32.mrf.mxu0 }
 0x11e   :  { %v760_v25 = vadd.f32 %v4425_v41, %v759_v22  ;;  %3529 = vmatprep.mubr.msk.bf16.mxu1 %vm1252_vm0, %v1198_v21  ;;  %v1154_v30 = vmax.f32 %v982_v24, 0.0 }
 0x11f   :  { %v761_v26 = vpop.f32.mrf.mxu0 }
 0x120   :  { %v985_v27 = vadd.f32 %v3476_v2, %v760_v25  ;;  %v1024_v26 = vpop.f32.mrf.mxu1 }
 0x121   :  { %v764_v28 = vpop.f32.mrf.mxu0 }
 0x122   :  { %v1155_v31 = vmax.f32 %v985_v27, 0.0  ;;  %v765_v32 = vadd.f32 %v4425_v41, %v764_v28 }
 0x123   :  { %v766_v33 = vpop.f32.mrf.mxu0 }
 0x124   :  { %v1199_v34 = vpack.c.bf16 %v1155_v31, %v1154_v30  ;;  %v990_v37 = vadd.f32 %v989_v23, %v765_v32  ;;  %v3491_v32 = vpop.f32.mrf.mxu1 }
 0x125   :  { %v767_v35 = vpop.f32.mrf.mxu0 }
 0x126   :  { %v768_v38 = vadd.f32 %v4425_v41, %v767_v35  ;;  %3530 = vmatmul.mubr.msk.bf16.gmra.mxu1 %vm1252_vm0, %v1199_v34  ;;  %v1156_v44 = vmax.f32 %v990_v37, 0.0 }
 0x127   :  { %v769_v39 = vpop.f32.mrf.mxu0 }
 0x128   :  { %v993_v40 = vadd.f32 %v992_v36, %v768_v38  ;;  %v1037_v39 = vpop.f32.mrf.mxu1 }
 0x129   :  { %v772_v42 = vpop.f32.mrf.mxu0 }
 0x12a   :  { %v1157_v45 = vmax.f32 %v993_v40, 0.0  ;;  %v773_v46 = vadd.f32 %v4425_v41, %v772_v42 }
 0x12b   :  { %v774_v47 = vpop.f32.mrf.mxu0 }
 0x12c   :  { %v1200_v48 = vpack.c.bf16 %v1157_v45, %v1156_v44  ;;  %v998_v51 = vadd.f32 %v3479_v16, %v773_v46  ;;  %v3492_v46 = vpop.f32.mrf.mxu1 }
 0x12d   :  { %v775_v49 = vpop.f32.mrf.mxu0 }
 0x12e   :  { %v776_v52 = vadd.f32 %v4425_v41, %v775_v49  ;;  %3533 = vmatprep.mubr.msk.bf16.mxu1 %vm1252_vm0, %v1200_v48  ;;  %v1158_v56 = vmax.f32 %v998_v51, 0.0 }
 0x12f   :  { %v777_v15 = vpop.f32.mrf.mxu0 }
 0x130   :  { %v1001_v53 = vadd.f32 %v3480_v29, %v776_v52  ;;  %v1040_v15 = vpop.f32.mrf.mxu1 }
 0x131   :  { %v780_v54 = vpop.f32.mrf.mxu0 }
 0x132   :  { %v1159_v57 = vmax.f32 %v1001_v53, 0.0  ;;  %v781_v58 = vadd.f32 %v4425_v41, %v780_v54 }
 0x133   :  { %v782_v59 = vpop.f32.mrf.mxu0 }
 0x134   :  { %v1201_v60 = vpack.c.bf16 %v1159_v57, %v1158_v56  ;;  %v1006_v63 = vadd.f32 %v1005_v50, %v781_v58  ;;  %v3495_v58 = vpop.f32.mrf.mxu1 }
 0x135   :  { %v783_v61 = vpop.f32.mrf.mxu0 }
 0x136   :  { %v784_v1 = vadd.f32 %v4425_v41, %v783_v61  ;;  %3534 = vmatmul.mubr.msk.bf16.gmra.mxu1 %vm1252_vm0, %v1201_v60  ;;  %v1160_v6 = vmax.f32 %v1006_v63, 0.0 }
 0x137   :  { %v785_v2 = vpop.f32.mrf.mxu0 }
 0x138   :  { %v1009_v3 = vadd.f32 %v1008_v62, %v784_v1  ;;  %v1053_v2 = vpop.f32.mrf.mxu1 }
 0x139   :  { %v788_v4 = vpop.f32.mrf.mxu0 }
 0x13a   :  { %v1161_v7 = vmax.f32 %v1009_v3, 0.0  ;;  %v789_v8 = vadd.f32 %v4425_v41, %v788_v4 }
 0x13b   :  { %v790_v9 = vpop.f32.mrf.mxu0 }
 0x13c   :  { %v1202_v10 = vpack.c.bf16 %v1161_v7, %v1160_v6  ;;  %v1014_v13 = vadd.f32 %v3483_v43, %v789_v8  ;;  %v3496_v8 = vpop.f32.mrf.mxu1 }
 0x13d   :  { %v791_v11 = vpop.f32.mrf.mxu0 }
 0x13e   :  { %v792_v14 = vadd.f32 %v4425_v41, %v791_v11  ;;  %3537 = vmatprep.mubr.msk.bf16.mxu1 %vm1252_vm0, %v1202_v10  ;;  %v1162_v20 = vmax.f32 %v1014_v13, 0.0 }
 0x13f   :  { %v793_v16 = vpop.f32.mrf.mxu0 }
 0x140   :  { %v1017_v17 = vadd.f32 %v3484_v55, %v792_v14  ;;  %v1056_v16 = vpop.f32.mrf.mxu1 }
 0x141   :  { %v796_v18 = vpop.f32.mrf.mxu0 }
 0x142   :  { %v1163_v21 = vmax.f32 %v1017_v17, 0.0  ;;  %v797_v22 = vadd.f32 %v4425_v41, %v796_v18 }
 0x143   :  { %v798_v23 = vpop.f32.mrf.mxu0 }
 0x144   :  { %v1203_v24 = vpack.c.bf16 %v1163_v21, %v1162_v20  ;;  %v1022_v27 = vadd.f32 %v1021_v12, %v797_v22  ;;  %v3499_v22 = vpop.f32.mrf.mxu1 }
 0x145   :  { %v799_v25 = vpop.f32.mrf.mxu0 }
 0x146   :  { %v800_v28 = vadd.f32 %v4425_v41, %v799_v25  ;;  %3538 = vmatmul.mubr.msk.bf16.gmra.mxu1 %vm1252_vm0, %v1203_v24  ;;  %v1164_v33 = vmax.f32 %v1022_v27, 0.0 }
 0x147   :  { %v801_v29 = vpop.f32.mrf.mxu0 }
 0x148   :  { %v1025_v30 = vadd.f32 %v1024_v26, %v800_v28  ;;  %v1069_v29 = vpop.f32.mrf.mxu1 }
 0x149   :  { %v804_v31 = vpop.f32.mrf.mxu0 }
 0x14a   :  { %v1165_v34 = vmax.f32 %v1025_v30, 0.0  ;;  %v805_v35 = vadd.f32 %v4425_v41, %v804_v31 }
 0x14b   :  { %v806_v36 = vpop.f32.mrf.mxu0 }
 0x14c   :  { %v1204_v37 = vpack.c.bf16 %v1165_v34, %v1164_v33  ;;  %v1030_v40 = vadd.f32 %v3487_v5, %v805_v35  ;;  %v3500_v35 = vpop.f32.mrf.mxu1 }
 0x14d   :  { %v807_v38 = vpop.f32.mrf.mxu0 }
 0x14e   :  { %v808_v42 = vadd.f32 %v4425_v41, %v807_v38  ;;  %3541 = vmatprep.mubr.msk.bf16.mxu1 %vm1252_vm0, %v1204_v37  ;;  %v1166_v47 = vmax.f32 %v1030_v40, 0.0 }
 0x14f   :  { %v809_v43 = vpop.f32.mrf.mxu0 }
 0x150   :  { %v1033_v44 = vadd.f32 %v3488_v19, %v808_v42  ;;  %v1072_v43 = vpop.f32.mrf.mxu1 }
 0x151   :  { %v812_v45 = vpop.f32.mrf.mxu0 }
 0x152   :  { %v1167_v48 = vmax.f32 %v1033_v44, 0.0  ;;  %v813_v49 = vadd.f32 %v4425_v41, %v812_v45 }
 0x153   :  { %v814_v50 = vpop.f32.mrf.mxu0 }
 0x154   :  { %v1205_v51 = vpack.c.bf16 %v1167_v48, %v1166_v47  ;;  %v1038_v53 = vadd.f32 %v1037_v39, %v813_v49  ;;  %v3503_v49 = vpop.f32.mrf.mxu1 }
 0x155   :  { %v815_v52 = vpop.f32.mrf.mxu0 }
 0x156   :  { %v816_v54 = vadd.f32 %v4425_v41, %v815_v52  ;;  %3542 = vmatmul.mubr.msk.bf16.gmra.mxu1 %vm1252_vm0, %v1205_v51  ;;  %v1168_v59 = vmax.f32 %v1038_v53, 0.0 }
 0x157   :  { %v817_v55 = vpop.f32.mrf.mxu0 }
 0x158   :  { %v1041_v56 = vadd.f32 %v1040_v15, %v816_v54  ;;  %v1085_v55 = vpop.f32.mrf.mxu1 }
 0x159   :  { %v820_v57 = vpop.f32.mrf.mxu0 }
 0x15a   :  { %v1169_v60 = vmax.f32 %v1041_v56, 0.0  ;;  %v821_v61 = vadd.f32 %v4425_v41, %v820_v57 }
 0x15b   :  { %v822_v62 = vpop.f32.mrf.mxu0 }
 0x15c   :  { %v1206_v63 = vpack.c.bf16 %v1169_v60, %v1168_v59  ;;  %v1046_v3 = vadd.f32 %v3491_v32, %v821_v61  ;;  %v3504_v61 = vpop.f32.mrf.mxu1 }
 0x15d   :  { %v823_v1 = vpop.f32.mrf.mxu0 }
 0x15e   :  { %v824_v4 = vadd.f32 %v4425_v41, %v823_v1  ;;  %3545 = vmatprep.mubr.msk.bf16.mxu1 %vm1252_vm0, %v1206_v63  ;;  %v1170_v9 = vmax.f32 %v1046_v3, 0.0 }
 0x15f   :  { %v825_v5 = vpop.f32.mrf.mxu0 }
 0x160   :  { %v1049_v6 = vadd.f32 %v3492_v46, %v824_v4  ;;  %v1088_v5 = vpop.f32.mrf.mxu1 }
 0x161   :  { %v828_v7 = vpop.f32.mrf.mxu0 }
 0x162   :  { %v1171_v10 = vmax.f32 %v1049_v6, 0.0  ;;  %v829_v11 = vadd.f32 %v4425_v41, %v828_v7 }
 0x163   :  { %v830_v12 = vpop.f32.mrf.mxu0 }
 0x164   :  { %v1207_v13 = vpack.c.bf16 %v1171_v10, %v1170_v9  ;;  %v1054_v17 = vadd.f32 %v1053_v2, %v829_v11  ;;  %v3507_v11 = vpop.f32.mrf.mxu1 }
 0x165   :  { %v831_v14 = vpop.f32.mrf.mxu0 }
 0x166   :  { %v832_v18 = vadd.f32 %v4425_v41, %v831_v14  ;;  %3546 = vmatmul.mubr.msk.bf16.gmra.mxu1 %vm1252_vm0, %v1207_v13  ;;  %v1172_v23 = vmax.f32 %v1054_v17, 0.0 }
 0x167   :  { %v833_v19 = vpop.f32.mrf.mxu0 }
 0x168   :  { %v1057_v20 = vadd.f32 %v1056_v16, %v832_v18  ;;  %v1101_v19 = vpop.f32.mrf.mxu1 }
 0x169   :  { %v836_v21 = vpop.f32.mrf.mxu0 }
 0x16a   :  { %v1173_v24 = vmax.f32 %v1057_v20, 0.0  ;;  %v837_v25 = vadd.f32 %v4425_v41, %v836_v21 }
 0x16b   :  { %v838_v26 = vpop.f32.mrf.mxu0 }
 0x16c   :  { %v1208_v27 = vpack.c.bf16 %v1173_v24, %v1172_v23  ;;  %v1062_v30 = vadd.f32 %v3495_v58, %v837_v25  ;;  %v3508_v25 = vpop.f32.mrf.mxu1 }
 0x16d   :  { %v839_v28 = vpop.f32.mrf.mxu0 }
 0x16e   :  { %v840_v31 = vadd.f32 %v4425_v41, %v839_v28  ;;  %3549 = vmatprep.mubr.msk.bf16.mxu1 %vm1252_vm0, %v1208_v27  ;;  %v1174_v36 = vmax.f32 %v1062_v30, 0.0 }
 0x16f   :  { %v841_v32 = vpop.f32.mrf.mxu0 }
 0x170   :  { %v1065_v33 = vadd.f32 %v3496_v8, %v840_v31  ;;  %v1104_v32 = vpop.f32.mrf.mxu1 }
 0x171   :  { %v844_v34 = vpop.f32.mrf.mxu0 }
 0x172   :  { %v1175_v37 = vmax.f32 %v1065_v33, 0.0  ;;  %v845_v38 = vadd.f32 %v4425_v41, %v844_v34 }
 0x173   :  { %v846_v39 = vpop.f32.mrf.mxu0 }
 0x174   :  { %v1209_v40 = vpack.c.bf16 %v1175_v37, %v1174_v36  ;;  %v1070_v44 = vadd.f32 %v1069_v29, %v845_v38  ;;  %v3511_v38 = vpop.f32.mrf.mxu1 }
 0x175   :  { %v847_v42 = vpop.f32.mrf.mxu0 }
 0x176   :  { %v848_v45 = vadd.f32 %v4425_v41, %v847_v42  ;;  %3550 = vmatmul.mubr.msk.bf16.gmra.mxu1 %vm1252_vm0, %v1209_v40  ;;  %v1176_v50 = vmax.f32 %v1070_v44, 0.0 }
 0x177   :  { %v849_v46 = vpop.f32.mrf.mxu0 }
 0x178   :  { %v1073_v47 = vadd.f32 %v1072_v43, %v848_v45  ;;  %v1117_v46 = vpop.f32.mrf.mxu1 }
 0x179   :  { %v852_v48 = vpop.f32.mrf.mxu0 }
 0x17a   :  { %v1177_v51 = vmax.f32 %v1073_v47, 0.0  ;;  %v853_v52 = vadd.f32 %v4425_v41, %v852_v48 }
 0x17b   :  { %v854_v15 = vpop.f32.mrf.mxu0 }
 0x17c   :  { %v1210_v53 = vpack.c.bf16 %v1177_v51, %v1176_v50  ;;  %v1078_v56 = vadd.f32 %v3499_v22, %v853_v52  ;;  %v3512_v52 = vpop.f32.mrf.mxu1 }
 0x17d   :  { %v855_v54 = vpop.f32.mrf.mxu0 }
 0x17e   :  { %v856_v57 = vadd.f32 %v4425_v41, %v855_v54  ;;  %3553 = vmatprep.mubr.msk.bf16.mxu1 %vm1252_vm0, %v1210_v53  ;;  %v1178_v62 = vmax.f32 %v1078_v56, 0.0 }
 0x17f   :  { %v857_v58 = vpop.f32.mrf.mxu0 }
 0x180   :  { %v1081_v59 = vadd.f32 %v3500_v35, %v856_v57  ;;  %v1120_v58 = vpop.f32.mrf.mxu1 }
 0x181   :  { %v860_v60 = vpop.f32.mrf.mxu0 }
 0x182   :  { %v1179_v63 = vmax.f32 %v1081_v59, 0.0  ;;  %v861_v1 = vadd.f32 %v4425_v41, %v860_v60 }
 0x183   :  { %v862_v2 = vpop.f32.mrf.mxu0 }
 0x184   :  { %v1211_v3 = vpack.c.bf16 %v1179_v63, %v1178_v62  ;;  %v1086_v6 = vadd.f32 %v1085_v55, %v861_v1  ;;  %v3515_v1 = vpop.f32.mrf.mxu1 }
 0x185   :  { %v863_v4 = vpop.f32.mrf.mxu0 }
 0x186   :  { %v864_v7 = vadd.f32 %v4425_v41, %v863_v4  ;;  %3554 = vmatmul.mubr.msk.bf16.gmra.mxu1 %vm1252_vm0, %v1211_v3  ;;  %v1180_v12 = vmax.f32 %v1086_v6, 0.0 }
 0x187   :  { %v865_v8 = vpop.f32.mrf.mxu0 }
 0x188   :  { %v1089_v9 = vadd.f32 %v1088_v5, %v864_v7  ;;  %v1133_v8 = vpop.f32.mrf.mxu1 }
 0x189   :  { %v868_v10 = vpop.f32.mrf.mxu0 }
 0x18a   :  { %v1181_v13 = vmax.f32 %v1089_v9, 0.0  ;;  %v869_v14 = vadd.f32 %v4425_v41, %v868_v10 }
 0x18b   :  { %v870_v16 = vpop.f32.mrf.mxu0 }
 0x18c   :  { %v1212_v17 = vpack.c.bf16 %v1181_v13, %v1180_v12  ;;  %v1094_v20 = vadd.f32 %v3503_v49, %v869_v14  ;;  %v3516_v14 = vpop.f32.mrf.mxu1 }
 0x18d   :  { %v871_v18 = vpop.f32.mrf.mxu0 }
 0x18e   :  { %v872_v21 = vadd.f32 %v4425_v41, %v871_v18  ;;  %3557 = vmatprep.mubr.msk.bf16.mxu1 %vm1252_vm0, %v1212_v17  ;;  %v1182_v26 = vmax.f32 %v1094_v20, 0.0 }
 0x18f   :  { %v873_v22 = vpop.f32.mrf.mxu0 }
 0x190   :  { %v1097_v23 = vadd.f32 %v3504_v61, %v872_v21  ;;  %v1136_v22 = vpop.f32.mrf.mxu1 }
 0x191   :  { %v876_v24 = vpop.f32.mrf.mxu0 }
 0x192   :  { %v1183_v27 = vmax.f32 %v1097_v23, 0.0  ;;  %v877_v28 = vadd.f32 %v4425_v41, %v876_v24 }
 0x193   :  { %v878_v29 = vpop.f32.mrf.mxu0 }
 0x194   :  { %v1213_v30 = vpack.c.bf16 %v1183_v27, %v1182_v26  ;;  %v1102_v33 = vadd.f32 %v1101_v19, %v877_v28 }
 0x195   :  { %v879_v31 = vpop.f32.mrf.mxu0 }
 0x196   :  { %v880_v34 = vadd.f32 %v4425_v41, %v879_v31  ;;  %3558 = vmatmul.mubr.msk.bf16.gmra.mxu1 %vm1252_vm0, %v1213_v30  ;;  %v1184_v39 = vmax.f32 %v1102_v33, 0.0 }
 0x197   :  { %v881_v35 = vpop.f32.mrf.mxu0 }
 0x198   :  { %v1105_v36 = vadd.f32 %v1104_v32, %v880_v34 }
 0x199   :  { %v884_v37 = vpop.f32.mrf.mxu0 }
 0x19a   :  { %v1185_v40 = vmax.f32 %v1105_v36, 0.0  ;;  %v885_v42 = vadd.f32 %v4425_v41, %v884_v37 }
 0x19b   :  { %v886_v43 = vpop.f32.mrf.mxu0 }
 0x19c   :  { %v1214_v44 = vpack.c.bf16 %v1185_v40, %v1184_v39  ;;  %v1110_v47 = vadd.f32 %v3507_v11, %v885_v42  ;;  %v4502_v42 = vld [vmem:[%s5371_s0 + $0x4] ss:$12 sps:$4 sm:$0xff]  }
 0x19d   :  { %v887_v45 = vpop.f32.mrf.mxu0 }
 0x19e   :  { %v888_v48 = vadd.f32 %v4425_v41, %v887_v45  ;;  %3561 = vmatprep.mubr.msk.bf16.mxu1 %vm1252_vm0, %v1214_v44  ;;  %v1186_v15 = vmax.f32 %v1110_v47, 0.0 }
 0x19f   :  { %v889_v49 = vpop.f32.mrf.mxu0 }
 0x1a0   :  { %v1113_v50 = vadd.f32 %v3508_v25, %v888_v48 }
 0x1a1   :  { %v892_v51 = vpop.f32.mrf.mxu0 }
 0x1a2   :  { %v1187_v53 = vmax.f32 %v1113_v50, 0.0  ;;  %v893_v54 = vadd.f32 %v4425_v41, %v892_v51 }
 0x1a3   :  { %v894_v55 = vpop.f32.mrf.mxu0 }
 0x1a4   :  { %v1215_v56 = vpack.c.bf16 %v1187_v53, %v1186_v15  ;;  %v1118_v59 = vadd.f32 %v1117_v46, %v893_v54 }
 0x1a5   :  { %v895_v57 = vpop.f32.mrf.mxu0 }
 0x1a6   :  { %v896_v60 = vadd.f32 %v4425_v41, %v895_v57  ;;  %3562 = vmatmul.mubr.msk.bf16.gmra.mxu1 %vm1252_vm0, %v1215_v56  ;;  %v1188_v2 = vmax.f32 %v1118_v59, 0.0 }
 0x1a7   :  { %v897_v61 = vpop.f32.mrf.mxu0 }
 0x1a8   :  { %v1121_v62 = vadd.f32 %v1120_v58, %v896_v60 }
 0x1a9   :  { %v900_v63 = vpop.f32.mrf.mxu0 }
 0x1aa   :  { %v1189_v3 = vmax.f32 %v1121_v62, 0.0  ;;  %v901_v4 = vadd.f32 %v4425_v41, %v900_v63 }
 0x1ab   :  { %v902_v5 = vpop.f32.mrf.mxu0 }
 0x1ac   :  { %v1216_v6 = vpack.c.bf16 %v1189_v3, %v1188_v2  ;;  %v1126_v9 = vadd.f32 %v3511_v38, %v901_v4 }
 0x1ad   :  { %v903_v7 = vpop.f32.mrf.mxu0 }
 0x1ae   :  { %v904_v10 = vadd.f32 %v4425_v41, %v903_v7  ;;  %3565 = vmatprep.mubr.msk.bf16.mxu1 %vm1252_vm0, %v1216_v6  ;;  %v1190_v16 = vmax.f32 %v1126_v9, 0.0 }
 0x1af   :  { %v905_v11 = vpop.f32.mrf.mxu0 }
 0x1b0   :  { %v1129_v12 = vadd.f32 %v3512_v52, %v904_v10 }
 0x1b1   :  { %v908_v13 = vpop.f32.mrf.mxu0 }
 0x1b2   :  { %v1191_v17 = vmax.f32 %v1129_v12, 0.0  ;;  %v909_v18 = vadd.f32 %v4425_v41, %v908_v13 }
 0x1b3   :  { %v910_v19 = vpop.f32.mrf.mxu0 }
 0x1b4   :  { %v1217_v20 = vpack.c.bf16 %v1191_v17, %v1190_v16  ;;  %v1134_v23 = vadd.f32 %v1133_v8, %v909_v18 }
 0x1b5   :  { %v911_v21 = vpop.f32.mrf.mxu0 }
 0x1b6   :  { %v912_v24 = vadd.f32 %v4425_v41, %v911_v21  ;;  %3566 = vmatmul.mubr.msk.bf16.gmra.mxu1 %vm1252_vm0, %v1217_v20  ;;  %v1192_v28 = vmax.f32 %v1134_v23, 0.0 }
 0x1b7   :  { %v913_v25 = vpop.f32.mrf.mxu0 }
 0x1b8   :  { %v1137_v26 = vadd.f32 %v1136_v22, %v912_v24 }
 0x1b9   :  { %v916_v27 = vpop.f32.mrf.mxu0 }
 0x1ba   :  { %v1193_v29 = vmax.f32 %v1137_v26, 0.0  ;;  %v917_v30 = vadd.f32 %v4425_v41, %v916_v27 }
 0x1bb   :  { %v918_v31 = vpop.f32.mrf.mxu0 }
 0x1bc   :  { %v1218_v32 = vpack.c.bf16 %v1193_v29, %v1192_v28  ;;  %v1142_v34 = vadd.f32 %v3515_v1, %v917_v30 }
 0x1bd   :  { %v919_v33 = vpop.f32.mrf.mxu0 }
 0x1be   :  { %v920_v35 = vadd.f32 %v4425_v41, %v919_v33  ;;  %3569 = vmatprep.mubr.msk.bf16.mxu1 %vm1252_vm0, %v1218_v32  ;;  %v1194_v38 = vmax.f32 %v1142_v34, 0.0  ;;  %v3926_v32 = vld [vmem:[%s5371_s0] ss:$12 sps:$4 sm:$0xff]   ;;  %v3927_v33 = vld [vmem:[%s5371_s0 + $0x1c] ss:$12 sps:$4 sm:$0xff]  }
 0x1bf   :  { %v921_v36 = vpop.f32.mrf.mxu0 }
 0x1c0   :  { %v1145_v37 = vadd.f32 %v3516_v14, %v920_v35  ;;  %v3928_v36 = vld [vmem:[%s5371_s0 + $0x18] ss:$12 sps:$4 sm:$0xff]  }
 0x1c2   :  { %v1195_v39 = vmax.f32 %v1145_v37, 0.0  ;;  %v3929_v37 = vld [vmem:[%s5371_s0 + $0x34] ss:$12 sps:$4 sm:$0xff]  }
 0x1c4   :  { %v1219_v40 = vpack.c.bf16 %v1195_v39, %v1194_v38 }
 0x1c6   :  { %3570 = vmatmul.mubr.msk.bf16.gmra.mxu1 %vm1252_vm0, %v1219_v40 }
 0x1c7   :  { %1611 = vmatprep.mubr.bf16.mxu1 %v4502_v42 }
 0x1d6   :  { %v3527_v43 = vpop.f32.mrf.mxu1 }
 0x1d8   :  { %v1359_v44 = vpop.f32.mrf.mxu1 }
 0x1da   :  { %v3528_v45 = vpop.f32.mrf.mxu1 }
 0x1db   :  { %v1551_v2 = vpack.c.bf16 %v3528_v45, %v3527_v43  ;;  %v3930_v43 = vld [vmem:[%s5371_s0 + $0x30] ss:$12 sps:$4 sm:$0xff]  }
 0x1dc   :  { %v1362_v41 = vpop.f32.mrf.mxu1 }
 0x1dd   :  { %v1550_v4 = vpack.c.bf16 %v1362_v41, %v1359_v44  ;;  %v3931_v44 = vld [vmem:[%s5371_s0 + $0x4c] ss:$12 sps:$4 sm:$0xff]  }
 0x1e6   :  { %v3531_v46 = vpop.f32.mrf.mxu1 }
 0x1e8   :  { %v1375_v47 = vpop.f32.mrf.mxu1 }
 0x1ea   :  { %v3532_v48 = vpop.f32.mrf.mxu1 }
 0x1eb   :  { %v1553_v61 = vpack.c.bf16 %v3532_v48, %v3531_v46  ;;  %v3932_v46 = vld [vmem:[%s5371_s0 + $0x48] ss:$12 sps:$4 sm:$0xff]  }
 0x1ec   :  { %v1378_v49 = vpop.f32.mrf.mxu1 }
 0x1ed   :  { %v1552_v63 = vpack.c.bf16 %v1378_v49, %v1375_v47  ;;  %v3933_v47 = vld [vmem:[%s5371_s0 + $0x64] ss:$12 sps:$4 sm:$0xff]  }
 0x1f6   :  { %v3535_v50 = vpop.f32.mrf.mxu1 }
 0x1f8   :  { %v1391_v51 = vpop.f32.mrf.mxu1 }
 0x1fa   :  { %v3536_v52 = vpop.f32.mrf.mxu1 }
 0x1fb   :  { %v1555_v59 = vpack.c.bf16 %v3536_v52, %v3535_v50 }
 0x1fc   :  { %v1394_v15 = vpop.f32.mrf.mxu1 }
 0x1fd   :  { %v1554_v60 = vpack.c.bf16 %v1394_v15, %v1391_v51  ;;  %v3934_v15 = vld [vmem:[%s5371_s0 + $0x60] ss:$12 sps:$4 sm:$0xff]  }
 0x206   :  { %v3539_v53 = vpop.f32.mrf.mxu1 }
 0x208   :  { %v1407_v54 = vpop.f32.mrf.mxu1 }
 0x20a   :  { %v3540_v55 = vpop.f32.mrf.mxu1 }
 0x20b   :  { %v1557_v56 = vpack.c.bf16 %v3540_v55, %v3539_v53 }
 0x20c   :  { %v1410_v57 = vpop.f32.mrf.mxu1 }
 0x20d   :  { %1580 = vmatpush1.bf16.msra.mxu1 %v1557_v56  ;;  %v1556_v58 = vpack.c.bf16 %v1410_v57, %v1407_v54  ;;  %v3935_v54 = vld [vmem:[%s5371_s0 + $0x7c] ss:$12 sps:$4 sm:$0xff]   ;;  %v3936_v56 = vld [vmem:[%s5371_s0 + $0x78] ss:$12 sps:$4 sm:$0xff]  }
 0x20e   :  { %1581 = vmatprep.subr.bf16.mxu1 %v4067_v0 }
 0x211   :  { %1582 = vmatpush1.bf16.msra.mxu1 %v1556_v58  ;;  %v3937_v58 = vld [vmem:[%s5371_s0 + $0x94] ss:$12 sps:$4 sm:$0xff]  }
 0x212   :  { %1583 = vmatprep.subr.bf16.mxu1 %v4067_v0 }
 0x215   :  { %1584 = vmatpush1.bf16.msra.mxu1 %v1555_v59 }
 0x216   :  { %1585 = vmatprep.subr.bf16.mxu1 %v4067_v0  ;;  %v3543_v62 = vpop.f32.mrf.mxu1 }
 0x218   :  { %v1423_v1 = vpop.f32.mrf.mxu1 }
 0x219   :  { %1586 = vmatpush1.bf16.msra.mxu1 %v1554_v60  ;;  %v3938_v60 = vld [vmem:[%s5371_s0 + $0x90] ss:$12 sps:$4 sm:$0xff]  }
 0x21a   :  { %1587 = vmatprep.subr.bf16.mxu1 %v4067_v0  ;;  %v3544_v3 = vpop.f32.mrf.mxu1 }
 0x21b   :  { %v1559_v27 = vpack.c.bf16 %v3544_v3, %v3543_v62  ;;  %v3939_v62 = vld [vmem:[%s5371_s0 + $0xac] ss:$12 sps:$4 sm:$0xff]   ;;  %v3941_v3 = vld [vmem:[%s5371_s0 + $0xc4] ss:$12 sps:$4 sm:$0xff]  }
 0x21c   :  { %v1426_v5 = vpop.f32.mrf.mxu1 }
 0x21d   :  { %1588 = vmatpush1.bf16.msra.mxu1 %v1553_v61  ;;  %v1558_v29 = vpack.c.bf16 %v1426_v5, %v1423_v1  ;;  %v3940_v1 = vld [vmem:[%s5371_s0 + $0xa8] ss:$12 sps:$4 sm:$0xff]   ;;  %v3943_v5 = vld [vmem:[%s5371_s0 + $0x20] ss:$12 sps:$4 sm:$0xff]  }
 0x21e   :  { %1589 = vmatprep.subr.bf16.mxu1 %v4067_v0 }
 0x221   :  { %1590 = vmatpush1.bf16.msra.mxu1 %v1552_v63 }
 0x222   :  { %1591 = vmatprep.subr.bf16.mxu1 %v4067_v0 }
 0x225   :  { %1592 = vmatpush1.bf16.msra.mxu1 %v1551_v2 }
 0x226   :  { %1593 = vmatprep.subr.bf16.mxu1 %v4067_v0  ;;  %v3547_v6 = vpop.f32.mrf.mxu1 }
 0x228   :  { %v1439_v7 = vpop.f32.mrf.mxu1 }
 0x229   :  { %1594 = vmatpush1.bf16.msra.mxu1 %v1550_v4  ;;  %v3942_v4 = vld [vmem:[%s5371_s0 + $0xc0] ss:$12 sps:$4 sm:$0xff]  }
 0x22a   :  { %1595 = vmatprep.subr.bf16.mxu1 %v4067_v0  ;;  %v3548_v8 = vpop.f32.mrf.mxu1 }
 0x22b   :  { %v1561_v23 = vpack.c.bf16 %v3548_v8, %v3547_v6  ;;  %v3944_v6 = vld [vmem:[%s5371_s0 + $0xdc] ss:$12 sps:$4 sm:$0xff]   ;;  %v3946_v8 = vld [vmem:[%s5371_s0 + $0xd8] ss:$12 sps:$4 sm:$0xff]  }
 0x22c   :  { %v1442_v9 = vpop.f32.mrf.mxu1 }
 0x22d   :  { %v1560_v25 = vpack.c.bf16 %v1442_v9, %v1439_v7  ;;  %v3945_v7 = vld [vmem:[%s5371_s0 + $0x38] ss:$12 sps:$4 sm:$0xff]   ;;  %v3947_v9 = vld [vmem:[%s5371_s0 + $0x50] ss:$12 sps:$4 sm:$0xff]  }
 0x236   :  { %v3551_v10 = vpop.f32.mrf.mxu1 }
 0x238   :  { %v1455_v11 = vpop.f32.mrf.mxu1 }
 0x23a   :  { %v3552_v12 = vpop.f32.mrf.mxu1 }
 0x23b   :  { %v1563_v21 = vpack.c.bf16 %v3552_v12, %v3551_v10  ;;  %v3948_v10 = vld [vmem:[%s5371_s0 + $0xf4] ss:$12 sps:$4 sm:$0xff]   ;;  %v3950_v12 = vld [vmem:[%s5371_s0 + $0xf0] ss:$12 sps:$4 sm:$0xff]  }
 0x23c   :  { %v1458_v13 = vpop.f32.mrf.mxu1 }
 0x23d   :  { %v1562_v22 = vpack.c.bf16 %v1458_v13, %v1455_v11  ;;  %v3949_v11 = vld [vmem:[%s5371_s0 + $0x68] ss:$12 sps:$4 sm:$0xff]   ;;  %v3951_v13 = vld [vmem:[%s5371_s0 + $0x80] ss:$12 sps:$4 sm:$0xff]  }
 0x246   :  { %v3555_v14 = vpop.f32.mrf.mxu1 }
 0x248   :  { %v1471_v16 = vpop.f32.mrf.mxu1 }
 0x24a   :  { %v3556_v17 = vpop.f32.mrf.mxu1 }
 0x24b   :  { %v1565_v18 = vpack.c.bf16 %v3556_v17, %v3555_v14  ;;  %v3952_v14 = vld [vmem:[%s5371_s0 + $0x10c] ss:$12 sps:$4 sm:$0xff]   ;;  %v3954_v17 = vld [vmem:[%s5371_s0 + $0x108] ss:$12 sps:$4 sm:$0xff]  }
 0x24c   :  { %v1474_v19 = vpop.f32.mrf.mxu1 }
 0x24d   :  { %1596 = vmatpush2.bf16.msra.mxu1 %v1565_v18  ;;  %v1564_v20 = vpack.c.bf16 %v1474_v19, %v1471_v16  ;;  %v3953_v16 = vld [vmem:[%s5371_s0 + $0x98] ss:$12 sps:$4 sm:$0xff]   ;;  %v3955_v18 = vld [vmem:[%s5371_s0 + $0xb0] ss:$12 sps:$4 sm:$0xff]  }
 0x24e   :  { %1597 = vmatprep.subr.bf16.mxu1 %v4067_v0  ;;  %v3956_v19 = vld [vmem:[%s5371_s0 + $0x124] ss:$12 sps:$4 sm:$0xff]  }
 0x251   :  { %1598 = vmatpush2.bf16.msra.mxu1 %v1564_v20  ;;  %v3957_v20 = vld [vmem:[%s5371_s0 + $0xc8] ss:$12 sps:$4 sm:$0xff]  }
 0x252   :  { %1599 = vmatprep.subr.bf16.mxu1 %v4067_v0 }
 0x255   :  { %1600 = vmatpush2.bf16.msra.mxu1 %v1563_v21  ;;  %v3958_v21 = vld [vmem:[%s5371_s0 + $0x120] ss:$12 sps:$4 sm:$0xff]  }
 0x256   :  { %1601 = vmatprep.subr.bf16.mxu1 %v4067_v0  ;;  %v4517_v24 = vpop.f32.mrf.mxu1 }
 0x258   :  { %v4520_v26 = vpop.f32.mrf.mxu1 }
 0x259   :  { %1602 = vmatpush2.bf16.msra.mxu1 %v1562_v22  ;;  %v3959_v22 = vld [vmem:[%s5371_s0 + $0xe0] ss:$12 sps:$4 sm:$0xff]  }
 0x25a   :  { %1603 = vmatprep.subr.bf16.mxu1 %v4067_v0  ;;  %v4523_v28 = vpop.f32.mrf.mxu1 }
 0x25b   :  { %v1567_v63 = vpack.c.bf16 %v4523_v28, %v4517_v24  ;;  %v3961_v24 = vld [vmem:[%s5371_s0 + $0xf8] ss:$12 sps:$4 sm:$0xff]   ;;  %v3965_v28 = vld [vmem:[%s5371_s0 + $0x128] ss:$12 sps:$4 sm:$0xff]  }
 0x25c   :  { %v4526_v30 = vpop.f32.mrf.mxu1 }
 0x25d   :  { %1604 = vmatpush2.bf16.msra.mxu1 %v1561_v23  ;;  %v1566_v2 = vpack.c.bf16 %v4526_v30, %v4520_v26  ;;  %v3960_v23 = vld [vmem:[%s5371_s0 + $0x13c] ss:$12 sps:$4 sm:$0xff]   ;;  %v3967_v30 = vld [vmem:[%s5371_s0 + $0x140] ss:$12 sps:$4 sm:$0xff]  }
 0x25e   :  { %1605 = vmatprep.subr.bf16.mxu1 %v4067_v0  ;;  %v3963_v26 = vld [vmem:[%s5371_s0 + $0x110] ss:$12 sps:$4 sm:$0xff]  }
 0x261   :  { %1606 = vmatpush2.bf16.msra.mxu1 %v1560_v25  ;;  %v3962_v25 = vld [vmem:[%s5371_s0 + $0x138] ss:$12 sps:$4 sm:$0xff]  }
 0x262   :  { %1607 = vmatprep.subr.bf16.mxu1 %v4067_v0 }
 0x265   :  { %1608 = vmatpush2.bf16.msra.mxu1 %v1559_v27  ;;  %v3964_v27 = vld [vmem:[%s5371_s0 + $0x154] ss:$12 sps:$4 sm:$0xff]  }
 0x266   :  { %1609 = vmatprep.subr.bf16.mxu1 %v4067_v0  ;;  %v3563_v31 = vpop.f32.mrf.mxu1 }
 0x268   :  { %v1503_v34 = vpop.f32.mrf.mxu1 }
 0x269   :  { %1610 = vmatpush2.bf16.msra.mxu1 %v1558_v29  ;;  %v3966_v29 = vld [vmem:[%s5371_s0 + $0x150] ss:$12 sps:$4 sm:$0xff]  }
 0x26a   :  { %2459 = vmatprep.subr.bf16.mxu1 %v4067_v0  ;;  %v3564_v35 = vpop.f32.mrf.mxu1 }
 0x26b   :  { %v1569_v59 = vpack.c.bf16 %v3564_v35, %v3563_v31  ;;  %v3968_v31 = vld [vmem:[%s5371_s0 + $0x16c] ss:$12 sps:$4 sm:$0xff]   ;;  %v3972_v35 = vld [vmem:[%s5371_s0 + $0x184] ss:$12 sps:$4 sm:$0xff]  }
 0x26c   :  { %1612 = vmatmul.mubr.bf16.vlgmr.msra.gmra.mxu1 %v3926_v32  ;;  %v1506_v38 = vpop.f32.mrf.mxu1  ;;  %v3969_v32 = vld [vmem:[%s5371_s0 + $0x158] ss:$12 sps:$4 sm:$0xff]  }
 0x26d   :  { %1619 = vmatprep.mubr.bf16.mxu1 %v3927_v33  ;;  %v1568_v61 = vpack.c.bf16 %v1506_v38, %v1503_v34  ;;  %v3970_v33 = vld [vmem:[%s5371_s0 + $0x168] ss:$12 sps:$4 sm:$0xff]   ;;  %v3971_v34 = vld [vmem:[%s5371_s0 + $0x170] ss:$12 sps:$4 sm:$0xff]   ;;  %v3974_v38 = vld [vmem:[%s5371_s0 + $0x180] ss:$12 sps:$4 sm:$0xff]  }
 0x274   :  { %1620 = vmatmul.mubr.bf16.gmra.mxu1 %v3928_v36  ;;  %v3973_v36 = vld [vmem:[%s5371_s0 + $0x188] ss:$12 sps:$4 sm:$0xff]  }
 0x275   :  { %1627 = vmatprep.mubr.bf16.mxu1 %v3929_v37  ;;  %v3920_v37 = vld [vmem:[%s5372_s2 + $0x38] sm:$0xff]  }
 0x276   :  { %v3567_v39 = vpop.f32.mrf.mxu1 }
 0x278   :  { %v1519_v40 = vpop.f32.mrf.mxu1 }
 0x27a   :  { %v3568_v45 = vpop.f32.mrf.mxu1 }
 0x27b   :  { %v1571_v55 = vpack.c.bf16 %v3568_v45, %v3567_v39  ;;  %v3975_v39 = vld [vmem:[%s5371_s0 + $0x19c] ss:$12 sps:$4 sm:$0xff]  }
 0x27c   :  { %1628 = vmatmul.mubr.bf16.gmra.mxu1 %v3930_v43  ;;  %v1522_v41 = vpop.f32.mrf.mxu1  ;;  %v3921_v43 = vld [vmem:[%s5372_s2 + $0x30] sm:$0xff]   ;;  %v3922_v45 = vld [vmem:[%s5372_s2 + $0x28] sm:$0xff]  }
 0x27d   :  { %1635 = vmatprep.mubr.bf16.mxu1 %v3931_v44  ;;  %v1570_v57 = vpack.c.bf16 %v1522_v41, %v1519_v40  ;;  %v3976_v40 = vld [vmem:[%s5371_s0 + $0x1a0] ss:$12 sps:$4 sm:$0xff]   ;;  %v3977_v44 = vld [vmem:[%s5371_s0 + $0x1b8] ss:$12 sps:$4 sm:$0xff]  }
 0x27e   :  { %v3978_v41 = vld [vmem:[%s5371_s0 + $0x198] ss:$12 sps:$4 sm:$0xff]  }
 0x284   :  { %1636 = vmatmul.mubr.bf16.gmra.mxu1 %v3932_v46  ;;  %v3979_v46 = vld [vmem:[%s5371_s0 + $0x1b4] ss:$12 sps:$4 sm:$0xff]  }
 0x285   :  { %1643 = vmatprep.mubr.bf16.mxu1 %v3933_v47  ;;  %v3980_v47 = vld [vmem:[%s5371_s0 + $0x1d0] ss:$12 sps:$4 sm:$0xff]  }
 0x286   :  { %v3571_v48 = vpop.f32.mrf.mxu1 }
 0x288   :  { %v1535_v49 = vpop.f32.mrf.mxu1 }
 0x28a   :  { %v3572_v50 = vpop.f32.mrf.mxu1 }
 0x28b   :  { %v1573_v51 = vpack.c.bf16 %v3572_v50, %v3571_v48  ;;  %v3923_v48 = vld [vmem:[%s5372_s2 + $0x20] sm:$0xff]   ;;  %v3982_v50 = vld [vmem:[%s5371_s0 + $0x1b0] ss:$12 sps:$4 sm:$0xff]  }
 0x28c   :  { %v1538_v52 = vpop.f32.mrf.mxu1  ;;  %1644 = vmatmul.mubr.bf16.gmra.mxu1 %v3934_v15  ;;  %v3985_v15 = vld [vmem:[%s5371_s0 + $0x218] ss:$12 sps:$4 sm:$0xff]  }
 0x28d   :  { %v1572_v53 = vpack.c.bf16 %v1538_v52, %v1535_v49  ;;  %3573 = vmatprep.subr.bf16.mxu0 %v1573_v51  ;;  %1651 = vmatprep.mubr.bf16.mxu1 %v3935_v54  ;;  %v3981_v49 = vld [vmem:[%s5371_s0 + $0x1e8] ss:$12 sps:$4 sm:$0xff]   ;;  %v3984_v52 = vld [vmem:[%s5371_s0 + $0x200] ss:$12 sps:$4 sm:$0xff]   ;;  %v3987_v54 = vld [vmem:[%s5371_s0 + $0x1e4] ss:$12 sps:$4 sm:$0xff]  }
 0x28e   :  { %3574 = vmatpush3.bf16.msra.mxu0 %v1573_v51  ;;  %v3983_v51 = vld [vmem:[%s5371_s0 + $0x1cc] ss:$12 sps:$4 sm:$0xff]  }
 0x28f   :  { %3575 = vmatprep.subr.bf16.mxu0 %v1572_v53 }
 0x292   :  { %3576 = vmatpush3.bf16.msra.mxu0 %v1572_v53  ;;  %v3986_v53 = vld [vmem:[%s5371_s0 + $0x1c8] ss:$12 sps:$4 sm:$0xff]  }
 0x293   :  { %3577 = vmatprep.subr.bf16.mxu0 %v1571_v55 }
 0x294   :  { %1652 = vmatmul.mubr.bf16.gmra.mxu1 %v3936_v56  ;;  %v3989_v56 = vld [vmem:[%s5371_s0 + $0x1e0] ss:$12 sps:$4 sm:$0xff]  }
 0x295   :  { %1659 = vmatprep.mubr.bf16.mxu1 %v3937_v58  ;;  %v3991_v58 = vld [vmem:[%s5371_s0 + $0x1f8] ss:$12 sps:$4 sm:$0xff]  }
 0x296   :  { %3578 = vmatpush3.bf16.msra.mxu0 %v1571_v55  ;;  %v3988_v55 = vld [vmem:[%s5371_s0 + $0x230] ss:$12 sps:$4 sm:$0xff]  }
 0x297   :  { %3579 = vmatprep.subr.bf16.mxu0 %v1570_v57 }
 0x29a   :  { %3580 = vmatpush3.bf16.msra.mxu0 %v1570_v57  ;;  %v3990_v57 = vld [vmem:[%s5371_s0 + $0x1fc] ss:$12 sps:$4 sm:$0xff]  }
 0x29b   :  { %3581 = vmatprep.subr.bf16.mxu0 %v1569_v59 }
 0x29c   :  { %1660 = vmatmul.mubr.bf16.gmra.mxu1 %v3938_v60  ;;  %v3993_v60 = vld [vmem:[%s5371_s0 + $0x210] ss:$12 sps:$4 sm:$0xff]  }
 0x29d   :  { %1667 = vmatprep.mubr.bf16.mxu1 %v3939_v62  ;;  %v3995_v62 = vld [vmem:[%s5371_s0 + $0x228] ss:$12 sps:$4 sm:$0xff]  }
 0x29e   :  { %3582 = vmatpush3.bf16.msra.mxu0 %v1569_v59  ;;  %v3992_v59 = vld [vmem:[%s5371_s0 + $0x214] ss:$12 sps:$4 sm:$0xff]  }
 0x29f   :  { %3583 = vmatprep.subr.bf16.mxu0 %v1568_v61 }
 0x2a2   :  { %3584 = vmatpush3.bf16.msra.mxu0 %v1568_v61  ;;  %v3994_v61 = vld [vmem:[%s5371_s0 + $0x22c] ss:$12 sps:$4 sm:$0xff]  }
 0x2a3   :  { %3585 = vmatprep.subr.bf16.mxu0 %v1567_v63 }
 0x2a4   :  { %1668 = vmatmul.mubr.bf16.gmra.mxu1 %v3940_v1 }
 0x2a5   :  { %1675 = vmatprep.mubr.bf16.mxu1 %v3941_v3 }
 0x2a6   :  { %3586 = vmatpush3.bf16.msra.mxu0 %v1567_v63 }
 0x2a7   :  { %3587 = vmatprep.subr.bf16.mxu0 %v1566_v2 }
 0x2aa   :  { %3588 = vmatpush3.bf16.msra.mxu0 %v1566_v2 }
 0x2ab   :  { %3637 = vmatprep.subr.bf16.mxu0 %v3920_v37 }
 0x2ac   :  { %1676 = vmatmul.mubr.bf16.gmra.mxu1 %v3942_v4 }
 0x2ad   :  { %3590 = vmatmul.mubr.bf16.vlgmr.msra.gmra.mxu0 %v3943_v5  ;;  %1683 = vmatprep.mubr.bf16.mxu1 %v3944_v6 }
 0x2ae   :  { %3593 = vmatprep.mubr.bf16.mxu0 %v3945_v7  ;;  %3638 = vmatpush3.bf16.msra.mxu0 %v3920_v37 }
 0x2af   :  { %3639 = vmatprep.subr.bf16.mxu0 %v3921_v43 }
 0x2b2   :  { %3640 = vmatpush3.bf16.msra.mxu0 %v3921_v43 }
 0x2b3   :  { %3641 = vmatprep.subr.bf16.mxu0 %v3922_v45 }
 0x2b4   :  { %1684 = vmatmul.mubr.bf16.gmra.mxu1 %v3946_v8 }
 0x2b5   :  { %3594 = vmatmul.mubr.bf16.gmra.mxu0 %v3947_v9  ;;  %1691 = vmatprep.mubr.bf16.mxu1 %v3948_v10 }
 0x2b6   :  { %3597 = vmatprep.mubr.bf16.mxu0 %v3949_v11  ;;  %3642 = vmatpush3.bf16.msra.mxu0 %v3922_v45 }
 0x2b7   :  { %3643 = vmatprep.subr.bf16.mxu0 %v3923_v48 }
 0x2ba   :  { %3644 = vmatpush3.bf16.msra.mxu0 %v3923_v48 }
 0x2bc   :  { %1692 = vmatmul.mubr.bf16.gmra.mxu1 %v3950_v12 }
 0x2bd   :  { %3598 = vmatmul.mubr.bf16.gmra.mxu0 %v3951_v13  ;;  %1699 = vmatprep.mubr.bf16.mxu1 %v3952_v14 }
 0x2be   :  { %3601 = vmatprep.mubr.bf16.mxu0 %v3953_v16 }
 0x2c4   :  { %1700 = vmatmul.mubr.bf16.gmra.mxu1 %v3954_v17 }
 0x2c5   :  { %3602 = vmatmul.mubr.bf16.gmra.mxu0 %v3955_v18  ;;  %1707 = vmatprep.mubr.bf16.mxu1 %v3956_v19 }
 0x2c6   :  { %3605 = vmatprep.mubr.bf16.mxu0 %v3957_v20 }
 0x2cc   :  { %1708 = vmatmul.mubr.bf16.gmra.mxu1 %v3958_v21 }
 0x2cd   :  { %3606 = vmatmul.mubr.bf16.gmra.mxu0 %v3959_v22  ;;  %1715 = vmatprep.mubr.bf16.mxu1 %v3960_v23 }
 0x2ce   :  { %3609 = vmatprep.mubr.bf16.mxu0 %v3961_v24 }
 0x2d4   :  { %1716 = vmatmul.mubr.bf16.gmra.mxu1 %v3962_v25 }
 0x2d5   :  { %3610 = vmatmul.mubr.bf16.gmra.mxu0 %v3963_v26  ;;  %1723 = vmatprep.mubr.bf16.mxu1 %v3964_v27 }
 0x2d6   :  { %3613 = vmatprep.mubr.bf16.mxu0 %v3965_v28 }
 0x2dc   :  { %1724 = vmatmul.mubr.bf16.gmra.mxu1 %v3966_v29 }
 0x2dd   :  { %3614 = vmatmul.mubr.bf16.gmra.mxu0 %v3967_v30  ;;  %1731 = vmatprep.mubr.bf16.mxu1 %v3968_v31 }
 0x2de   :  { %3617 = vmatprep.mubr.bf16.mxu0 %v3969_v32 }
 0x2e4   :  { %1732 = vmatmul.mubr.bf16.gmra.mxu1 %v3970_v33  ;;  %v4775_v33 = vld [vmem:[%s5373_s3 + $0x1] ss:$0 sm:$0xff] }
 0x2e5   :  { %3618 = vmatmul.mubr.bf16.gmra.mxu0 %v3971_v34  ;;  %1739 = vmatprep.mubr.bf16.mxu1 %v3972_v35 }
 0x2e6   :  { %3621 = vmatprep.mubr.bf16.mxu0 %v3973_v36 }
 0x2ec   :  { %1740 = vmatmul.mubr.bf16.gmra.mxu1 %v3974_v38 }
 0x2ed   :  { %1747 = vmatprep.mubr.bf16.mxu1 %v3975_v39  ;;  %3622 = vmatmul.mubr.bf16.gmra.mxu0 %v3976_v40 }
 0x2ee   :  { %3625 = vmatprep.mubr.bf16.mxu0 %v3977_v44 }
 0x2f4   :  { %1748 = vmatmul.mubr.bf16.gmra.mxu1 %v3978_v41 }
 0x2f5   :  { %1755 = vmatprep.mubr.bf16.mxu1 %v3979_v46  ;;  %3626 = vmatmul.mubr.bf16.gmra.mxu0 %v3980_v47 }
 0x2f6   :  { %3629 = vmatprep.mubr.bf16.mxu0 %v3981_v49 }
 0x2fc   :  { %1756 = vmatmul.mubr.bf16.gmra.mxu1 %v3982_v50 }
 0x2fd   :  { %1763 = vmatprep.mubr.bf16.mxu1 %v3983_v51  ;;  %3630 = vmatmul.mubr.bf16.gmra.mxu0 %v3984_v52 }
 0x2fe   :  { %3633 = vmatprep.mubr.bf16.mxu0 %v3985_v15 }
 0x304   :  { %1764 = vmatmul.mubr.bf16.gmra.mxu1 %v3986_v53 }
 0x305   :  { %1771 = vmatprep.mubr.bf16.mxu1 %v3987_v54  ;;  %3634 = vmatmul.mubr.bf16.gmra.mxu0 %v3988_v55 }
 0x30c   :  { %1772 = vmatmul.mubr.bf16.gmra.mxu1 %v3989_v56 }
 0x30d   :  { %1779 = vmatprep.mubr.bf16.mxu1 %v3990_v57 }
 0x314   :  { %1780 = vmatmul.mubr.bf16.gmra.mxu1 %v3991_v58 }
 0x315   :  { %1787 = vmatprep.mubr.bf16.mxu1 %v3992_v59 }
 0x31c   :  { %1788 = vmatmul.mubr.bf16.gmra.mxu1 %v3993_v60 }
 0x31d   :  { %1795 = vmatprep.mubr.bf16.mxu1 %v3994_v61 }
 0x324   :  { %1796 = vmatmul.mubr.bf16.gmra.mxu1 %v3995_v62 }
 0x325   :  { %2491 = vmatprep.mubr.bf16.mxu1 %v4502_v42 }
 0x32c   :  { %v1613_v63 = vpop.f32.mrf.mxu1 }
 0x32d   :  { %v1614_v37 = vadd.f32 %v4775_v33, %v1613_v63 }
 0x32e   :  { %v1615_v1 = vpop.f32.mrf.mxu1 }
 0x330   :  { %v1616_v2 = vpop.f32.mrf.mxu1 }
 0x331   :  { %v1617_v44 = vadd.f32 %v4775_v33, %v1616_v2 }
 0x332   :  { %v1618_v3 = vpop.f32.mrf.mxu1 }
 0x334   :  { %v1621_v4 = vpop.f32.mrf.mxu1 }
 0x335   :  { %v1622_v40 = vadd.f32 %v4775_v33, %v1621_v4 }
 0x336   :  { %v1623_v5 = vpop.f32.mrf.mxu1 }
 0x338   :  { %v1624_v6 = vpop.f32.mrf.mxu1 }
 0x339   :  { %v1625_v38 = vadd.f32 %v4775_v33, %v1624_v6 }
 0x33a   :  { %v1626_v7 = vpop.f32.mrf.mxu1 }
 0x33c   :  { %v1629_v8 = vpop.f32.mrf.mxu1 }
 0x33d   :  { %v1630_v57 = vadd.f32 %v4775_v33, %v1629_v8 }
 0x33e   :  { %v1631_v9 = vpop.f32.mrf.mxu1 }
 0x340   :  { %v1632_v10 = vpop.f32.mrf.mxu1 }
 0x341   :  { %v1633_v1 = vadd.f32 %v4775_v33, %v1632_v10 }
 0x342   :  { %v1634_v11 = vpop.f32.mrf.mxu1 }
 0x344   :  { %v1637_v12 = vpop.f32.mrf.mxu1 }
 0x345   :  { %v1638_v61 = vadd.f32 %v4775_v33, %v1637_v12 }
 0x346   :  { %v1639_v13 = vpop.f32.mrf.mxu1 }
 0x348   :  { %v1640_v14 = vpop.f32.mrf.mxu1 }
 0x349   :  { %v1641_v58 = vadd.f32 %v4775_v33, %v1640_v14 }
 0x34a   :  { %v1642_v16 = vpop.f32.mrf.mxu1 }
 0x34c   :  { %v4756_v17 = vpop.f32.mrf.mxu1 }
 0x34d   :  { %v1646_v10 = vadd.f32 %v4775_v33, %v4756_v17 }
 0x34e   :  { %v1647_v18 = vpop.f32.mrf.mxu1 }
 0x350   :  { %v4758_v42 = vpop.f32.mrf.mxu1 }
 0x352   :  { %v1650_v19 = vpop.f32.mrf.mxu1 }
 0x354   :  { %v4760_v20 = vpop.f32.mrf.mxu1 }
 0x356   :  { %v1655_v21 = vpop.f32.mrf.mxu1 }
 0x358   :  { %v1656_v22 = vpop.f32.mrf.mxu1 }
 0x359   :  { %v1657_v19 = vadd.f32 %v4775_v33, %v1656_v22 }
 0x35a   :  { %v1658_v23 = vpop.f32.mrf.mxu1 }
 0x35c   :  { %v4762_v24 = vpop.f32.mrf.mxu1 }
 0x35e   :  { %v1663_v25 = vpop.f32.mrf.mxu1 }
 0x35f   :  { %v1654_v25 = vadd.f32 %v4775_v33, %v4760_v20 }
 0x360   :  { %v4764_v26 = vpop.f32.mrf.mxu1 }
 0x362   :  { %v1666_v27 = vpop.f32.mrf.mxu1 }
 0x364   :  { %v4766_v28 = vpop.f32.mrf.mxu1 }
 0x366   :  { %v1671_v29 = vpop.f32.mrf.mxu1 }
 0x368   :  { %v4768_v30 = vpop.f32.mrf.mxu1 }
 0x36a   :  { %v1674_v31 = vpop.f32.mrf.mxu1 }
 0x36b   :  { %v1649_v31 = vadd.f32 %v4775_v33, %v4758_v42  ;;  %v1662_v42 = vadd.f32 %v4775_v33, %v4762_v24 }
 0x36c   :  { %v4770_v32 = vpop.f32.mrf.mxu1 }
 0x36d   :  { %v3591_v34 = vpop.f32.mrf.mxu0 }
 0x36e   :  { %v1679_v35 = vpop.f32.mrf.mxu1  ;;  %v1847_v47 = vadd.f32 %v3591_v34, %v1622_v40 }
 0x36f   :  { %v1838_v36 = vpop.f32.mrf.mxu0 }
 0x370   :  { %v4779_v39 = vpop.f32.mrf.mxu1  ;;  %v1839_v45 = vadd.f32 %v1838_v36, %v1614_v37  ;;  %v2031_v55 = vmax.f32 %v1847_v47, 0.0  ;;  %v1673_v47 = vadd.f32 %v4775_v33, %v4768_v30 }
 0x371   :  { %v3592_v43 = vpop.f32.mrf.mxu0 }
 0x372   :  { %v1850_v41 = vadd.f32 %v3592_v43, %v1625_v38  ;;  %v1682_v46 = vpop.f32.mrf.mxu1  ;;  %v2029_v15 = vmax.f32 %v1839_v45, 0.0 }
 0x373   :  { %v1841_v48 = vpop.f32.mrf.mxu0 }
 0x374   :  { %v1842_v49 = vadd.f32 %v1841_v48, %v1617_v44  ;;  %v4783_v50 = vpop.f32.mrf.mxu1  ;;  %v2032_v51 = vmax.f32 %v1850_v41, 0.0 }
 0x375   :  { %v3595_v52 = vpop.f32.mrf.mxu0 }
 0x376   :  { %v2030_v53 = vmax.f32 %v1842_v49, 0.0  ;;  %v1687_v54 = vpop.f32.mrf.mxu1  ;;  %v2078_v62 = vpack.c.bf16 %v2032_v51, %v2031_v55  ;;  %v1863_v5 = vadd.f32 %v3595_v52, %v1638_v61  ;;  %v1670_v51 = vadd.f32 %v4775_v33, %v4766_v28 }
 0x377   :  { %v1854_v56 = vpop.f32.mrf.mxu0 }
 0x378   :  { %v2077_v59 = vpack.c.bf16 %v2030_v53, %v2029_v15  ;;  %v4787_v60 = vpop.f32.mrf.mxu1  ;;  %v1855_v2 = vadd.f32 %v1854_v56, %v1630_v57  ;;  %v2035_v16 = vmax.f32 %v1863_v5, 0.0  ;;  %v1665_v53 = vadd.f32 %v4775_v33, %v4764_v26 }
 0x379   :  { %v3596_v63 = vpop.f32.mrf.mxu0  ;;  %v1678_v26 = vadd.f32 %v4775_v33, %v4770_v32 }
 0x37a   :  { %v1866_v3 = vadd.f32 %v3596_v63, %v1641_v58  ;;  %3645 = vmatprep.mubr.msk.bf16.mxu0 %vm1252_vm0, %v2077_v59  ;;  %v1690_v4 = vpop.f32.mrf.mxu1  ;;  %v2033_v13 = vmax.f32 %v1855_v2, 0.0 }
 0x37b   :  { %v1857_v6 = vpop.f32.mrf.mxu0  ;;  %3646 = vmatmul.mubr.msk.bf16.vlgmr.msra.gmra.mxu0 %vm1252_vm0, %v2078_v62 }
 0x37c   :  { %v1858_v7 = vadd.f32 %v1857_v6, %v1633_v1  ;;  %v4793_v8 = vpop.f32.mrf.mxu1  ;;  %v2036_v9 = vmax.f32 %v1866_v3, 0.0  ;;  %v1689_v3 = vadd.f32 %v4775_v33, %v4787_v60  ;;  %v1686_v6 = vadd.f32 %v4775_v33, %v4783_v50 }
 0x37d   :  { %v3599_v11 = vpop.f32.mrf.mxu0 }
 0x37e   :  { %v2034_v12 = vmax.f32 %v1858_v7, 0.0  ;;  %v1695_v14 = vpop.f32.mrf.mxu1  ;;  %v2080_v27 = vpack.c.bf16 %v2036_v9, %v2035_v16  ;;  %v1879_v37 = vadd.f32 %v3599_v11, %v1654_v25  ;;  %v1681_v11 = vadd.f32 %v4775_v33, %v4779_v39 }
 0x37f   :  { %v1870_v18 = vpop.f32.mrf.mxu0  ;;  %v1694_v39 = vadd.f32 %v4775_v33, %v4793_v8 }
 0x380   :  { %v2079_v21 = vpack.c.bf16 %v2034_v12, %v2033_v13  ;;  %v4798_v23 = vpop.f32.mrf.mxu1  ;;  %v1871_v34 = vadd.f32 %v1870_v18, %v1646_v10  ;;  %v2039_v41 = vmax.f32 %v1879_v37, 0.0 }
 0x381   :  { %v3600_v29 = vpop.f32.mrf.mxu0 }
 0x382   :  { %v1882_v35 = vadd.f32 %v3600_v29, %v1657_v19  ;;  %3649 = vmatprep.mubr.msk.bf16.mxu0 %vm1252_vm0, %v2079_v21  ;;  %v1698_v36 = vpop.f32.mrf.mxu1  ;;  %v2037_v44 = vmax.f32 %v1871_v34, 0.0 }
 0x383   :  { %v1873_v17 = vpop.f32.mrf.mxu0  ;;  %3650 = vmatmul.mubr.msk.bf16.gmra.mxu0 %vm1252_vm0, %v2080_v27 }
 0x384   :  { %v1874_v22 = vadd.f32 %v1873_v17, %v1649_v31  ;;  %v1701_v38 = vpop.f32.mrf.mxu1  ;;  %v2040_v40 = vmax.f32 %v1882_v35, 0.0 }
 0x385   :  { %v3603_v43 = vpop.f32.mrf.mxu0  ;;  %v1702_v36 = vadd.f32 %v4775_v33, %v1701_v38 }
 0x386   :  { %v2038_v20 = vmax.f32 %v1874_v22, 0.0  ;;  %v1703_v45 = vpop.f32.mrf.mxu1  ;;  %v2082_v52 = vpack.c.bf16 %v2040_v40, %v2039_v41  ;;  %v1895_v57 = vadd.f32 %v3603_v43, %v1670_v51  ;;  %v1697_v22 = vadd.f32 %v4775_v33, %v4798_v23 }
 0x387   :  { %v1886_v46 = vpop.f32.mrf.mxu0 }
 0x388   :  { %v2081_v48 = vpack.c.bf16 %v2038_v20, %v2037_v44  ;;  %v1704_v49 = vpop.f32.mrf.mxu1  ;;  %v1887_v54 = vadd.f32 %v1886_v46, %v1662_v42  ;;  %v2043_v1 = vmax.f32 %v1895_v57, 0.0 }
 0x389   :  { %v3604_v15 = vpop.f32.mrf.mxu0  ;;  %v1705_v31 = vadd.f32 %v4775_v33, %v1704_v49 }
 0x38a   :  { %v1898_v55 = vadd.f32 %v3604_v15, %v1673_v47  ;;  %3653 = vmatprep.mubr.msk.bf16.mxu0 %vm1252_vm0, %v2081_v48  ;;  %v1706_v56 = vpop.f32.mrf.mxu1  ;;  %v2041_v62 = vmax.f32 %v1887_v54, 0.0 }
 0x38b   :  { %v1889_v24 = vpop.f32.mrf.mxu0  ;;  %3654 = vmatmul.mubr.msk.bf16.gmra.mxu0 %vm1252_vm0, %v2082_v52 }
 0x38c   :  { %v1890_v30 = vadd.f32 %v1889_v24, %v1665_v53  ;;  %v1709_v58 = vpop.f32.mrf.mxu1  ;;  %v2044_v59 = vmax.f32 %v1898_v55, 0.0 }
 0x38d   :  { %v3607_v61 = vpop.f32.mrf.mxu0  ;;  %v1710_v23 = vadd.f32 %v4775_v33, %v1709_v58 }
 0x38e   :  { %v2042_v28 = vmax.f32 %v1890_v30, 0.0  ;;  %v1711_v63 = vpop.f32.mrf.mxu1  ;;  %v2084_v7 = vpack.c.bf16 %v2044_v59, %v2043_v1  ;;  %v1911_v16 = vadd.f32 %v3607_v61, %v1686_v6 }
 0x38f   :  { %v1902_v2 = vpop.f32.mrf.mxu0 }
 0x390   :  { %v2083_v4 = vpack.c.bf16 %v2042_v28, %v2041_v62  ;;  %v1712_v5 = vpop.f32.mrf.mxu1  ;;  %v1903_v13 = vadd.f32 %v1902_v2, %v1678_v26  ;;  %v2047_v27 = vmax.f32 %v1911_v16, 0.0 }
 0x391   :  { %v3608_v9 = vpop.f32.mrf.mxu0  ;;  %v1713_v57 = vadd.f32 %v4775_v33, %v1712_v5 }
 0x392   :  { %v1914_v12 = vadd.f32 %v3608_v9, %v1689_v3  ;;  %3657 = vmatprep.mubr.msk.bf16.mxu0 %vm1252_vm0, %v2083_v4  ;;  %v1714_v14 = vpop.f32.mrf.mxu1  ;;  %v2045_v21 = vmax.f32 %v1903_v13, 0.0 }
 0x393   :  { %v1905_v32 = vpop.f32.mrf.mxu0  ;;  %3658 = vmatmul.mubr.msk.bf16.gmra.mxu0 %vm1252_vm0, %v2084_v7 }
 0x394   :  { %v1906_v60 = vadd.f32 %v1905_v32, %v1681_v11  ;;  %v1717_v18 = vpop.f32.mrf.mxu1  ;;  %v2048_v10 = vmax.f32 %v1914_v12, 0.0 }
 0x395   :  { %v3611_v19 = vpop.f32.mrf.mxu0  ;;  %v1718_v54 = vadd.f32 %v4775_v33, %v1717_v18 }
 0x396   :  { %v2046_v50 = vmax.f32 %v1906_v60, 0.0  ;;  %v1719_v25 = vpop.f32.mrf.mxu1  ;;  %v2086_v37 = vpack.c.bf16 %v2048_v10, %v2047_v27  ;;  %v1927_v20 = vadd.f32 %v3611_v19, %v1702_v36 }
 0x397   :  { %v1918_v29 = vpop.f32.mrf.mxu0 }
 0x398   :  { %v2085_v34 = vpack.c.bf16 %v2046_v50, %v2045_v21  ;;  %v1720_v35 = vpop.f32.mrf.mxu1  ;;  %v1919_v40 = vadd.f32 %v1918_v29, %v1694_v39  ;;  %v2051_v49 = vmax.f32 %v1927_v20, 0.0 }
 0x399   :  { %v3612_v17 = vpop.f32.mrf.mxu0  ;;  %v1721_v52 = vadd.f32 %v4775_v33, %v1720_v35 }
 0x39a   :  { %v1930_v43 = vadd.f32 %v3612_v17, %v1705_v31  ;;  %3661 = vmatprep.mubr.msk.bf16.mxu0 %vm1252_vm0, %v2085_v34  ;;  %v1722_v44 = vpop.f32.mrf.mxu1  ;;  %v2049_v47 = vmax.f32 %v1919_v40, 0.0 }
 0x39b   :  { %v1921_v45 = vpop.f32.mrf.mxu0  ;;  %3662 = vmatmul.mubr.msk.bf16.gmra.mxu0 %vm1252_vm0, %v2086_v37 }
 0x39c   :  { %v1922_v8 = vadd.f32 %v1921_v45, %v1697_v22  ;;  %v1725_v41 = vpop.f32.mrf.mxu1  ;;  %v2052_v46 = vmax.f32 %v1930_v43, 0.0 }
 0x39d   :  { %v3615_v42 = vpop.f32.mrf.mxu0  ;;  %v1726_v7 = vadd.f32 %v4775_v33, %v1725_v41 }
 0x39e   :  { %v2050_v38 = vmax.f32 %v1922_v8, 0.0  ;;  %v1727_v48 = vpop.f32.mrf.mxu1  ;;  %v2088_v55 = vpack.c.bf16 %v2052_v46, %v2051_v49  ;;  %v1943_v61 = vadd.f32 %v3615_v42, %v1718_v54 }
 0x39f   :  { %v1934_v51 = vpop.f32.mrf.mxu0 }
 0x3a0   :  { %v2087_v15 = vpack.c.bf16 %v2050_v38, %v2049_v47  ;;  %v1728_v53 = vpop.f32.mrf.mxu1  ;;  %v1935_v24 = vadd.f32 %v1934_v51, %v1710_v23  ;;  %v2055_v4 = vmax.f32 %v1943_v61, 0.0 }
 0x3a1   :  { %v3616_v56 = vpop.f32.mrf.mxu0  ;;  %v1729_v16 = vadd.f32 %v4775_v33, %v1728_v53 }
 0x3a2   :  { %v1946_v30 = vadd.f32 %v3616_v56, %v1721_v52  ;;  %3665 = vmatprep.mubr.msk.bf16.mxu0 %vm1252_vm0, %v2087_v15  ;;  %v1730_v59 = vpop.f32.mrf.mxu1  ;;  %v2053_v2 = vmax.f32 %v1935_v24, 0.0 }
 0x3a3   :  { %v1937_v62 = vpop.f32.mrf.mxu0  ;;  %3666 = vmatmul.mubr.msk.bf16.gmra.mxu0 %vm1252_vm0, %v2088_v55 }
 0x3a4   :  { %v1938_v58 = vadd.f32 %v1937_v62, %v1713_v57  ;;  %v1733_v28 = vpop.f32.mrf.mxu1  ;;  %v2056_v63 = vmax.f32 %v1946_v30, 0.0 }
 0x3a5   :  { %v3619_v1 = vpop.f32.mrf.mxu0  ;;  %v1734_v6 = vadd.f32 %v4775_v33, %v1733_v28 }
 0x3a6   :  { %v2054_v26 = vmax.f32 %v1938_v58, 0.0  ;;  %v1735_v3 = vpop.f32.mrf.mxu1  ;;  %v2090_v13 = vpack.c.bf16 %v2056_v63, %v2055_v4 }
 0x3a7   :  { %v1950_v5 = vpop.f32.mrf.mxu0  ;;  %v1959_v18 = vadd.f32 %v3619_v1, %v1734_v6 }
 0x3a8   :  { %v2089_v9 = vpack.c.bf16 %v2054_v26, %v2053_v2  ;;  %v1736_v11 = vpop.f32.mrf.mxu1  ;;  %v1951_v32 = vadd.f32 %v1950_v5, %v1726_v7 }
 0x3a9   :  { %v3620_v12 = vpop.f32.mrf.mxu0  ;;  %v1737_v14 = vadd.f32 %v4775_v33, %v1736_v11  ;;  %v2059_v35 = vmax.f32 %v1959_v18, 0.0 }
 0x3aa   :  { %3669 = vmatprep.mubr.msk.bf16.mxu0 %vm1252_vm0, %v2089_v9  ;;  %v1738_v60 = vpop.f32.mrf.mxu1  ;;  %v2057_v39 = vmax.f32 %v1951_v32, 0.0 }
 0x3ab   :  { %v1962_v10 = vadd.f32 %v3620_v12, %v1737_v14  ;;  %v1953_v19 = vpop.f32.mrf.mxu0  ;;  %3670 = vmatmul.mubr.msk.bf16.gmra.mxu0 %vm1252_vm0, %v2090_v13 }
 0x3ac   :  { %v1954_v21 = vadd.f32 %v1953_v19, %v1729_v16  ;;  %v1741_v50 = vpop.f32.mrf.mxu1 }
 0x3ad   :  { %v2060_v25 = vmax.f32 %v1962_v10, 0.0  ;;  %v1742_v27 = vadd.f32 %v4775_v33, %v1741_v50  ;;  %v3623_v29 = vpop.f32.mrf.mxu0 }
 0x3ae   :  { %v2058_v31 = vmax.f32 %v1954_v21, 0.0  ;;  %v1743_v34 = vpop.f32.mrf.mxu1 }
 0x3af   :  { %v1966_v36 = vpop.f32.mrf.mxu0  ;;  %v2092_v40 = vpack.c.bf16 %v2060_v25, %v2059_v35 }
 0x3b0   :  { %v2091_v37 = vpack.c.bf16 %v2058_v31, %v2057_v39  ;;  %v1744_v17 = vpop.f32.mrf.mxu1  ;;  %v1967_v22 = vadd.f32 %v1966_v36, %v1742_v27 }
 0x3b1   :  { %v1745_v43 = vadd.f32 %v4775_v33, %v1744_v17  ;;  %v3624_v44 = vpop.f32.mrf.mxu0 }
 0x3b2   :  { %3673 = vmatprep.mubr.msk.bf16.mxu0 %vm1252_vm0, %v2091_v37  ;;  %v1746_v20 = vpop.f32.mrf.mxu1  ;;  %v2061_v41 = vmax.f32 %v1967_v22, 0.0 }
 0x3b3   :  { %3674 = vmatmul.mubr.msk.bf16.gmra.mxu0 %vm1252_vm0, %v2092_v40  ;;  %v1969_v45 = vpop.f32.mrf.mxu0 }
 0x3b4   :  { %v1749_v8 = vpop.f32.mrf.mxu1  ;;  %v1970_v46 = vadd.f32 %v1969_v45, %v1745_v43 }
 0x3b5   :  { %v1750_v42 = vadd.f32 %v4775_v33, %v1749_v8  ;;  %v3627_v47 = vpop.f32.mrf.mxu0 }
 0x3b6   :  { %v1751_v38 = vpop.f32.mrf.mxu1  ;;  %v2062_v48 = vmax.f32 %v1970_v46, 0.0 }
 0x3b7   :  { %v1975_v49 = vadd.f32 %v3623_v29, %v1750_v42  ;;  %v1982_v52 = vpop.f32.mrf.mxu0 }
 0x3b8   :  { %v1752_v51 = vpop.f32.mrf.mxu1  ;;  %v2093_v23 = vpack.c.bf16 %v2062_v48, %v2061_v41 }
 0x3b9   :  { %v1753_v15 = vadd.f32 %v4775_v33, %v1752_v51  ;;  %v2063_v54 = vmax.f32 %v1975_v49, 0.0  ;;  %v3628_v57 = vpop.f32.mrf.mxu0 }
 0x3ba   :  { %v1754_v53 = vpop.f32.mrf.mxu1  ;;  %3677 = vmatprep.mubr.msk.bf16.mxu0 %vm1252_vm0, %v2093_v23 }
 0x3bb   :  { %v1978_v55 = vadd.f32 %v3624_v44, %v1753_v15  ;;  %v1985_v28 = vpop.f32.mrf.mxu0 }
 0x3bc   :  { %v1757_v56 = vpop.f32.mrf.mxu1 }
 0x3bd   :  { %v1758_v24 = vadd.f32 %v4775_v33, %v1757_v56  ;;  %v2064_v30 = vmax.f32 %v1978_v55, 0.0  ;;  %v3631_v4 = vpop.f32.mrf.mxu0 }
 0x3be   :  { %v1759_v59 = vpop.f32.mrf.mxu1 }
 0x3bf   :  { %v2094_v61 = vpack.c.bf16 %v2064_v30, %v2063_v54  ;;  %v1983_v62 = vadd.f32 %v1982_v52, %v1758_v24  ;;  %v1998_v12 = vpop.f32.mrf.mxu0 }
 0x3c0   :  { %v1760_v58 = vpop.f32.mrf.mxu1 }
 0x3c1   :  { %v1761_v63 = vadd.f32 %v4775_v33, %v1760_v58  ;;  %3678 = vmatmul.mubr.msk.bf16.gmra.mxu0 %vm1252_vm0, %v2094_v61  ;;  %v2065_v2 = vmax.f32 %v1983_v62, 0.0  ;;  %v3632_v10 = vpop.f32.mrf.mxu0 }
 0x3c2   :  { %v1762_v1 = vpop.f32.mrf.mxu1 }
 0x3c3   :  { %v1986_v26 = vadd.f32 %v1985_v28, %v1761_v63  ;;  %v2001_v39 = vpop.f32.mrf.mxu0 }
 0x3c4   :  { %v1765_v3 = vpop.f32.mrf.mxu1 }
 0x3c5   :  { %v1766_v6 = vadd.f32 %v4775_v33, %v1765_v3  ;;  %v2066_v5 = vmax.f32 %v1986_v26, 0.0  ;;  %v3635_v17 = vpop.f32.mrf.mxu0 }
 0x3c6   :  { %v1767_v7 = vpop.f32.mrf.mxu1 }
 0x3c7   :  { %v1991_v9 = vadd.f32 %v3627_v47, %v1766_v6  ;;  %v2095_v11 = vpack.c.bf16 %v2066_v5, %v2065_v2  ;;  %v2014_v8 = vpop.f32.mrf.mxu0  ;;  %v3996_v5 = vld [vmem:[%s5371_s0 + $0x8] ss:$12 sps:$4 sm:$0xff]  }
 0x3c8   :  { %v1768_v13 = vpop.f32.mrf.mxu1 }
 0x3c9   :  { %v1769_v14 = vadd.f32 %v4775_v33, %v1768_v13  ;;  %3681 = vmatprep.mubr.msk.bf16.mxu0 %vm1252_vm0, %v2095_v11  ;;  %v2067_v32 = vmax.f32 %v1991_v9, 0.0  ;;  %v3636_v48 = vpop.f32.mrf.mxu0 }
 0x3ca   :  { %v1770_v16 = vpop.f32.mrf.mxu1 }
 0x3cb   :  { %v1994_v60 = vadd.f32 %v3628_v57, %v1769_v14  ;;  %v2017_v54 = vpop.f32.mrf.mxu0 }
 0x3cc   :  { %v1773_v18 = vpop.f32.mrf.mxu1 }
 0x3cd   :  { %v1774_v19 = vadd.f32 %v4775_v33, %v1773_v18  ;;  %v2068_v21 = vmax.f32 %v1994_v60, 0.0 }
 0x3ce   :  { %v1775_v50 = vpop.f32.mrf.mxu1 }
 0x3cf   :  { %v2096_v25 = vpack.c.bf16 %v2068_v21, %v2067_v32  ;;  %v1999_v27 = vadd.f32 %v1998_v12, %v1774_v19 }
 0x3d0   :  { %v1776_v29 = vpop.f32.mrf.mxu1 }
 0x3d1   :  { %v1777_v31 = vadd.f32 %v4775_v33, %v1776_v29  ;;  %3682 = vmatmul.mubr.msk.bf16.gmra.mxu0 %vm1252_vm0, %v2096_v25  ;;  %v2069_v35 = vmax.f32 %v1999_v27, 0.0 }
 0x3d2   :  { %v1778_v34 = vpop.f32.mrf.mxu1 }
 0x3d3   :  { %v2002_v36 = vadd.f32 %v2001_v39, %v1777_v31 }
 0x3d4   :  { %v1781_v37 = vpop.f32.mrf.mxu1 }
 0x3d5   :  { %v1782_v22 = vadd.f32 %v4775_v33, %v1781_v37  ;;  %v2070_v40 = vmax.f32 %v2002_v36, 0.0 }
 0x3d6   :  { %v1783_v43 = vpop.f32.mrf.mxu1 }
 0x3d7   :  { %v2007_v44 = vadd.f32 %v3631_v4, %v1782_v22  ;;  %v2097_v20 = vpack.c.bf16 %v2070_v40, %v2069_v35 }
 0x3d8   :  { %v1784_v45 = vpop.f32.mrf.mxu1 }
 0x3d9   :  { %v1785_v41 = vadd.f32 %v4775_v33, %v1784_v45  ;;  %3685 = vmatprep.mubr.msk.bf16.mxu0 %vm1252_vm0, %v2097_v20  ;;  %v2071_v42 = vmax.f32 %v2007_v44, 0.0 }
 0x3da   :  { %v1786_v46 = vpop.f32.mrf.mxu1 }
 0x3db   :  { %v2010_v47 = vadd.f32 %v3632_v10, %v1785_v41 }
 0x3dc   :  { %v1789_v38 = vpop.f32.mrf.mxu1 }
 0x3dd   :  { %v1790_v49 = vadd.f32 %v4775_v33, %v1789_v38  ;;  %v2072_v51 = vmax.f32 %v2010_v47, 0.0 }
 0x3de   :  { %v1791_v23 = vpop.f32.mrf.mxu1 }
 0x3df   :  { %v2098_v52 = vpack.c.bf16 %v2072_v51, %v2071_v42  ;;  %v2015_v15 = vadd.f32 %v2014_v8, %v1790_v49 }
 0x3e0   :  { %v1792_v53 = vpop.f32.mrf.mxu1 }
 0x3e1   :  { %v1793_v55 = vadd.f32 %v4775_v33, %v1792_v53  ;;  %3686 = vmatmul.mubr.msk.bf16.gmra.mxu0 %vm1252_vm0, %v2098_v52  ;;  %v2073_v57 = vmax.f32 %v2015_v15, 0.0 }
 0x3e2   :  { %v1794_v56 = vpop.f32.mrf.mxu1 }
 0x3e3   :  { %v2018_v24 = vadd.f32 %v2017_v54, %v1793_v55 }
 0x3e4   :  { %v1797_v30 = vpop.f32.mrf.mxu1 }
 0x3e5   :  { %v1798_v59 = vadd.f32 %v4775_v33, %v1797_v30  ;;  %v2074_v61 = vmax.f32 %v2018_v24, 0.0 }
 0x3e6   :  { %v1799_v62 = vpop.f32.mrf.mxu1 }
 0x3e7   :  { %v2023_v58 = vadd.f32 %v3635_v17, %v1798_v59  ;;  %v2099_v28 = vpack.c.bf16 %v2074_v61, %v2073_v57 }
 0x3e8   :  { %v1800_v63 = vpop.f32.mrf.mxu1 }
 0x3e9   :  { %v1801_v1 = vadd.f32 %v4775_v33, %v1800_v63  ;;  %3689 = vmatprep.mubr.msk.bf16.mxu0 %vm1252_vm0, %v2099_v28  ;;  %v2075_v26 = vmax.f32 %v2023_v58, 0.0  ;;  %v3997_v28 = vld [vmem:[%s5371_s0] ss:$12 sps:$4 sm:$0xff]  }
 0x3ea   :  { %v1802_v2 = vpop.f32.mrf.mxu1 }
 0x3eb   :  { %v2026_v3 = vadd.f32 %v3636_v48, %v1801_v1  ;;  %v3998_v1 = vld [vmem:[%s5371_s0 + $0x1c] ss:$12 sps:$4 sm:$0xff]  }
 0x3ed   :  { %v2076_v4 = vmax.f32 %v2026_v3, 0.0  ;;  %v4000_v3 = vld [vmem:[%s5371_s0 + $0x34] ss:$12 sps:$4 sm:$0xff]  }
 0x3ef   :  { %v2100_v6 = vpack.c.bf16 %v2076_v4, %v2075_v26 }
 0x3f1   :  { %3690 = vmatmul.mubr.msk.bf16.gmra.mxu0 %vm1252_vm0, %v2100_v6  ;;  %v4001_v6 = vld [vmem:[%s5371_s0 + $0x30] ss:$12 sps:$4 sm:$0xff]  }
 0x3f2   :  { %3709 = vmatprep.mubr.bf16.mxu0 %v3996_v5 }
 0x43b   :  { %v3647_v7 = vpop.f32.mrf.mxu0 }
 0x43d   :  { %v2239_v9 = vpop.f32.mrf.mxu0 }
 0x43f   :  { %v3648_v11 = vpop.f32.mrf.mxu0 }
 0x440   :  { %v2431_v46 = vpack.c.bf16 %v3648_v11, %v3647_v7  ;;  %v4002_v7 = vld [vmem:[%s5371_s0 + $0x4c] ss:$12 sps:$4 sm:$0xff]   ;;  %v4003_v11 = vld [vmem:[%s5371_s0 + $0x48] ss:$12 sps:$4 sm:$0xff]  }
 0x441   :  { %v2242_v13 = vpop.f32.mrf.mxu0 }
 0x442   :  { %v2430_v38 = vpack.c.bf16 %v2242_v13, %v2239_v9 }
 0x443   :  { %v3651_v12 = vpop.f32.mrf.mxu0 }
 0x445   :  { %v2255_v33 = vpop.f32.mrf.mxu0 }
 0x447   :  { %v3652_v14 = vpop.f32.mrf.mxu0 }
 0x448   :  { %v2433_v43 = vpack.c.bf16 %v3652_v14, %v3651_v12  ;;  %v4004_v12 = vld [vmem:[%s5371_s0 + $0x64] ss:$12 sps:$4 sm:$0xff]  }
 0x449   :  { %v2258_v16 = vpop.f32.mrf.mxu0 }
 0x44a   :  { %v2432_v45 = vpack.c.bf16 %v2258_v16, %v2255_v33 }
 0x44b   :  { %v3655_v32 = vpop.f32.mrf.mxu0 }
 0x44d   :  { %v2271_v60 = vpop.f32.mrf.mxu0 }
 0x44f   :  { %v3656_v18 = vpop.f32.mrf.mxu0 }
 0x450   :  { %v2435_v35 = vpack.c.bf16 %v3656_v18, %v3655_v32  ;;  %v4005_v18 = vld [vmem:[%s5371_s0 + $0x60] ss:$12 sps:$4 sm:$0xff]  }
 0x451   :  { %v2274_v10 = vpop.f32.mrf.mxu0 }
 0x452   :  { %v2434_v17 = vpack.c.bf16 %v2274_v10, %v2271_v60 }
 0x453   :  { %v3659_v19 = vpop.f32.mrf.mxu0 }
 0x455   :  { %v2287_v21 = vpop.f32.mrf.mxu0 }
 0x457   :  { %v3660_v50 = vpop.f32.mrf.mxu0 }
 0x458   :  { %v2437_v25 = vpack.c.bf16 %v3660_v50, %v3659_v19  ;;  %v4006_v19 = vld [vmem:[%s5371_s0 + $0x7c] ss:$12 sps:$4 sm:$0xff]   ;;  %v4007_v50 = vld [vmem:[%s5371_s0 + $0x78] ss:$12 sps:$4 sm:$0xff]  }
 0x459   :  { %v2290_v27 = vpop.f32.mrf.mxu0 }
 0x45a   :  { %2460 = vmatpush1.bf16.msra.mxu1 %v2437_v25  ;;  %v2436_v39 = vpack.c.bf16 %v2290_v27, %v2287_v21  ;;  %v4008_v25 = vld [vmem:[%s5371_s0 + $0x94] ss:$12 sps:$4 sm:$0xff]  }
 0x45b   :  { %v3663_v29 = vpop.f32.mrf.mxu0  ;;  %2461 = vmatprep.subr.bf16.mxu1 %v4067_v0 }
 0x45d   :  { %v4876_v31 = vpop.f32.mrf.mxu0 }
 0x45e   :  { %2462 = vmatpush1.bf16.msra.mxu1 %v2436_v39  ;;  %v4009_v39 = vld [vmem:[%s5371_s0 + $0x90] ss:$12 sps:$4 sm:$0xff]  }
 0x45f   :  { %v3664_v34 = vpop.f32.mrf.mxu0  ;;  %2463 = vmatprep.subr.bf16.mxu1 %v4067_v0 }
 0x460   :  { %v2439_v59 = vpack.c.bf16 %v3664_v34, %v3663_v29 }
 0x461   :  { %v2306_v36 = vpop.f32.mrf.mxu0 }
 0x462   :  { %2464 = vmatpush1.bf16.msra.mxu1 %v2435_v35  ;;  %v2438_v62 = vpack.c.bf16 %v2306_v36, %v4876_v31  ;;  %v4010_v31 = vld [vmem:[%s5371_s0 + $0xac] ss:$12 sps:$4 sm:$0xff]   ;;  %v4011_v36 = vld [vmem:[%s5371_s0 + $0xa8] ss:$12 sps:$4 sm:$0xff]  }
 0x463   :  { %v3667_v37 = vpop.f32.mrf.mxu0  ;;  %2465 = vmatprep.subr.bf16.mxu1 %v4067_v0 }
 0x465   :  { %v2319_v22 = vpop.f32.mrf.mxu0 }
 0x466   :  { %2466 = vmatpush1.bf16.msra.mxu1 %v2434_v17  ;;  %v4013_v17 = vld [vmem:[%s5371_s0 + $0x20] ss:$12 sps:$4 sm:$0xff]  }
 0x467   :  { %v3668_v40 = vpop.f32.mrf.mxu0  ;;  %2467 = vmatprep.subr.bf16.mxu1 %v4067_v0 }
 0x468   :  { %v2441_v56 = vpack.c.bf16 %v3668_v40, %v3667_v37  ;;  %v4012_v37 = vld [vmem:[%s5371_s0 + $0xc4] ss:$12 sps:$4 sm:$0xff]  }
 0x469   :  { %v2322_v44 = vpop.f32.mrf.mxu0  ;;  %v4015_v40 = vld [vmem:[%s5371_s0 + $0x38] ss:$12 sps:$4 sm:$0xff]  }
 0x46a   :  { %2468 = vmatpush1.bf16.msra.mxu1 %v2433_v43  ;;  %v2440_v24 = vpack.c.bf16 %v2322_v44, %v2319_v22  ;;  %v4014_v22 = vld [vmem:[%s5371_s0 + $0xc0] ss:$12 sps:$4 sm:$0xff]   ;;  %v4016_v43 = vld [vmem:[%s5371_s0 + $0xdc] ss:$12 sps:$4 sm:$0xff]  }
 0x46b   :  { %v3671_v20 = vpop.f32.mrf.mxu0  ;;  %2469 = vmatprep.subr.bf16.mxu1 %v4067_v0  ;;  %v4017_v44 = vld [vmem:[%s5371_s0 + $0x50] ss:$12 sps:$4 sm:$0xff]  }
 0x46d   :  { %v2335_v8 = vpop.f32.mrf.mxu0 }
 0x46e   :  { %2470 = vmatpush1.bf16.msra.mxu1 %v2432_v45  ;;  %v4019_v45 = vld [vmem:[%s5371_s0 + $0x68] ss:$12 sps:$4 sm:$0xff]  }
 0x46f   :  { %v3672_v41 = vpop.f32.mrf.mxu0  ;;  %2471 = vmatprep.subr.bf16.mxu1 %v4067_v0 }
 0x470   :  { %v2443_v15 = vpack.c.bf16 %v3672_v41, %v3671_v20  ;;  %v4018_v20 = vld [vmem:[%s5371_s0 + $0xd8] ss:$12 sps:$4 sm:$0xff]   ;;  %v4021_v41 = vld [vmem:[%s5371_s0 + $0x80] ss:$12 sps:$4 sm:$0xff]  }
 0x471   :  { %v2338_v42 = vpop.f32.mrf.mxu0 }
 0x472   :  { %2472 = vmatpush1.bf16.msra.mxu1 %v2431_v46  ;;  %v2442_v54 = vpack.c.bf16 %v2338_v42, %v2335_v8  ;;  %v4020_v8 = vld [vmem:[%s5371_s0 + $0xf4] ss:$12 sps:$4 sm:$0xff]   ;;  %v4022_v46 = vld [vmem:[%s5371_s0 + $0xf0] ss:$12 sps:$4 sm:$0xff]   ;;  %v4023_v42 = vld [vmem:[%s5371_s0 + $0x98] ss:$12 sps:$4 sm:$0xff]  }
 0x473   :  { %v3675_v47 = vpop.f32.mrf.mxu0  ;;  %2473 = vmatprep.subr.bf16.mxu1 %v4067_v0 }
 0x475   :  { %v2351_v48 = vpop.f32.mrf.mxu0 }
 0x476   :  { %2474 = vmatpush1.bf16.msra.mxu1 %v2430_v38  ;;  %v4025_v38 = vld [vmem:[%s5371_s0 + $0xb0] ss:$12 sps:$4 sm:$0xff]  }
 0x477   :  { %v3676_v49 = vpop.f32.mrf.mxu0  ;;  %2475 = vmatprep.subr.bf16.mxu1 %v4067_v0 }
 0x478   :  { %v2445_v51 = vpack.c.bf16 %v3676_v49, %v3675_v47  ;;  %v4024_v47 = vld [vmem:[%s5371_s0 + $0x10c] ss:$12 sps:$4 sm:$0xff]   ;;  %v4027_v49 = vld [vmem:[%s5371_s0 + $0xc8] ss:$12 sps:$4 sm:$0xff]  }
 0x479   :  { %v2354_v23 = vpop.f32.mrf.mxu0 }
 0x47a   :  { %2476 = vmatpush2.bf16.msra.mxu1 %v2445_v51  ;;  %v2444_v52 = vpack.c.bf16 %v2354_v23, %v2351_v48  ;;  %v4026_v48 = vld [vmem:[%s5371_s0 + $0x108] ss:$12 sps:$4 sm:$0xff]   ;;  %v4028_v51 = vld [vmem:[%s5371_s0 + $0x124] ss:$12 sps:$4 sm:$0xff]   ;;  %v4029_v23 = vld [vmem:[%s5371_s0 + $0xe0] ss:$12 sps:$4 sm:$0xff]  }
 0x47b   :  { %2477 = vmatprep.subr.bf16.mxu1 %v4067_v0 }
 0x47e   :  { %2478 = vmatpush2.bf16.msra.mxu1 %v2444_v52  ;;  %v4030_v52 = vld [vmem:[%s5371_s0 + $0x120] ss:$12 sps:$4 sm:$0xff]  }
 0x47f   :  { %2479 = vmatprep.subr.bf16.mxu1 %v4067_v0 }
 0x481   :  { %v4887_v53 = vpop.f32.mrf.mxu0 }
 0x482   :  { %2480 = vmatpush2.bf16.msra.mxu1 %v2443_v15  ;;  %v4031_v15 = vld [vmem:[%s5371_s0 + $0xf8] ss:$12 sps:$4 sm:$0xff]  }
 0x483   :  { %2481 = vmatprep.subr.bf16.mxu1 %v4067_v0  ;;  %v4890_v55 = vpop.f32.mrf.mxu0 }
 0x485   :  { %v4893_v57 = vpop.f32.mrf.mxu0 }
 0x486   :  { %2482 = vmatpush2.bf16.msra.mxu1 %v2442_v54  ;;  %v2447_v34 = vpack.c.bf16 %v4893_v57, %v4887_v53  ;;  %v4032_v53 = vld [vmem:[%s5371_s0 + $0x13c] ss:$12 sps:$4 sm:$0xff]   ;;  %v4036_v57 = vld [vmem:[%s5371_s0 + $0x154] ss:$12 sps:$4 sm:$0xff]  }
 0x487   :  { %2483 = vmatprep.subr.bf16.mxu1 %v4067_v0  ;;  %v4896_v30 = vpop.f32.mrf.mxu0  ;;  %v4033_v54 = vld [vmem:[%s5371_s0 + $0x110] ss:$12 sps:$4 sm:$0xff]  }
 0x488   :  { %v2446_v35 = vpack.c.bf16 %v4896_v30, %v4890_v55  ;;  %v4034_v55 = vld [vmem:[%s5371_s0 + $0x138] ss:$12 sps:$4 sm:$0xff]   ;;  %v4038_v30 = vld [vmem:[%s5371_s0 + $0x150] ss:$12 sps:$4 sm:$0xff]  }
 0x48a   :  { %2484 = vmatpush2.bf16.msra.mxu1 %v2441_v56  ;;  %v4035_v56 = vld [vmem:[%s5371_s0 + $0x128] ss:$12 sps:$4 sm:$0xff]  }
 0x48b   :  { %2485 = vmatprep.subr.bf16.mxu1 %v4067_v0 }
 0x48e   :  { %2486 = vmatpush2.bf16.msra.mxu1 %v2440_v24  ;;  %v4037_v24 = vld [vmem:[%s5371_s0 + $0x140] ss:$12 sps:$4 sm:$0xff]  }
 0x48f   :  { %2487 = vmatprep.subr.bf16.mxu1 %v4067_v0 }
 0x491   :  { %v3683_v61 = vpop.f32.mrf.mxu0 }
 0x492   :  { %2488 = vmatpush2.bf16.msra.mxu1 %v2439_v59  ;;  %v4039_v59 = vld [vmem:[%s5371_s0 + $0x158] ss:$12 sps:$4 sm:$0xff]  }
 0x493   :  { %2489 = vmatprep.subr.bf16.mxu1 %v4067_v0  ;;  %v2383_v58 = vpop.f32.mrf.mxu0  ;;  %v3999_v0 = vld [vmem:[%s5371_s0 + $0x18] ss:$12 sps:$4 sm:$0xff]  }
 0x495   :  { %v3684_v63 = vpop.f32.mrf.mxu0 }
 0x496   :  { %2490 = vmatpush2.bf16.msra.mxu1 %v2438_v62  ;;  %v2449_v27 = vpack.c.bf16 %v3684_v63, %v3683_v61  ;;  %v4040_v61 = vld [vmem:[%s5371_s0 + $0x16c] ss:$12 sps:$4 sm:$0xff]   ;;  %v4041_v62 = vld [vmem:[%s5371_s0 + $0x170] ss:$12 sps:$4 sm:$0xff]  }
 0x497   :  { %v2386_v2 = vpop.f32.mrf.mxu0  ;;  %v4044_v63 = vld [vmem:[%s5371_s0 + $0x184] ss:$12 sps:$4 sm:$0xff]  }
 0x498   :  { %v2448_v29 = vpack.c.bf16 %v2386_v2, %v2383_v58  ;;  %v4042_v58 = vld [vmem:[%s5371_s0 + $0x168] ss:$12 sps:$4 sm:$0xff]   ;;  %v4046_v2 = vld [vmem:[%s5371_s0 + $0x180] ss:$12 sps:$4 sm:$0xff]  }
 0x499   :  { %2492 = vmatmul.mubr.bf16.vlgmr.msra.gmra.mxu1 %v3997_v28  ;;  %v4043_v28 = vld [vmem:[%s5371_s0 + $0x188] ss:$12 sps:$4 sm:$0xff]  }
 0x49a   :  { %2499 = vmatprep.mubr.bf16.mxu1 %v3998_v1  ;;  %v4045_v1 = vld [vmem:[%s5371_s0 + $0x1a0] ss:$12 sps:$4 sm:$0xff]  }
 0x4a1   :  { %2500 = vmatmul.mubr.bf16.gmra.mxu1 %v3999_v0  ;;  %v3687_v26 = vpop.f32.mrf.mxu0  ;;  %v4047_v0 = vld [vmem:[%s5371_s0 + $0x1b8] ss:$12 sps:$4 sm:$0xff]  }
 0x4a2   :  { %2507 = vmatprep.mubr.bf16.mxu1 %v4000_v3  ;;  %v4049_v3 = vld [vmem:[%s5371_s0 + $0x1d0] ss:$12 sps:$4 sm:$0xff]  }
 0x4a3   :  { %v2399_v4 = vpop.f32.mrf.mxu0 }
 0x4a5   :  { %v3688_v5 = vpop.f32.mrf.mxu0 }
 0x4a6   :  { %v2451_v10 = vpack.c.bf16 %v3688_v5, %v3687_v26  ;;  %v4048_v26 = vld [vmem:[%s5371_s0 + $0x19c] ss:$12 sps:$4 sm:$0xff]   ;;  %v4052_v5 = vld [vmem:[%s5371_s0 + $0x1b4] ss:$12 sps:$4 sm:$0xff]  }
 0x4a7   :  { %v2402_v9 = vpop.f32.mrf.mxu0 }
 0x4a8   :  { %v2450_v21 = vpack.c.bf16 %v2402_v9, %v2399_v4  ;;  %v4050_v4 = vld [vmem:[%s5371_s0 + $0x198] ss:$12 sps:$4 sm:$0xff]   ;;  %v4054_v9 = vld [vmem:[%s5371_s0 + $0x1b0] ss:$12 sps:$4 sm:$0xff]  }
 0x4a9   :  { %2508 = vmatmul.mubr.bf16.gmra.mxu1 %v4001_v6  ;;  %v4051_v6 = vld [vmem:[%s5371_s0 + $0x1e8] ss:$12 sps:$4 sm:$0xff]  }
 0x4aa   :  { %2515 = vmatprep.mubr.bf16.mxu1 %v4002_v7  ;;  %v4053_v7 = vld [vmem:[%s5371_s0 + $0x200] ss:$12 sps:$4 sm:$0xff]  }
 0x4b1   :  { %2516 = vmatmul.mubr.bf16.gmra.mxu1 %v4003_v11  ;;  %v3691_v13 = vpop.f32.mrf.mxu0  ;;  %v4055_v11 = vld [vmem:[%s5371_s0 + $0x218] ss:$12 sps:$4 sm:$0xff]  }
 0x4b2   :  { %2523 = vmatprep.mubr.bf16.mxu1 %v4004_v12  ;;  %v4057_v12 = vld [vmem:[%s5371_s0 + $0x230] ss:$12 sps:$4 sm:$0xff]  }
 0x4b3   :  { %v2415_v33 = vpop.f32.mrf.mxu0 }
 0x4b5   :  { %v3692_v14 = vpop.f32.mrf.mxu0 }
 0x4b6   :  { %v2453_v16 = vpack.c.bf16 %v3692_v14, %v3691_v13  ;;  %v4056_v13 = vld [vmem:[%s5371_s0 + $0x1cc] ss:$12 sps:$4 sm:$0xff]   ;;  %v4059_v14 = vld [vmem:[%s5371_s0 + $0x1e4] ss:$12 sps:$4 sm:$0xff]  }
 0x4b7   :  { %v2418_v32 = vpop.f32.mrf.mxu0 }
 0x4b8   :  { %3693 = vmatprep.subr.bf16.mxu0 %v2453_v16  ;;  %v2452_v60 = vpack.c.bf16 %v2418_v32, %v2415_v33  ;;  %v4058_v33 = vld [vmem:[%s5371_s0 + $0x1c8] ss:$12 sps:$4 sm:$0xff]  }
 0x4b9   :  { %2524 = vmatmul.mubr.bf16.gmra.mxu1 %v4005_v18  ;;  %3694 = vmatpush3.bf16.msra.mxu0 %v2453_v16  ;;  %v4060_v16 = vld [vmem:[%s5371_s0 + $0x1e0] ss:$12 sps:$4 sm:$0xff]   ;;  %v4061_v32 = vld [vmem:[%s5371_s0 + $0x1fc] ss:$12 sps:$4 sm:$0xff]  }
 0x4ba   :  { %3695 = vmatprep.subr.bf16.mxu0 %v2452_v60  ;;  %2531 = vmatprep.mubr.bf16.mxu1 %v4006_v19  ;;  %v4063_v18 = vld [vmem:[%s5371_s0 + $0x214] ss:$12 sps:$4 sm:$0xff]   ;;  %v4065_v19 = vld [vmem:[%s5371_s0 + $0x22c] ss:$12 sps:$4 sm:$0xff]  }
 0x4bd   :  { %3696 = vmatpush3.bf16.msra.mxu0 %v2452_v60  ;;  %v4062_v60 = vld [vmem:[%s5371_s0 + $0x1f8] ss:$12 sps:$4 sm:$0xff]  }
 0x4be   :  { %3697 = vmatprep.subr.bf16.mxu0 %v2451_v10 }
 0x4c1   :  { %2532 = vmatmul.mubr.bf16.gmra.mxu1 %v4007_v50  ;;  %3698 = vmatpush3.bf16.msra.mxu0 %v2451_v10  ;;  %v4064_v10 = vld [vmem:[%s5371_s0 + $0x210] ss:$12 sps:$4 sm:$0xff]  }
 0x4c2   :  { %3699 = vmatprep.subr.bf16.mxu0 %v2450_v21  ;;  %2539 = vmatprep.mubr.bf16.mxu1 %v4008_v25 }
 0x4c5   :  { %3700 = vmatpush3.bf16.msra.mxu0 %v2450_v21  ;;  %v4066_v21 = vld [vmem:[%s5371_s0 + $0x228] ss:$12 sps:$4 sm:$0xff]  }
 0x4c6   :  { %3701 = vmatprep.subr.bf16.mxu0 %v2449_v27 }
 0x4c9   :  { %2540 = vmatmul.mubr.bf16.gmra.mxu1 %v4009_v39  ;;  %3702 = vmatpush3.bf16.msra.mxu0 %v2449_v27 }
 0x4ca   :  { %3703 = vmatprep.subr.bf16.mxu0 %v2448_v29  ;;  %2547 = vmatprep.mubr.bf16.mxu1 %v4010_v31 }
 0x4cd   :  { %3704 = vmatpush3.bf16.msra.mxu0 %v2448_v29 }
 0x4ce   :  { %3705 = vmatprep.subr.bf16.mxu0 %v2447_v34 }
 0x4d1   :  { %2548 = vmatmul.mubr.bf16.gmra.mxu1 %v4011_v36  ;;  %3706 = vmatpush3.bf16.msra.mxu0 %v2447_v34 }
 0x4d2   :  { %3707 = vmatprep.subr.bf16.mxu0 %v2446_v35  ;;  %2555 = vmatprep.mubr.bf16.mxu1 %v4012_v37 }
 0x4d5   :  { %3708 = vmatpush3.bf16.msra.mxu0 %v2446_v35 }
 0x4d8   :  { %3710 = vmatmul.mubr.bf16.vlgmr.msra.gmra.mxu0 %v4013_v17 }
 0x4d9   :  { %2556 = vmatmul.mubr.bf16.gmra.mxu1 %v4014_v22  ;;  %3713 = vmatprep.mubr.bf16.mxu0 %v4015_v40 }
 0x4da   :  { %2563 = vmatprep.mubr.bf16.mxu1 %v4016_v43 }
 0x4e0   :  { %3714 = vmatmul.mubr.bf16.gmra.mxu0 %v4017_v44 }
 0x4e1   :  { %2564 = vmatmul.mubr.bf16.gmra.mxu1 %v4018_v20  ;;  %3717 = vmatprep.mubr.bf16.mxu0 %v4019_v45 }
 0x4e2   :  { %2571 = vmatprep.mubr.bf16.mxu1 %v4020_v8 }
 0x4e8   :  { %3718 = vmatmul.mubr.bf16.gmra.mxu0 %v4021_v41 }
 0x4e9   :  { %2572 = vmatmul.mubr.bf16.gmra.mxu1 %v4022_v46  ;;  %3721 = vmatprep.mubr.bf16.mxu0 %v4023_v42 }
 0x4ea   :  { %2579 = vmatprep.mubr.bf16.mxu1 %v4024_v47 }
 0x4f0   :  { %3722 = vmatmul.mubr.bf16.gmra.mxu0 %v4025_v38 }
 0x4f1   :  { %2580 = vmatmul.mubr.bf16.gmra.mxu1 %v4026_v48  ;;  %3725 = vmatprep.mubr.bf16.mxu0 %v4027_v49 }
 0x4f2   :  { %2587 = vmatprep.mubr.bf16.mxu1 %v4028_v51 }
 0x4f8   :  { %3726 = vmatmul.mubr.bf16.gmra.mxu0 %v4029_v23 }
 0x4f9   :  { %2588 = vmatmul.mubr.bf16.gmra.mxu1 %v4030_v52  ;;  %3729 = vmatprep.mubr.bf16.mxu0 %v4031_v15  ;;  %v4068_v52 = vmov 1983009808  }
 0x4fa   :  { %2595 = vmatprep.mubr.bf16.mxu1 %v4032_v53  ;;  %v2913_v15 = vunpack.c.l.s4 %v4068_v52  ;;  %v2915_v53 = vlaneseq }
 0x500   :  { %3730 = vmatmul.mubr.bf16.gmra.mxu0 %v4033_v54 }
 0x501   :  { %2596 = vmatmul.mubr.bf16.gmra.mxu1 %v4034_v55  ;;  %3733 = vmatprep.mubr.bf16.mxu0 %v4035_v56  ;;  %v2914_v55 = vunpack.c.0.s8 %v2913_v15  ;;  %v2916_v56 = vshrl.u32 %v2915_v53, 7 }
 0x502   :  { %2603 = vmatprep.mubr.bf16.mxu1 %v4036_v57 }
 0x508   :  { %3734 = vmatmul.mubr.bf16.gmra.mxu0 %v4037_v24  ;;  %v2917_v24 = vsub.s32 %v2914_v55, %v2916_v56 }
 0x509   :  { %2604 = vmatmul.mubr.bf16.gmra.mxu1 %v4038_v30  ;;  %3737 = vmatprep.mubr.bf16.mxu0 %v4039_v59  ;;  %v2909_v30 = vld [vmem:[%s5374_s4] sm:$0x3f] }
 0x50a   :  { %2611 = vmatprep.mubr.bf16.mxu1 %v4040_v61  ;;  %v5132_v61 = vrot.slane %v2909_v30, %v2917_v24 }
 0x50c   :  { %5377 = vst [vmem:[#allocation2_spill] sm:$0xff] %v5132_v61 }
 0x510   :  { %3738 = vmatmul.mubr.bf16.gmra.mxu0 %v4041_v62 }
 0x511   :  { %2612 = vmatmul.mubr.bf16.gmra.mxu1 %v4042_v58  ;;  %3741 = vmatprep.mubr.bf16.mxu0 %v4043_v28  ;;  %v2926_v58 = vcombine.high %v5132_v61, %v5132_v61  ;;  %v5141_v28 = vld [vmem:[%s5373_s3 + $0x2] ss:$0 sm:$0xff] }
 0x512   :  { %2619 = vmatprep.mubr.bf16.mxu1 %v4044_v63 }
 0x518   :  { %3742 = vmatmul.mubr.bf16.gmra.mxu0 %v4045_v1 }
 0x519   :  { %2620 = vmatmul.mubr.bf16.gmra.mxu1 %v4046_v2  ;;  %3745 = vmatprep.mubr.bf16.mxu0 %v4047_v0  ;;  %v2911_v0 = vcombine.high %v2909_v30, %v2909_v30 }
 0x51a   :  { %2627 = vmatprep.mubr.bf16.mxu1 %v4048_v26 }
 0x520   :  { %3746 = vmatmul.mubr.bf16.gmra.mxu0 %v4049_v3 }
 0x521   :  { %2628 = vmatmul.mubr.bf16.gmra.mxu1 %v4050_v4  ;;  %3749 = vmatprep.mubr.bf16.mxu0 %v4051_v6 }
 0x522   :  { %2635 = vmatprep.mubr.bf16.mxu1 %v4052_v5  ;;  %v5149_v5 = vrot.slane %v2911_v0, %v2917_v24 }
 0x524   :  { %5379 = vst [vmem:[#allocation4_spill] sm:$0xff] %v5149_v5 }
 0x528   :  { %3750 = vmatmul.mubr.bf16.gmra.mxu0 %v4053_v7 }
 0x529   :  { %2636 = vmatmul.mubr.bf16.gmra.mxu1 %v4054_v9  ;;  %3753 = vmatprep.mubr.bf16.mxu0 %v4055_v11 }
 0x52a   :  { %2643 = vmatprep.mubr.bf16.mxu1 %v4056_v13 }
 0x530   :  { %3754 = vmatmul.mubr.bf16.gmra.mxu0 %v4057_v12 }
 0x531   :  { %2644 = vmatmul.mubr.bf16.gmra.mxu1 %v4058_v33  ;;  %2994 = vmatprep.mubr.f32.mxu0 %v2926_v58 }
 0x532   :  { %2651 = vmatprep.mubr.bf16.mxu1 %v4059_v14 }
 0x539   :  { %2652 = vmatmul.mubr.bf16.gmra.mxu1 %v4060_v16 }
 0x53a   :  { %2659 = vmatprep.mubr.bf16.mxu1 %v4061_v32 }
 0x541   :  { %2660 = vmatmul.mubr.bf16.gmra.mxu1 %v4062_v60 }
 0x542   :  { %2667 = vmatprep.mubr.bf16.mxu1 %v4063_v18 }
 0x549   :  { %2668 = vmatmul.mubr.bf16.gmra.mxu1 %v4064_v10 }
 0x54a   :  { %2675 = vmatprep.mubr.bf16.mxu1 %v4065_v19 }
 0x551   :  { %2676 = vmatmul.mubr.bf16.gmra.mxu1 %v4066_v21 }
 0x559   :  { %v2493_v50 = vpop.f32.mrf.mxu1 }
 0x55a   :  { %v2494_v26 = vadd.f32 %v5141_v28, %v2493_v50 }
 0x55b   :  { %v2495_v25 = vpop.f32.mrf.mxu1 }
 0x55d   :  { %v2496_v27 = vpop.f32.mrf.mxu1 }
 0x55e   :  { %v2497_v12 = vadd.f32 %v5141_v28, %v2496_v27 }
 0x55f   :  { %v2498_v29 = vpop.f32.mrf.mxu1 }
 0x561   :  { %v2501_v39 = vpop.f32.mrf.mxu1 }
 0x562   :  { %v2502_v63 = vadd.f32 %v5141_v28, %v2501_v39 }
 0x563   :  { %v2503_v31 = vpop.f32.mrf.mxu1 }
 0x565   :  { %v2504_v34 = vpop.f32.mrf.mxu1 }
 0x566   :  { %v2505_v7 = vadd.f32 %v5141_v28, %v2504_v34 }
 0x567   :  { %v2506_v35 = vpop.f32.mrf.mxu1 }
 0x569   :  { %v2509_v36 = vpop.f32.mrf.mxu1 }
 0x56a   :  { %v2510_v19 = vadd.f32 %v5141_v28, %v2509_v36 }
 0x56b   :  { %v2511_v37 = vpop.f32.mrf.mxu1 }
 0x56d   :  { %v2512_v17 = vpop.f32.mrf.mxu1 }
 0x56e   :  { %v2513_v34 = vadd.f32 %v5141_v28, %v2512_v17 }
 0x56f   :  { %v2514_v22 = vpop.f32.mrf.mxu1 }
 0x571   :  { %v2517_v40 = vpop.f32.mrf.mxu1 }
 0x572   :  { %v2518_v32 = vadd.f32 %v5141_v28, %v2517_v40 }
 0x573   :  { %v2519_v43 = vpop.f32.mrf.mxu1 }
 0x575   :  { %v2520_v44 = vpop.f32.mrf.mxu1 }
 0x576   :  { %v2521_v27 = vadd.f32 %v5141_v28, %v2520_v44 }
 0x577   :  { %v2522_v20 = vpop.f32.mrf.mxu1 }
 0x579   :  { %v5115_v45 = vpop.f32.mrf.mxu1 }
 0x57b   :  { %v2527_v8 = vpop.f32.mrf.mxu1 }
 0x57d   :  { %v5117_v41 = vpop.f32.mrf.mxu1 }
 0x57f   :  { %v2530_v46 = vpop.f32.mrf.mxu1 }
 0x581   :  { %v5119_v42 = vpop.f32.mrf.mxu1 }
 0x583   :  { %v2535_v47 = vpop.f32.mrf.mxu1 }
 0x585   :  { %v5121_v38 = vpop.f32.mrf.mxu1 }
 0x587   :  { %v2538_v48 = vpop.f32.mrf.mxu1 }
 0x589   :  { %v5123_v49 = vpop.f32.mrf.mxu1 }
 0x58b   :  { %v2543_v51 = vpop.f32.mrf.mxu1 }
 0x58d   :  { %v5125_v23 = vpop.f32.mrf.mxu1 }
 0x58f   :  { %v2546_v54 = vpop.f32.mrf.mxu1 }
 0x591   :  { %v5127_v57 = vpop.f32.mrf.mxu1 }
 0x593   :  { %v2551_v59 = vpop.f32.mrf.mxu1 }
 0x595   :  { %v5134_v62 = vpop.f32.mrf.mxu1 }
 0x597   :  { %v2554_v1 = vpop.f32.mrf.mxu1 }
 0x598   :  { %v3711_v2 = vpop.f32.mrf.mxu0 }
 0x599   :  { %v5145_v3 = vpop.f32.mrf.mxu1  ;;  %v5147_v4 = vadd.f32 %v3711_v2, %v2502_v63 }
 0x59a   :  { %v2718_v6 = vpop.f32.mrf.mxu0 }
 0x59b   :  { %5378 = vst [vmem:[#allocation3_spill] sm:$0xff] %v5147_v4  ;;  %v2559_v9 = vpop.f32.mrf.mxu1  ;;  %v5152_v11 = vadd.f32 %v2718_v6, %v2494_v26 }
 0x59c   :  { %v3712_v13 = vpop.f32.mrf.mxu0 }
 0x59d   :  { %5380 = vst [vmem:[#allocation5_spill] sm:$0xff] %v5152_v11  ;;  %v5155_v33 = vpop.f32.mrf.mxu1  ;;  %v5157_v14 = vadd.f32 %v3712_v13, %v2505_v7 }
 0x59e   :  { %v2721_v16 = vpop.f32.mrf.mxu0 }
 0x59f   :  { %v2562_v60 = vpop.f32.mrf.mxu1  ;;  %v5160_v18 = vadd.f32 %v2721_v16, %v2497_v12 }
 0x5a0   :  { %v3715_v10 = vpop.f32.mrf.mxu0 }
 0x5a1   :  { %5381 = vst [vmem:[#allocation6_spill] sm:$0xff] %v5160_v18  ;;  %v5163_v21 = vpop.f32.mrf.mxu1  ;;  %v5165_v50 = vadd.f32 %v3715_v10, %v2518_v32 }
 0x5a2   :  { %v2734_v25 = vpop.f32.mrf.mxu0 }
 0x5a3   :  { %v2567_v29 = vpop.f32.mrf.mxu1  ;;  %v5168_v39 = vadd.f32 %v2734_v25, %v2510_v19 }
 0x5a4   :  { %v3716_v31 = vpop.f32.mrf.mxu0 }
 0x5a5   :  { %v5171_v35 = vpop.f32.mrf.mxu1  ;;  %v5173_v37 = vadd.f32 %v3716_v31, %v2521_v27 }
 0x5a6   :  { %v2737_v22 = vpop.f32.mrf.mxu0 }
 0x5a7   :  { %v2570_v40 = vpop.f32.mrf.mxu1  ;;  %v5175_v36 = vadd.f32 %v2737_v22, %v2513_v34 }
 0x5a8   :  { %v5177_v43 = vpop.f32.mrf.mxu0 }
 0x5a9   :  { %v5179_v20 = vpop.f32.mrf.mxu1 }
 0x5aa   :  { %v5181_v8 = vpop.f32.mrf.mxu0 }
 0x5ab   :  { %v2575_v44 = vpop.f32.mrf.mxu1 }
 0x5ac   :  { %v5183_v46 = vpop.f32.mrf.mxu0 }
 0x5ad   :  { %v5185_v47 = vpop.f32.mrf.mxu1 }
 0x5ae   :  { %v5187_v17 = vpop.f32.mrf.mxu0 }
 0x5af   :  { %v2578_v48 = vpop.f32.mrf.mxu1 }
 0x5b0   :  { %v3723_v51 = vpop.f32.mrf.mxu0 }
 0x5b1   :  { %v5189_v52 = vpop.f32.mrf.mxu1 }
 0x5b2   :  { %v5191_v15 = vpop.f32.mrf.mxu0 }
 0x5b3   :  { %v2583_v53 = vpop.f32.mrf.mxu1 }
 0x5b4   :  { %v3724_v54 = vpop.f32.mrf.mxu0 }
 0x5b5   :  { %v5193_v55 = vpop.f32.mrf.mxu1 }
 0x5b6   :  { %v2769_v56 = vpop.f32.mrf.mxu0 }
 0x5b7   :  { %v2586_v24 = vpop.f32.mrf.mxu1 }
 0x5b8   :  { %v5195_v30 = vpop.f32.mrf.mxu0 }
 0x5b9   :  { %v5197_v59 = vpop.f32.mrf.mxu1 }
 0x5ba   :  { %v5199_v58 = vpop.f32.mrf.mxu0 }
 0x5bb   :  { %5382 = vst [vmem:[#allocation7_spill] sm:$0xff] %v5199_v58  ;;  %v2591_v63 = vpop.f32.mrf.mxu1 }
 0x5bc   :  { %v5201_v1 = vpop.f32.mrf.mxu0 }
 0x5bd   :  { %v2592_v2 = vpop.f32.mrf.mxu1 }
 0x5be   :  { %v5203_v0 = vpop.f32.mrf.mxu0 }
 0x5bf   :  { %v2594_v26 = vpop.f32.mrf.mxu1 }
 0x5c0   :  { %v5205_v6 = vpop.f32.mrf.mxu0 }
 0x5c1   :  { %v2597_v7 = vpop.f32.mrf.mxu1 }
 0x5c2   :  { %v5207_v9 = vpop.f32.mrf.mxu0 }
 0x5c3   :  { %v2599_v13 = vpop.f32.mrf.mxu1 }
 0x5c4   :  { %v5209_v12 = vpop.f32.mrf.mxu0 }
 0x5c5   :  { %v2600_v16 = vpop.f32.mrf.mxu1 }
 0x5c6   :  { %v5211_v32 = vpop.f32.mrf.mxu0 }
 0x5c7   :  { %v2602_v60 = vpop.f32.mrf.mxu1 }
 0x5c8   :  { %v3735_v10 = vpop.f32.mrf.mxu0  ;;  %v2553_v60 = vadd.f32 %v5141_v28, %v5134_v62 }
 0x5c9   :  { %v2605_v19 = vpop.f32.mrf.mxu1 }
 0x5ca   :  { %v5213_v25 = vpop.f32.mrf.mxu0  ;;  %v2778_v11 = vadd.f32 %v3724_v54, %v2553_v60  ;;  %v2606_v62 = vadd.f32 %v5141_v28, %v2605_v19  ;;  %v2593_v19 = vadd.f32 %v5141_v28, %v2592_v2 }
 0x5cb   :  { %v2607_v27 = vpop.f32.mrf.mxu1 }
 0x5cc   :  { %v3736_v29 = vpop.f32.mrf.mxu0  ;;  %v2550_v27 = vadd.f32 %v5141_v28, %v5127_v57  ;;  %v2542_v57 = vadd.f32 %v5141_v28, %v5123_v49  ;;  %v2534_v49 = vadd.f32 %v5141_v28, %v5119_v42  ;;  %v2590_v42 = vadd.f32 %v5141_v28, %v5197_v59 }
 0x5cd   :  { %v2608_v31 = vpop.f32.mrf.mxu1 }
 0x5ce   :  { %v2817_v34 = vpop.f32.mrf.mxu0 }
 0x5cf   :  { %v2610_v22 = vpop.f32.mrf.mxu1 }
 0x5d0   :  { %v3739_v40 = vpop.f32.mrf.mxu0 }
 0x5d1   :  { %v2613_v44 = vpop.f32.mrf.mxu1 }
 0x5d2   :  { %v2830_v48 = vpop.f32.mrf.mxu0  ;;  %v2614_v26 = vadd.f32 %v5141_v28, %v2613_v44  ;;  %v2545_v44 = vadd.f32 %v5141_v28, %v5125_v23  ;;  %v2537_v23 = vadd.f32 %v5141_v28, %v5121_v38  ;;  %v2529_v38 = vadd.f32 %v5141_v28, %v5117_v41 }
 0x5d3   :  { %v2615_v53 = vpop.f32.mrf.mxu1  ;;  %v2585_v41 = vadd.f32 %v5141_v28, %v5193_v55  ;;  %v2577_v55 = vadd.f32 %v5141_v28, %v5185_v47  ;;  %v2569_v47 = vadd.f32 %v5141_v28, %v5171_v35  ;;  %v2561_v35 = vadd.f32 %v5141_v28, %v5155_v33 }
 0x5d4   :  { %v3740_v63 = vpop.f32.mrf.mxu0  ;;  %v2609_v53 = vadd.f32 %v5141_v28, %v2608_v31  ;;  %v2839_v58 = vadd.f32 %v3739_v40, %v2614_v26  ;;  %v2770_v54 = vadd.f32 %v2769_v56, %v2545_v44  ;;  %v2601_v31 = vadd.f32 %v5141_v28, %v2600_v16 }
 0x5d5   :  { %v2616_v24 = vpop.f32.mrf.mxu1  ;;  %v2762_v56 = vadd.f32 %v5183_v46, %v2537_v23  ;;  %v2818_v46 = vadd.f32 %v2817_v34, %v2593_v19  ;;  %v2754_v2 = vadd.f32 %v5187_v17, %v2529_v38  ;;  %v2810_v17 = vadd.f32 %v5209_v12, %v2585_v41 }
 0x5d6   :  { %v2617_v13 = vadd.f32 %v5141_v28, %v2616_v24  ;;  %v2833_v22 = vpop.f32.mrf.mxu0  ;;  %v2775_v24 = vadd.f32 %v3723_v51, %v2550_v27  ;;  %v2598_v51 = vadd.f32 %v5141_v28, %v2597_v7  ;;  %v2802_v12 = vadd.f32 %v5211_v32, %v2577_v55 }
 0x5d7   :  { %v2618_v5 = vpop.f32.mrf.mxu1  ;;  %v2794_v32 = vadd.f32 %v5201_v1, %v2569_v47  ;;  %v2786_v1 = vadd.f32 %v5203_v0, %v2561_v35  ;;  %v4069_v0 = vmov 0.0  }
 0x5d8   :  { %v2842_v61 = vadd.f32 %v3740_v63, %v2617_v13  ;;  %v2834_v5 = vadd.f32 %v2833_v22, %v2609_v53  ;;  %v2823_v40 = vadd.f32 %v3735_v10, %v2598_v51 }
 0x5d9   :  { %v5221_v18 = vpop.f32.mrf.mxu1 }
 0x5da   :  { %3401 = vmatprep.subr.mxu0 %v2842_v61  ;;  %v2831_v61 = vadd.f32 %v2830_v48, %v2606_v62  ;;  %v2526_v48 = vadd.f32 %v5141_v28, %v5115_v45  ;;  %v2582_v45 = vadd.f32 %v5141_v28, %v5189_v52  ;;  %v2574_v52 = vadd.f32 %v5141_v28, %v5179_v20  ;;  %v5384_v62 = vld [vmem:[#allocation7_spill] sm:$0xff] }
 0x5db   :  { %3402 = vmatpush3.msra.mxu0 %v2778_v11  ;;  %v2623_v4 = vpop.f32.mrf.mxu1  ;;  %v2566_v20 = vadd.f32 %v5141_v28, %v5163_v21  ;;  %v2558_v21 = vadd.f32 %v5141_v28, %v5145_v3 }
 0x5dc   :  { %3403 = vmatprep.subr.mxu0 %v2839_v58  ;;  %v2767_v4 = vadd.f32 %v5191_v15, %v2542_v57  ;;  %v2826_v58 = vadd.f32 %v3736_v29, %v2601_v31  ;;  %v2759_v15 = vadd.f32 %v5177_v43, %v2534_v49  ;;  %v5245_v29 = vpop.f32.mrf.mxu0  ;;  %v2815_v43 = vadd.f32 %v5213_v25, %v2590_v42 }
 0x5dd   :  { %3404 = vmatpush3.msra.mxu0 %v2775_v24  ;;  %v5229_v63 = vpop.f32.mrf.mxu1  ;;  %v2751_v26 = vadd.f32 %v5181_v8, %v2526_v48  ;;  %v2807_v25 = vadd.f32 %v5205_v6, %v2582_v45  ;;  %v2799_v6 = vadd.f32 %v5207_v9, %v2574_v52  ;;  %v2783_v33 = vadd.f32 %v5384_v62, %v2558_v21 }
 0x5de   :  { %3405 = vmatprep.subr.mxu0 %v2834_v5  ;;  %v5258_v34 = vpop.f32.mrf.mxu0 }
 0x5df   :  { %3406 = vmatpush3.msra.mxu0 %v2770_v54  ;;  %v2626_v11 = vpop.f32.mrf.mxu1  ;;  %v5387_v54 = vld [vmem:[#allocation2_spill] sm:$0xff] }
 0x5e0   :  { %3407 = vmatprep.subr.mxu0 %v2831_v61  ;;  %v5269_v60 = vpop.f32.mrf.mxu0 }
 0x5e1   :  { %3408 = vmatpush3.msra.mxu0 %v2767_v4  ;;  %v5239_v16 = vpop.f32.mrf.mxu1 }
 0x5e2   :  { %3409 = vmatprep.subr.mxu0 %v2826_v58  ;;  %v5281_v22 = vpop.f32.mrf.mxu0 }
 0x5e3   :  { %3410 = vmatpush3.msra.mxu0 %v2762_v56  ;;  %v2631_v7 = vpop.f32.mrf.mxu1 }
 0x5e4   :  { %3411 = vmatprep.subr.mxu0 %v2823_v40  ;;  %v5289_v53 = vpop.f32.mrf.mxu0 }
 0x5e5   :  { %3412 = vmatpush3.msra.mxu0 %v2759_v15  ;;  %v5252_v10 = vpop.f32.mrf.mxu1 }
 0x5e6   :  { %3413 = vmatprep.subr.mxu0 %v2818_v46  ;;  %v5301_v24 = vpop.f32.mrf.mxu0 }
 0x5e7   :  { %3414 = vmatpush3.msra.mxu0 %v2754_v2  ;;  %v2634_v59 = vpop.f32.mrf.mxu1 }
 0x5e8   :  { %3415 = vmatprep.subr.mxu0 %v2815_v43  ;;  %v5306_v3 = vpop.f32.mrf.mxu0 }
 0x5e9   :  { %3416 = vmatpush3.msra.mxu0 %v2751_v26  ;;  %v5263_v13 = vpop.f32.mrf.mxu1 }
 0x5ea   :  { %3417 = vmatprep.subr.mxu0 %v2810_v17  ;;  %v5311_v23 = vpop.f32.mrf.mxu0 }
 0x5eb   :  { %3418 = vmatpush3.msra.mxu0 %v5173_v37  ;;  %v2639_v8 = vpop.f32.mrf.mxu1 }
 0x5ec   :  { %3419 = vmatprep.subr.mxu0 %v2807_v25  ;;  %v3751_v11 = vpop.f32.mrf.mxu0 }
 0x5ed   :  { %3420 = vmatpush3.msra.mxu0 %v5165_v50  ;;  %v5275_v27 = vpop.f32.mrf.mxu1 }
 0x5ee   :  { %3421 = vmatprep.subr.mxu0 %v2802_v12  ;;  %v2878_v49 = vpop.f32.mrf.mxu0 }
 0x5ef   :  { %3422 = vmatpush3.msra.mxu0 %v5175_v36  ;;  %v2642_v37 = vpop.f32.mrf.mxu1  ;;  %v2791_v36 = vadd.f32 %v5195_v30, %v2566_v20  ;;  %v5385_v30 = vld [vmem:[#allocation6_spill] sm:$0xff] }
 0x5f0   :  { %3423 = vmatprep.subr.mxu0 %v2799_v6  ;;  %v3752_v40 = vpop.f32.mrf.mxu0 }
 0x5f1   :  { %3424 = vmatpush3.msra.mxu0 %v5168_v39  ;;  %v5287_v50 = vpop.f32.mrf.mxu1  ;;  %v5383_v39 = vld [vmem:[#allocation3_spill] sm:$0xff] }
 0x5f2   :  { %3425 = vmatprep.subr.mxu0 %v2794_v32  ;;  %v2881_v7 = vpop.f32.mrf.mxu0  ;;  %v2646_v62 = vadd.f32 %v5141_v28, %v5287_v50  ;;  %v2633_v50 = vadd.f32 %v5141_v28, %v5252_v10  ;;  %v2622_v10 = vadd.f32 %v5141_v28, %v5221_v18 }
 0x5f3   :  { %3426 = vmatpush3.msra.mxu0 %v5157_v14  ;;  %v2647_v9 = vpop.f32.mrf.mxu1  ;;  %v5386_v14 = vld [vmem:[#allocation5_spill] sm:$0xff] }
 0x5f4   :  { %3427 = vmatprep.subr.mxu0 %v2791_v36  ;;  %v3755_v46 = vpop.f32.mrf.mxu0 }
 0x5f5   :  { %3428 = vmatpush3.msra.mxu0 %v5383_v39  ;;  %v5299_v44 = vpop.f32.mrf.mxu1 }
 0x5f6   :  { %3429 = vmatprep.subr.mxu0 %v2786_v1  ;;  %v2894_v41 = vpop.f32.mrf.mxu0  ;;  %v2649_v1 = vadd.f32 %v5141_v28, %v5299_v44  ;;  %v2638_v44 = vadd.f32 %v5141_v28, %v5263_v13  ;;  %v2625_v13 = vadd.f32 %v5141_v28, %v5229_v63  ;;  %v2847_v63 = vadd.f32 %v5258_v34, %v2622_v10  ;;  %v3248_v34 = vld [vmem:[%s5373_s3 + $0x4] ss:$0 sm:$0xff] }
 0x5f7   :  { %3430 = vmatpush3.msra.mxu0 %v5385_v30  ;;  %v2650_v5 = vpop.f32.mrf.mxu1  ;;  %v2641_v30 = vadd.f32 %v5141_v28, %v5275_v27  ;;  %v2630_v27 = vadd.f32 %v5141_v28, %v5239_v16 }
 0x5f8   :  { %3431 = vmatprep.subr.mxu0 %v2783_v33  ;;  %v3756_v59 = vpop.f32.mrf.mxu0  ;;  %v2874_v5 = vadd.f32 %v5306_v3, %v2649_v1  ;;  %v2863_v3 = vadd.f32 %v5301_v24, %v2638_v44  ;;  %v2850_v16 = vadd.f32 %v5281_v22, %v2625_v13 }
 0x5f9   :  { %3432 = vmatpush3.msra.mxu0 %v5386_v14  ;;  %v2653_v57 = vpop.f32.mrf.mxu1  ;;  %v2871_v14 = vadd.f32 %v5289_v53, %v2646_v62  ;;  %v2858_v53 = vadd.f32 %v5269_v60, %v2633_v50  ;;  %v5388_v60 = vld [vmem:[#allocation4_spill] sm:$0xff] }
 0x5fa   :  { %3757 = vmatprep.subr.mxu0 %v4069_v0  ;;  %2995 = vmatmul.mubr.f32.vlgmr.msra.gmra.mxu0 %v5387_v54  ;;  %v2897_v52 = vpop.f32.mrf.mxu0  ;;  %v2654_v9 = vadd.f32 %v5141_v28, %v2653_v57  ;;  %v2866_v57 = vadd.f32 %v5311_v23, %v2641_v30  ;;  %v2855_v54 = vadd.f32 %v5245_v29, %v2630_v27 }
 0x5fb   :  { %v2655_v31 = vpop.f32.mrf.mxu1  ;;  %3789 = vmatprep.mubr.msk.f32.mxu0 %vm4070_vm1, %v4069_v0 }
 0x5fc   :  { %v2879_v33 = vadd.f32 %v2878_v49, %v2654_v9  ;;  %v3247_v31 = vld [vmem:[%s5373_s3 + $0x3] ss:$0 sm:$0xff] }
 0x5fd   :  { %v2656_v61 = vpop.f32.mrf.mxu1 }
 0x5fe   :  { %v2657_v35 = vadd.f32 %v5141_v28, %v2656_v61 }
 0x5ff   :  { %v2658_v4 = vpop.f32.mrf.mxu1 }
 0x600   :  { %v2882_v39 = vadd.f32 %v2881_v7, %v2657_v35 }
 0x601   :  { %v2661_v51 = vpop.f32.mrf.mxu1 }
 0x602   :  { %v2662_v20 = vadd.f32 %v5141_v28, %v2661_v51 }
 0x603   :  { %v2663_v58 = vpop.f32.mrf.mxu1 }
 0x604   :  { %v2887_v21 = vadd.f32 %v3751_v11, %v2662_v20 }
 0x605   :  { %v2664_v56 = vpop.f32.mrf.mxu1 }
 0x606   :  { %v2665_v6 = vadd.f32 %v5141_v28, %v2664_v56 }
 0x607   :  { %v2666_v19 = vpop.f32.mrf.mxu1 }
 0x608   :  { %v2890_v36 = vadd.f32 %v3752_v40, %v2665_v6 }
 0x609   :  { %v2669_v38 = vpop.f32.mrf.mxu1 }
 0x60a   :  { %v2670_v12 = vadd.f32 %v5141_v28, %v2669_v38 }
 0x60b   :  { %v2671_v15 = vpop.f32.mrf.mxu1 }
 0x60c   :  { %v2895_v32 = vadd.f32 %v2894_v41, %v2670_v12 }
 0x60d   :  { %v2672_v42 = vpop.f32.mrf.mxu1 }
 0x60e   :  { %v2673_v25 = vadd.f32 %v5141_v28, %v2672_v42 }
 0x60f   :  { %v2674_v48 = vpop.f32.mrf.mxu1 }
 0x610   :  { %v2898_v37 = vadd.f32 %v2897_v52, %v2673_v25 }
 0x611   :  { %v2677_v2 = vpop.f32.mrf.mxu1 }
 0x612   :  { %v2678_v45 = vadd.f32 %v5141_v28, %v2677_v2 }
 0x613   :  { %v2679_v43 = vpop.f32.mrf.mxu1 }
 0x614   :  { %v2903_v47 = vadd.f32 %v3755_v46, %v2678_v45 }
 0x615   :  { %v2680_v26 = vpop.f32.mrf.mxu1 }
 0x616   :  { %v2681_v17 = vadd.f32 %v5141_v28, %v2680_v26 }
 0x617   :  { %v2682_v55 = vpop.f32.mrf.mxu1 }
 0x618   :  { %v2906_v8 = vadd.f32 %v3756_v59, %v2681_v17 }
 0x61a   :  { %3758 = vmatpush3.msra.mxu0 %v2906_v8 }
 0x61b   :  { %3759 = vmatprep.subr.mxu0 %v4069_v0 }
 0x61c   :  { %3760 = vmatpush3.msra.mxu0 %v2903_v47 }
 0x61d   :  { %3761 = vmatprep.subr.mxu0 %v4069_v0 }
 0x61e   :  { %3762 = vmatpush3.msra.mxu0 %v2898_v37 }
 0x61f   :  { %3763 = vmatprep.subr.mxu0 %v4069_v0 }
 0x620   :  { %3764 = vmatpush3.msra.mxu0 %v2895_v32 }
 0x621   :  { %3765 = vmatprep.subr.mxu0 %v4069_v0 }
 0x622   :  { %3766 = vmatpush3.msra.mxu0 %v2890_v36 }
 0x623   :  { %3767 = vmatprep.subr.mxu0 %v4069_v0 }
 0x624   :  { %3768 = vmatpush3.msra.mxu0 %v2887_v21 }
 0x625   :  { %3769 = vmatprep.subr.mxu0 %v4069_v0 }
 0x626   :  { %3770 = vmatpush3.msra.mxu0 %v2882_v39 }
 0x627   :  { %3771 = vmatprep.subr.mxu0 %v4069_v0 }
 0x628   :  { %3772 = vmatpush3.msra.mxu0 %v2879_v33 }
 0x629   :  { %3773 = vmatprep.subr.mxu0 %v4069_v0 }
 0x62a   :  { %3774 = vmatpush3.msra.mxu0 %v2874_v5 }
 0x62b   :  { %3775 = vmatprep.subr.mxu0 %v4069_v0 }
 0x62c   :  { %3776 = vmatpush3.msra.mxu0 %v2871_v14 }
 0x62d   :  { %3777 = vmatprep.subr.mxu0 %v4069_v0 }
 0x62e   :  { %3778 = vmatpush3.msra.mxu0 %v2866_v57 }
 0x62f   :  { %3779 = vmatprep.subr.mxu0 %v4069_v0 }
 0x630   :  { %3780 = vmatpush3.msra.mxu0 %v2863_v3 }
 0x631   :  { %3781 = vmatprep.subr.mxu0 %v4069_v0 }
 0x632   :  { %3782 = vmatpush3.msra.mxu0 %v2858_v53 }
 0x633   :  { %3783 = vmatprep.subr.mxu0 %v4069_v0 }
 0x634   :  { %3784 = vmatpush3.msra.mxu0 %v2855_v54 }
 0x635   :  { %3785 = vmatprep.subr.mxu0 %v4069_v0 }
 0x636   :  { %3786 = vmatpush3.msra.mxu0 %v2850_v16 }
 0x637   :  { %3787 = vmatprep.subr.mxu0 %v4069_v0 }
 0x638   :  { %3788 = vmatpush3.msra.mxu0 %v2847_v63 }
 0x639   :  { %3790 = vmatmul.mubr.f32.vlgmr.msra.gmra.mxu0 %v5388_v60 }
 0x6ba   :  { %v3433_v24 = vpop.f32.mrf.mxu0 }
 0x6bc   :  { %v3434_v28 = vpop.f32.mrf.mxu0 }
 0x6bd   :  { %v3435_v18 = vadd.f32 %v3434_v28, %v3433_v24 }
 0x6f9   :  { %v3066_v29 = vpop.f32.mrf.mxu0 }
 0x6fa   :  { %v3067_v22 = vadd.f32 %v3435_v18, %v3066_v29 }
 0x6fb   :  { %v3791_v61 = vpop.f32.mrf.mxu0 }
 0x6fc   :  { %v3075_v23 = vmul.f32 %v3247_v31, %v3067_v22 }
 0x6fe   :  { %v3077_v4 = vsel %vm3076_vm2, %v3075_v23, 0.0 }
 0x6ff   :  { %3078 = vadd.xlane.f32.xlu0 %v3077_v4 }
 0x788   :  { %v3079_v0 = vpop.xlane.xlu0 %3078 }
 0x789   :  { %v3085_v11 = vadd.f32 %v3248_v34, %v3079_v0 }
 0x78b   :  { %3087 = vst.msk [vmem:[%s5375_s5] sm:$0x3] %vm3086_vm3, %v3085_v11 }

</bundles_post_ra>
